<compile_context>
chip_gen: v7x
topology: tpu7x:2x2x1
jax: 0.10.0
libtpu: 0.0.40
codegen_flags: <defaults>
</compile_context>

<pallas_src>
import functools

import jax
import jax.numpy as jnp
from jax import lax
from jax.experimental import pallas as pl
from jax.experimental.pallas import tpu as pltpu


# ------------------------------- Pallas kernel ------------------------------ #
def _ae_fused_kernel(x_ref, *refs, slopes):
    """Whole-network forward on one batch block.

    refs = [M_0, RT_0, sh_0, ..., M_L, RT_L, sh_L, out_ref, in_scr, out_scr]
    x_ref  : (NB, C0*H, W)      (free reshape of NCHW)
    out_ref: (NB, Cout*OH, OW)
    """
    out_ref, in_scr, out_scr = refs[-3], refs[-2], refs[-1]
    lrefs = refs[:-3]
    nb, _, w0 = x_ref.shape

    # (NB, C0*H, W) -> (C0*H, NB*W): batch moves from sublanes to lanes, inside VMEM.
    for n in range(nb):
        in_scr[:, n * w0:(n + 1) * w0] = x_ref[n]
    x = in_scr[...]                                   # (Ci*H, NB*W) f32 activation tile

    for l, slope in enumerate(slopes):
        m_ref, rt_ref, sh_ref = lrefs[3 * l:3 * l + 3]
        s = m_ref.shape[0] // 3                       # Co*OH rows per kw tap (mult. of 8)
        # One stacked LHS matmul for all 3 kw taps: (3*Co*OH, Ci*H) @ (Ci*H, NB*W).
        z = jnp.dot(m_ref[...], x, preferred_element_type=jnp.float32)
        acc = None
        for kw in range(3):                           # free sublane slices of z
            t = jnp.dot(z[kw * s:(kw + 1) * s, :], rt_ref[kw],
                        preferred_element_type=jnp.float32)   # (Co*OH, NB*OW)
            acc = t if acc is None else acc + t
        y = acc + sh_ref[...]                         # folded conv bias / BatchNorm shift
        if slope is not None:                         # LeakyReLU(0.2); final layer: none
            y = jnp.where(y > 0, y, slope * y)
        x = y                                         # next layer's (Ci*H, NB*W) tile

    # (Cout*OH, NB*OW) -> (NB, Cout*OH, OW): lanes back to sublane-major batch, in VMEM.
    out_scr[...] = x
    ow = out_ref.shape[2]
    for n in range(nb):
        out_ref[n, :, :] = out_scr[:, n * ow:(n + 1) * ow]


# -------------------- constant (tap / gather / affine) folding -------------------- #
def _taps_conv(out_sz, in_sz):
    # A[k, o, i] = 1  iff  i == 2*o + k - 1        (Conv2d k=3, stride 2, pad 1)
    k = jnp.arange(3)[:, None, None]
    o = jnp.arange(out_sz)[None, :, None]
    i = jnp.arange(in_sz)[None, None, :]
    return (i == 2 * o + k - 1).astype(jnp.float32)


def _taps_deconv(out_sz, in_sz):
    # C[k, o, i] = 1  iff  2*i == o + 1 - k        (ConvTranspose2d k=3, s=2, p=1, op=1)
    k = jnp.arange(3)[:, None, None]
    o = jnp.arange(out_sz)[None, :, None]
    i = jnp.arange(in_sz)[None, None, :]
    return (2 * i == o + 1 - k).astype(jnp.float32)


def _fold_affine(p):
    """Fold conv bias + (eval-mode) BatchNorm into per-channel (scale, shift)."""
    eps = 1e-5
    if p["bn"]:
        s = p["gamma"] / jnp.sqrt(p["var"] + eps)
        return s, s * (p["b"] - p["mean"]) + p["beta"]
    return jnp.ones_like(p["b"]), p["b"]


def build_layer_constants(params, nb, H, W):
    """Per layer: M_stack (3*Co*OH, Ci*H), RT (3, NB*W, NB*OW), shift (Co*OH, 1) + slope."""
    consts, slopes = [], []
    h, w = H, W
    eye = jnp.eye(nb, dtype=jnp.float32)
    for p in params:
        cin, cout = p["cin"], p["cout"]
        if p["kind"] == "conv":
            oh, ow = h // 2, w // 2
            A, B = _taps_conv(oh, h), _taps_conv(ow, w)
            wm = p["w"]                                   # (Cout, Cin, kh, kw)  (OIHW)
        else:
            oh, ow = 2 * h, 2 * w
            A, B = _taps_deconv(oh, h), _taps_deconv(ow, w)
            wm = jnp.transpose(p["w"], (1, 0, 2, 3))      # IOHW -> (Cout, Cin, kh, kw)
        scale, shift = _fold_affine(p)
        wm = wm * scale[:, None, None, None]              # fold BN scale into the weights
        # M_stack[(kw,co,oh), (ci,ih)] = sum_kh wm[co,ci,kh,kw] * A[kh,oh,ih]
        m = jnp.einsum("abkq,kuh->qaubh", wm, A).reshape(3 * cout * oh, cin * h)
        # RT[kw, (n,iw), (m,ow)] = delta_{nm} * B[kw,ow,iw]  (fixed small-NB kron)
        rt = jnp.einsum("qow,nm->qnwmo", B, eye).reshape(3, nb * w, nb * ow)
        sh = jnp.repeat(shift, oh).reshape(cout * oh, 1)
        consts.append((m, rt, sh))
        slopes.append(p["act"])
        h, w = oh, ow
    return consts, tuple(slopes), (h, w)


# ---------------------------------- wrapper ---------------------------------- #
def autoencoder_forward(x_nchw, params, nb=32):
    N, C0, H0, W0 = x_nchw.shape
    assert N % nb == 0, "batch must be a multiple of the per-block batch nb"
    consts, slopes, (oh, ow) = build_layer_constants(params, nb, H0, W0)
    cout = params[-1]["cout"]

    # Free reshape only (no transpose, no extra XLA launch): NCHW -> (N, C0*H, W).
    x3 = x_nchw.astype(jnp.float32).reshape(N, C0 * H0, W0)

    inputs = [x3]
    in_specs = [pl.BlockSpec((nb, C0 * H0, W0), lambda b: (b, 0, 0))]
    for m, rt, sh in consts:
        inputs += [m, rt, sh]
        in_specs += [pl.BlockSpec(m.shape, lambda b: (0, 0)),        # resident constants
                     pl.BlockSpec(rt.shape, lambda b: (0, 0, 0)),
                     pl.BlockSpec(sh.shape, lambda b: (0, 0))]

    out3 = pl.pallas_call(
        functools.partial(_ae_fused_kernel, slopes=slopes),
        grid=(N // nb,),                                   # batch-block grid axis
        out_shape=jax.ShapeDtypeStruct((N, cout * oh, ow), jnp.float32),
        in_specs=in_specs,
        out_specs=pl.BlockSpec((nb, cout * oh, ow), lambda b: (b, 0, 0)),
        scratch_shapes=[pltpu.VMEM((C0 * H0, nb * W0), jnp.float32),   # input relayout
                        pltpu.VMEM((cout * oh, nb * ow), jnp.float32)],  # output relayout
        compiler_params=pltpu.CompilerParams(
            dimension_semantics=("parallel",)),            # v7x: 2 TCs split batch blocks
    )(*inputs)

    # Free reshape back to NCHW.
    return out3.reshape(N, cout, oh, ow)


# --------------------------- deterministic parameters ----------------------- #
def init_params(key, channels, image_channels):
    specs = []
    ins = [image_channels] + list(channels[:-1])
    for i, (cin, cout) in enumerate(zip(ins, channels)):                 # encoder
        specs.append(dict(kind="conv", cin=cin, cout=cout, bn=(i > 0), act=0.2))
    for i in range(len(channels) - 1, 0, -1):                            # decoder
        specs.append(dict(kind="deconv", cin=channels[i], cout=channels[i - 1],
                          bn=(i > 1), act=0.2))
    specs.append(dict(kind="deconv", cin=channels[0], cout=1, bn=False, act=None))

    params = []
    for spec in specs:
        key, kw, kb, kg, kbe, km, kv = jax.random.split(key, 7)
        cin, cout = spec["cin"], spec["cout"]
        if spec["kind"] == "conv":
            w = 0.1 * jax.random.normal(kw, (cout, cin, 3, 3), jnp.float32)   # OIHW
        else:
            w = 0.1 * jax.random.normal(kw, (cin, cout, 3, 3), jnp.float32)   # IOHW
        p = dict(spec, w=w, b=0.05 * jax.random.normal(kb, (cout,), jnp.float32))
        if spec["bn"]:
            p["gamma"] = 1.0 + 0.1 * jax.random.normal(kg, (cout,), jnp.float32)
            p["beta"] = 0.1 * jax.random.normal(kbe, (cout,), jnp.float32)
            p["mean"] = 0.1 * jax.random.normal(km, (cout,), jnp.float32)
            p["var"] = 1.0 + 0.1 * jax.random.uniform(kv, (cout,), jnp.float32)
        params.append(p)
    return params


# ------------------------------ pure-JAX reference -------------------------- #
def conv_weight_kkio(p):
    if p["kind"] == "conv":
        return jnp.transpose(p["w"], (2, 3, 1, 0))                # OIHW -> HWIO
    return jnp.transpose(p["w"][:, :, ::-1, ::-1], (2, 3, 0, 1))  # flipped IOHW -> HWIO


def reference_forward(x_nchw, params):
    x = jnp.transpose(x_nchw, (0, 2, 3, 1)).astype(jnp.float32)
    dn = ("NHWC", "HWIO", "NHWC")
    for p in params:
        wk = conv_weight_kkio(p)
        if p["kind"] == "conv":
            y = lax.conv_general_dilated(x, wk, (2, 2), ((1, 1), (1, 1)),
                                         dimension_numbers=dn)
        else:
            y = lax.conv_general_dilated(x, wk, (1, 1), ((1, 2), (1, 2)),
                                         lhs_dilation=(2, 2), dimension_numbers=dn)
        scale, shift = _fold_affine(p)
        y = y * scale + shift
        if p["act"] is not None:
            y = jnp.where(y > 0, y, p["act"] * y)
        x = y
    return jnp.transpose(x, (0, 3, 1, 2))


if __name__ == "__main__":
    channels = [4, 8]        # AutoEncoder(channels=[4, 8], image_dim=16)
    image_dim = 16
    image_channels = 1       # cfg.image_channels (decoder reconstructs 1 channel)
    batch = 64               # two batch blocks of NB=32 -> lane width >=128 at every layer
    nb = 32

    params = init_params(jax.random.PRNGKey(1), channels, image_channels)
    x = jax.random.normal(jax.random.PRNGKey(0),
                          (batch, image_channels, image_dim, image_dim), jnp.float32)

    fwd = jax.jit(lambda inp: autoencoder_forward(inp, params, nb=nb))
    out = jax.block_until_ready(fwd(x))
    assert out.shape == (batch, 1, image_dim, image_dim), out.shape

    ref = jax.block_until_ready(reference_forward(x, params))
    assert jnp.allclose(out, ref, atol=1e-4, rtol=1e-4), float(jnp.max(jnp.abs(out - ref)))

    print("KERNEL_OK")
</pallas_src>

<mosaic_0001>
module attributes {stable_mosaic.version = 11 : i64} {
  func.func @_ae_fused_kernel(%arg0: i32, %arg1: memref<32x16x16xf32, #tpu.memory_space<vmem>>, %arg2: memref<96x16xf32, #tpu.memory_space<vmem>>, %arg3: memref<3x512x256xf32, #tpu.memory_space<vmem>>, %arg4: memref<32x1xf32, #tpu.memory_space<vmem>>, %arg5: memref<96x32xf32, #tpu.memory_space<vmem>>, %arg6: memref<3x256x128xf32, #tpu.memory_space<vmem>>, %arg7: memref<32x1xf32, #tpu.memory_space<vmem>>, %arg8: memref<96x32xf32, #tpu.memory_space<vmem>>, %arg9: memref<3x128x256xf32, #tpu.memory_space<vmem>>, %arg10: memref<32x1xf32, #tpu.memory_space<vmem>>, %arg11: memref<48x32xf32, #tpu.memory_space<vmem>>, %arg12: memref<3x256x512xf32, #tpu.memory_space<vmem>>, %arg13: memref<16x1xf32, #tpu.memory_space<vmem>>, %arg14: memref<32x16x16xf32, #tpu.memory_space<vmem>>, %arg15: memref<16x512xf32, #tpu.memory_space<vmem>>, %arg16: memref<16x512xf32, #tpu.memory_space<vmem>>) attributes {dimension_semantics = [#tpu.dimension_semantics<parallel>], iteration_bounds = array<i64: 2>, scalar_prefetch = 0 : i64, scratch_operands = 2 : i64, tpu.core_type = #tpu.core_type<tc>, window_params = [{transform_indices = @transform_0, window_bounds = array<i64: 32, 16, 16>}, {pipeline_mode = #tpu.pipeline_mode<synchronous>, transform_indices = @transform_1, window_bounds = array<i64: 96, 16>}, {pipeline_mode = #tpu.pipeline_mode<synchronous>, transform_indices = @transform_2, window_bounds = array<i64: 3, 512, 256>}, {pipeline_mode = #tpu.pipeline_mode<synchronous>, transform_indices = @transform_3, window_bounds = array<i64: 32, 1>}, {pipeline_mode = #tpu.pipeline_mode<synchronous>, transform_indices = @transform_4, window_bounds = array<i64: 96, 32>}, {pipeline_mode = #tpu.pipeline_mode<synchronous>, transform_indices = @transform_5, window_bounds = array<i64: 3, 256, 128>}, {pipeline_mode = #tpu.pipeline_mode<synchronous>, transform_indices = @transform_6, window_bounds = array<i64: 32, 1>}, {pipeline_mode = #tpu.pipeline_mode<synchronous>, transform_indices = @transform_7, window_bounds = array<i64: 96, 32>}, {pipeline_mode = #tpu.pipeline_mode<synchronous>, transform_indices = @transform_8, window_bounds = array<i64: 3, 128, 256>}, {pipeline_mode = #tpu.pipeline_mode<synchronous>, transform_indices = @transform_9, window_bounds = array<i64: 32, 1>}, {pipeline_mode = #tpu.pipeline_mode<synchronous>, transform_indices = @transform_10, window_bounds = array<i64: 48, 32>}, {pipeline_mode = #tpu.pipeline_mode<synchronous>, transform_indices = @transform_11, window_bounds = array<i64: 3, 256, 512>}, {pipeline_mode = #tpu.pipeline_mode<synchronous>, transform_indices = @transform_12, window_bounds = array<i64: 16, 1>}, {transform_indices = @transform_13, window_bounds = array<i64: 32, 16, 16>}]} {
    %c0 = arith.constant 0 : index
    %c0_0 = arith.constant 0 : index
    %c0_1 = arith.constant 0 : index
    %0 = vector.load %arg1[%c0, %c0_0, %c0_1] : memref<32x16x16xf32, #tpu.memory_space<vmem>>, vector<1x16x16xf32>
    %1 = vector.shape_cast %0 : vector<1x16x16xf32> to vector<16x16xf32>
    %c0_2 = arith.constant 0 : index
    %c0_3 = arith.constant 0 : index
    %2 = vector.load %arg15[%c0_2, %c0_3] : memref<16x512xf32, #tpu.memory_space<vmem>>, vector<16x16xf32>
    tpu.vector_store %arg15[%c0_2, %c0_3], %1 {strides = array<i32>} : memref<16x512xf32, #tpu.memory_space<vmem>>, vector<16x16xf32>,
    %c1 = arith.constant 1 : index
    %c0_4 = arith.constant 0 : index
    %c0_5 = arith.constant 0 : index
    %3 = vector.load %arg1[%c1, %c0_4, %c0_5] : memref<32x16x16xf32, #tpu.memory_space<vmem>>, vector<1x16x16xf32>
    %4 = vector.shape_cast %3 : vector<1x16x16xf32> to vector<16x16xf32>
    %c0_6 = arith.constant 0 : index
    %c16 = arith.constant 16 : index
    %5 = vector.load %arg15[%c0_6, %c16] : memref<16x512xf32, #tpu.memory_space<vmem>>, vector<16x16xf32>
    tpu.vector_store %arg15[%c0_6, %c16], %4 {strides = array<i32>} : memref<16x512xf32, #tpu.memory_space<vmem>>, vector<16x16xf32>,
    %c2 = arith.constant 2 : index
    %c0_7 = arith.constant 0 : index
    %c0_8 = arith.constant 0 : index
    %6 = vector.load %arg1[%c2, %c0_7, %c0_8] : memref<32x16x16xf32, #tpu.memory_space<vmem>>, vector<1x16x16xf32>
    %7 = vector.shape_cast %6 : vector<1x16x16xf32> to vector<16x16xf32>
    %c0_9 = arith.constant 0 : index
    %c32 = arith.constant 32 : index
    %8 = vector.load %arg15[%c0_9, %c32] : memref<16x512xf32, #tpu.memory_space<vmem>>, vector<16x16xf32>
    tpu.vector_store %arg15[%c0_9, %c32], %7 {strides = array<i32>} : memref<16x512xf32, #tpu.memory_space<vmem>>, vector<16x16xf32>,
    %c3 = arith.constant 3 : index
    %c0_10 = arith.constant 0 : index
    %c0_11 = arith.constant 0 : index
    %9 = vector.load %arg1[%c3, %c0_10, %c0_11] : memref<32x16x16xf32, #tpu.memory_space<vmem>>, vector<1x16x16xf32>
    %10 = vector.shape_cast %9 : vector<1x16x16xf32> to vector<16x16xf32>
    %c0_12 = arith.constant 0 : index
    %c48 = arith.constant 48 : index
    %11 = vector.load %arg15[%c0_12, %c48] : memref<16x512xf32, #tpu.memory_space<vmem>>, vector<16x16xf32>
    tpu.vector_store %arg15[%c0_12, %c48], %10 {strides = array<i32>} : memref<16x512xf32, #tpu.memory_space<vmem>>, vector<16x16xf32>,
    %c4 = arith.constant 4 : index
    %c0_13 = arith.constant 0 : index
    %c0_14 = arith.constant 0 : index
    %12 = vector.load %arg1[%c4, %c0_13, %c0_14] : memref<32x16x16xf32, #tpu.memory_space<vmem>>, vector<1x16x16xf32>
    %13 = vector.shape_cast %12 : vector<1x16x16xf32> to vector<16x16xf32>
    %c0_15 = arith.constant 0 : index
    %c64 = arith.constant 64 : index
    %14 = vector.load %arg15[%c0_15, %c64] : memref<16x512xf32, #tpu.memory_space<vmem>>, vector<16x16xf32>
    tpu.vector_store %arg15[%c0_15, %c64], %13 {strides = array<i32>} : memref<16x512xf32, #tpu.memory_space<vmem>>, vector<16x16xf32>,
    %c5 = arith.constant 5 : index
    %c0_16 = arith.constant 0 : index
    %c0_17 = arith.constant 0 : index
    %15 = vector.load %arg1[%c5, %c0_16, %c0_17] : memref<32x16x16xf32, #tpu.memory_space<vmem>>, vector<1x16x16xf32>
    %16 = vector.shape_cast %15 : vector<1x16x16xf32> to vector<16x16xf32>
    %c0_18 = arith.constant 0 : index
    %c80 = arith.constant 80 : index
    %17 = vector.load %arg15[%c0_18, %c80] : memref<16x512xf32, #tpu.memory_space<vmem>>, vector<16x16xf32>
    tpu.vector_store %arg15[%c0_18, %c80], %16 {strides = array<i32>} : memref<16x512xf32, #tpu.memory_space<vmem>>, vector<16x16xf32>,
    %c6 = arith.constant 6 : index
    %c0_19 = arith.constant 0 : index
    %c0_20 = arith.constant 0 : index
    %18 = vector.load %arg1[%c6, %c0_19, %c0_20] : memref<32x16x16xf32, #tpu.memory_space<vmem>>, vector<1x16x16xf32>
    %19 = vector.shape_cast %18 : vector<1x16x16xf32> to vector<16x16xf32>
    %c0_21 = arith.constant 0 : index
    %c96 = arith.constant 96 : index
    %20 = vector.load %arg15[%c0_21, %c96] : memref<16x512xf32, #tpu.memory_space<vmem>>, vector<16x16xf32>
    tpu.vector_store %arg15[%c0_21, %c96], %19 {strides = array<i32>} : memref<16x512xf32, #tpu.memory_space<vmem>>, vector<16x16xf32>,
    %c7 = arith.constant 7 : index
    %c0_22 = arith.constant 0 : index
    %c0_23 = arith.constant 0 : index
    %21 = vector.load %arg1[%c7, %c0_22, %c0_23] : memref<32x16x16xf32, #tpu.memory_space<vmem>>, vector<1x16x16xf32>
    %22 = vector.shape_cast %21 : vector<1x16x16xf32> to vector<16x16xf32>
    %c0_24 = arith.constant 0 : index
    %c112 = arith.constant 112 : index
    %23 = vector.load %arg15[%c0_24, %c112] : memref<16x512xf32, #tpu.memory_space<vmem>>, vector<16x16xf32>
    tpu.vector_store %arg15[%c0_24, %c112], %22 {strides = array<i32>} : memref<16x512xf32, #tpu.memory_space<vmem>>, vector<16x16xf32>,
    %c8 = arith.constant 8 : index
    %c0_25 = arith.constant 0 : index
    %c0_26 = arith.constant 0 : index
    %24 = vector.load %arg1[%c8, %c0_25, %c0_26] : memref<32x16x16xf32, #tpu.memory_space<vmem>>, vector<1x16x16xf32>
    %25 = vector.shape_cast %24 : vector<1x16x16xf32> to vector<16x16xf32>
    %c0_27 = arith.constant 0 : index
    %c128 = arith.constant 128 : index
    %26 = vector.load %arg15[%c0_27, %c128] : memref<16x512xf32, #tpu.memory_space<vmem>>, vector<16x16xf32>
    tpu.vector_store %arg15[%c0_27, %c128], %25 {strides = array<i32>} : memref<16x512xf32, #tpu.memory_space<vmem>>, vector<16x16xf32>,
    %c9 = arith.constant 9 : index
    %c0_28 = arith.constant 0 : index
    %c0_29 = arith.constant 0 : index
    %27 = vector.load %arg1[%c9, %c0_28, %c0_29] : memref<32x16x16xf32, #tpu.memory_space<vmem>>, vector<1x16x16xf32>
    %28 = vector.shape_cast %27 : vector<1x16x16xf32> to vector<16x16xf32>
    %c0_30 = arith.constant 0 : index
    %c144 = arith.constant 144 : index
    %29 = vector.load %arg15[%c0_30, %c144] : memref<16x512xf32, #tpu.memory_space<vmem>>, vector<16x16xf32>
    tpu.vector_store %arg15[%c0_30, %c144], %28 {strides = array<i32>} : memref<16x512xf32, #tpu.memory_space<vmem>>, vector<16x16xf32>,
    %c10 = arith.constant 10 : index
    %c0_31 = arith.constant 0 : index
    %c0_32 = arith.constant 0 : index
    %30 = vector.load %arg1[%c10, %c0_31, %c0_32] : memref<32x16x16xf32, #tpu.memory_space<vmem>>, vector<1x16x16xf32>
    %31 = vector.shape_cast %30 : vector<1x16x16xf32> to vector<16x16xf32>
    %c0_33 = arith.constant 0 : index
    %c160 = arith.constant 160 : index
    %32 = vector.load %arg15[%c0_33, %c160] : memref<16x512xf32, #tpu.memory_space<vmem>>, vector<16x16xf32>
    tpu.vector_store %arg15[%c0_33, %c160], %31 {strides = array<i32>} : memref<16x512xf32, #tpu.memory_space<vmem>>, vector<16x16xf32>,
    %c11 = arith.constant 11 : index
    %c0_34 = arith.constant 0 : index
    %c0_35 = arith.constant 0 : index
    %33 = vector.load %arg1[%c11, %c0_34, %c0_35] : memref<32x16x16xf32, #tpu.memory_space<vmem>>, vector<1x16x16xf32>
    %34 = vector.shape_cast %33 : vector<1x16x16xf32> to vector<16x16xf32>
    %c0_36 = arith.constant 0 : index
    %c176 = arith.constant 176 : index
    %35 = vector.load %arg15[%c0_36, %c176] : memref<16x512xf32, #tpu.memory_space<vmem>>, vector<16x16xf32>
    tpu.vector_store %arg15[%c0_36, %c176], %34 {strides = array<i32>} : memref<16x512xf32, #tpu.memory_space<vmem>>, vector<16x16xf32>,
    %c12 = arith.constant 12 : index
    %c0_37 = arith.constant 0 : index
    %c0_38 = arith.constant 0 : index
    %36 = vector.load %arg1[%c12, %c0_37, %c0_38] : memref<32x16x16xf32, #tpu.memory_space<vmem>>, vector<1x16x16xf32>
    %37 = vector.shape_cast %36 : vector<1x16x16xf32> to vector<16x16xf32>
    %c0_39 = arith.constant 0 : index
    %c192 = arith.constant 192 : index
    %38 = vector.load %arg15[%c0_39, %c192] : memref<16x512xf32, #tpu.memory_space<vmem>>, vector<16x16xf32>
    tpu.vector_store %arg15[%c0_39, %c192], %37 {strides = array<i32>} : memref<16x512xf32, #tpu.memory_space<vmem>>, vector<16x16xf32>,
    %c13 = arith.constant 13 : index
    %c0_40 = arith.constant 0 : index
    %c0_41 = arith.constant 0 : index
    %39 = vector.load %arg1[%c13, %c0_40, %c0_41] : memref<32x16x16xf32, #tpu.memory_space<vmem>>, vector<1x16x16xf32>
    %40 = vector.shape_cast %39 : vector<1x16x16xf32> to vector<16x16xf32>
    %c0_42 = arith.constant 0 : index
    %c208 = arith.constant 208 : index
    %41 = vector.load %arg15[%c0_42, %c208] : memref<16x512xf32, #tpu.memory_space<vmem>>, vector<16x16xf32>
    tpu.vector_store %arg15[%c0_42, %c208], %40 {strides = array<i32>} : memref<16x512xf32, #tpu.memory_space<vmem>>, vector<16x16xf32>,
    %c14 = arith.constant 14 : index
    %c0_43 = arith.constant 0 : index
    %c0_44 = arith.constant 0 : index
    %42 = vector.load %arg1[%c14, %c0_43, %c0_44] : memref<32x16x16xf32, #tpu.memory_space<vmem>>, vector<1x16x16xf32>
    %43 = vector.shape_cast %42 : vector<1x16x16xf32> to vector<16x16xf32>
    %c0_45 = arith.constant 0 : index
    %c224 = arith.constant 224 : index
    %44 = vector.load %arg15[%c0_45, %c224] : memref<16x512xf32, #tpu.memory_space<vmem>>, vector<16x16xf32>
    tpu.vector_store %arg15[%c0_45, %c224], %43 {strides = array<i32>} : memref<16x512xf32, #tpu.memory_space<vmem>>, vector<16x16xf32>,
    %c15 = arith.constant 15 : index
    %c0_46 = arith.constant 0 : index
    %c0_47 = arith.constant 0 : index
    %45 = vector.load %arg1[%c15, %c0_46, %c0_47] : memref<32x16x16xf32, #tpu.memory_space<vmem>>, vector<1x16x16xf32>
    %46 = vector.shape_cast %45 : vector<1x16x16xf32> to vector<16x16xf32>
    %c0_48 = arith.constant 0 : index
    %c240 = arith.constant 240 : index
    %47 = vector.load %arg15[%c0_48, %c240] : memref<16x512xf32, #tpu.memory_space<vmem>>, vector<16x16xf32>
    tpu.vector_store %arg15[%c0_48, %c240], %46 {strides = array<i32>} : memref<16x512xf32, #tpu.memory_space<vmem>>, vector<16x16xf32>,
    %c16_49 = arith.constant 16 : index
    %c0_50 = arith.constant 0 : index
    %c0_51 = arith.constant 0 : index
    %48 = vector.load %arg1[%c16_49, %c0_50, %c0_51] : memref<32x16x16xf32, #tpu.memory_space<vmem>>, vector<1x16x16xf32>
    %49 = vector.shape_cast %48 : vector<1x16x16xf32> to vector<16x16xf32>
    %c0_52 = arith.constant 0 : index
    %c256 = arith.constant 256 : index
    %50 = vector.load %arg15[%c0_52, %c256] : memref<16x512xf32, #tpu.memory_space<vmem>>, vector<16x16xf32>
    tpu.vector_store %arg15[%c0_52, %c256], %49 {strides = array<i32>} : memref<16x512xf32, #tpu.memory_space<vmem>>, vector<16x16xf32>,
    %c17 = arith.constant 17 : index
    %c0_53 = arith.constant 0 : index
    %c0_54 = arith.constant 0 : index
    %51 = vector.load %arg1[%c17, %c0_53, %c0_54] : memref<32x16x16xf32, #tpu.memory_space<vmem>>, vector<1x16x16xf32>
    %52 = vector.shape_cast %51 : vector<1x16x16xf32> to vector<16x16xf32>
    %c0_55 = arith.constant 0 : index
    %c272 = arith.constant 272 : index
    %53 = vector.load %arg15[%c0_55, %c272] : memref<16x512xf32, #tpu.memory_space<vmem>>, vector<16x16xf32>
    tpu.vector_store %arg15[%c0_55, %c272], %52 {strides = array<i32>} : memref<16x512xf32, #tpu.memory_space<vmem>>, vector<16x16xf32>,
    %c18 = arith.constant 18 : index
    %c0_56 = arith.constant 0 : index
    %c0_57 = arith.constant 0 : index
    %54 = vector.load %arg1[%c18, %c0_56, %c0_57] : memref<32x16x16xf32, #tpu.memory_space<vmem>>, vector<1x16x16xf32>
    %55 = vector.shape_cast %54 : vector<1x16x16xf32> to vector<16x16xf32>
    %c0_58 = arith.constant 0 : index
    %c288 = arith.constant 288 : index
    %56 = vector.load %arg15[%c0_58, %c288] : memref<16x512xf32, #tpu.memory_space<vmem>>, vector<16x16xf32>
    tpu.vector_store %arg15[%c0_58, %c288], %55 {strides = array<i32>} : memref<16x512xf32, #tpu.memory_space<vmem>>, vector<16x16xf32>,
    %c19 = arith.constant 19 : index
    %c0_59 = arith.constant 0 : index
    %c0_60 = arith.constant 0 : index
    %57 = vector.load %arg1[%c19, %c0_59, %c0_60] : memref<32x16x16xf32, #tpu.memory_space<vmem>>, vector<1x16x16xf32>
    %58 = vector.shape_cast %57 : vector<1x16x16xf32> to vector<16x16xf32>
    %c0_61 = arith.constant 0 : index
    %c304 = arith.constant 304 : index
    %59 = vector.load %arg15[%c0_61, %c304] : memref<16x512xf32, #tpu.memory_space<vmem>>, vector<16x16xf32>
    tpu.vector_store %arg15[%c0_61, %c304], %58 {strides = array<i32>} : memref<16x512xf32, #tpu.memory_space<vmem>>, vector<16x16xf32>,
    %c20 = arith.constant 20 : index
    %c0_62 = arith.constant 0 : index
    %c0_63 = arith.constant 0 : index
    %60 = vector.load %arg1[%c20, %c0_62, %c0_63] : memref<32x16x16xf32, #tpu.memory_space<vmem>>, vector<1x16x16xf32>
    %61 = vector.shape_cast %60 : vector<1x16x16xf32> to vector<16x16xf32>
    %c0_64 = arith.constant 0 : index
    %c320 = arith.constant 320 : index
    %62 = vector.load %arg15[%c0_64, %c320] : memref<16x512xf32, #tpu.memory_space<vmem>>, vector<16x16xf32>
    tpu.vector_store %arg15[%c0_64, %c320], %61 {strides = array<i32>} : memref<16x512xf32, #tpu.memory_space<vmem>>, vector<16x16xf32>,
    %c21 = arith.constant 21 : index
    %c0_65 = arith.constant 0 : index
    %c0_66 = arith.constant 0 : index
    %63 = vector.load %arg1[%c21, %c0_65, %c0_66] : memref<32x16x16xf32, #tpu.memory_space<vmem>>, vector<1x16x16xf32>
    %64 = vector.shape_cast %63 : vector<1x16x16xf32> to vector<16x16xf32>
    %c0_67 = arith.constant 0 : index
    %c336 = arith.constant 336 : index
    %65 = vector.load %arg15[%c0_67, %c336] : memref<16x512xf32, #tpu.memory_space<vmem>>, vector<16x16xf32>
    tpu.vector_store %arg15[%c0_67, %c336], %64 {strides = array<i32>} : memref<16x512xf32, #tpu.memory_space<vmem>>, vector<16x16xf32>,
    %c22 = arith.constant 22 : index
    %c0_68 = arith.constant 0 : index
    %c0_69 = arith.constant 0 : index
    %66 = vector.load %arg1[%c22, %c0_68, %c0_69] : memref<32x16x16xf32, #tpu.memory_space<vmem>>, vector<1x16x16xf32>
    %67 = vector.shape_cast %66 : vector<1x16x16xf32> to vector<16x16xf32>
    %c0_70 = arith.constant 0 : index
    %c352 = arith.constant 352 : index
    %68 = vector.load %arg15[%c0_70, %c352] : memref<16x512xf32, #tpu.memory_space<vmem>>, vector<16x16xf32>
    tpu.vector_store %arg15[%c0_70, %c352], %67 {strides = array<i32>} : memref<16x512xf32, #tpu.memory_space<vmem>>, vector<16x16xf32>,
    %c23 = arith.constant 23 : index
    %c0_71 = arith.constant 0 : index
    %c0_72 = arith.constant 0 : index
    %69 = vector.load %arg1[%c23, %c0_71, %c0_72] : memref<32x16x16xf32, #tpu.memory_space<vmem>>, vector<1x16x16xf32>
    %70 = vector.shape_cast %69 : vector<1x16x16xf32> to vector<16x16xf32>
    %c0_73 = arith.constant 0 : index
    %c368 = arith.constant 368 : index
    %71 = vector.load %arg15[%c0_73, %c368] : memref<16x512xf32, #tpu.memory_space<vmem>>, vector<16x16xf32>
    tpu.vector_store %arg15[%c0_73, %c368], %70 {strides = array<i32>} : memref<16x512xf32, #tpu.memory_space<vmem>>, vector<16x16xf32>,
    %c24 = arith.constant 24 : index
    %c0_74 = arith.constant 0 : index
    %c0_75 = arith.constant 0 : index
    %72 = vector.load %arg1[%c24, %c0_74, %c0_75] : memref<32x16x16xf32, #tpu.memory_space<vmem>>, vector<1x16x16xf32>
    %73 = vector.shape_cast %72 : vector<1x16x16xf32> to vector<16x16xf32>
    %c0_76 = arith.constant 0 : index
    %c384 = arith.constant 384 : index
    %74 = vector.load %arg15[%c0_76, %c384] : memref<16x512xf32, #tpu.memory_space<vmem>>, vector<16x16xf32>
    tpu.vector_store %arg15[%c0_76, %c384], %73 {strides = array<i32>} : memref<16x512xf32, #tpu.memory_space<vmem>>, vector<16x16xf32>,
    %c25 = arith.constant 25 : index
    %c0_77 = arith.constant 0 : index
    %c0_78 = arith.constant 0 : index
    %75 = vector.load %arg1[%c25, %c0_77, %c0_78] : memref<32x16x16xf32, #tpu.memory_space<vmem>>, vector<1x16x16xf32>
    %76 = vector.shape_cast %75 : vector<1x16x16xf32> to vector<16x16xf32>
    %c0_79 = arith.constant 0 : index
    %c400 = arith.constant 400 : index
    %77 = vector.load %arg15[%c0_79, %c400] : memref<16x512xf32, #tpu.memory_space<vmem>>, vector<16x16xf32>
    tpu.vector_store %arg15[%c0_79, %c400], %76 {strides = array<i32>} : memref<16x512xf32, #tpu.memory_space<vmem>>, vector<16x16xf32>,
    %c26 = arith.constant 26 : index
    %c0_80 = arith.constant 0 : index
    %c0_81 = arith.constant 0 : index
    %78 = vector.load %arg1[%c26, %c0_80, %c0_81] : memref<32x16x16xf32, #tpu.memory_space<vmem>>, vector<1x16x16xf32>
    %79 = vector.shape_cast %78 : vector<1x16x16xf32> to vector<16x16xf32>
    %c0_82 = arith.constant 0 : index
    %c416 = arith.constant 416 : index
    %80 = vector.load %arg15[%c0_82, %c416] : memref<16x512xf32, #tpu.memory_space<vmem>>, vector<16x16xf32>
    tpu.vector_store %arg15[%c0_82, %c416], %79 {strides = array<i32>} : memref<16x512xf32, #tpu.memory_space<vmem>>, vector<16x16xf32>,
    %c27 = arith.constant 27 : index
    %c0_83 = arith.constant 0 : index
    %c0_84 = arith.constant 0 : index
    %81 = vector.load %arg1[%c27, %c0_83, %c0_84] : memref<32x16x16xf32, #tpu.memory_space<vmem>>, vector<1x16x16xf32>
    %82 = vector.shape_cast %81 : vector<1x16x16xf32> to vector<16x16xf32>
    %c0_85 = arith.constant 0 : index
    %c432 = arith.constant 432 : index
    %83 = vector.load %arg15[%c0_85, %c432] : memref<16x512xf32, #tpu.memory_space<vmem>>, vector<16x16xf32>
    tpu.vector_store %arg15[%c0_85, %c432], %82 {strides = array<i32>} : memref<16x512xf32, #tpu.memory_space<vmem>>, vector<16x16xf32>,
    %c28 = arith.constant 28 : index
    %c0_86 = arith.constant 0 : index
    %c0_87 = arith.constant 0 : index
    %84 = vector.load %arg1[%c28, %c0_86, %c0_87] : memref<32x16x16xf32, #tpu.memory_space<vmem>>, vector<1x16x16xf32>
    %85 = vector.shape_cast %84 : vector<1x16x16xf32> to vector<16x16xf32>
    %c0_88 = arith.constant 0 : index
    %c448 = arith.constant 448 : index
    %86 = vector.load %arg15[%c0_88, %c448] : memref<16x512xf32, #tpu.memory_space<vmem>>, vector<16x16xf32>
    tpu.vector_store %arg15[%c0_88, %c448], %85 {strides = array<i32>} : memref<16x512xf32, #tpu.memory_space<vmem>>, vector<16x16xf32>,
    %c29 = arith.constant 29 : index
    %c0_89 = arith.constant 0 : index
    %c0_90 = arith.constant 0 : index
    %87 = vector.load %arg1[%c29, %c0_89, %c0_90] : memref<32x16x16xf32, #tpu.memory_space<vmem>>, vector<1x16x16xf32>
    %88 = vector.shape_cast %87 : vector<1x16x16xf32> to vector<16x16xf32>
    %c0_91 = arith.constant 0 : index
    %c464 = arith.constant 464 : index
    %89 = vector.load %arg15[%c0_91, %c464] : memref<16x512xf32, #tpu.memory_space<vmem>>, vector<16x16xf32>
    tpu.vector_store %arg15[%c0_91, %c464], %88 {strides = array<i32>} : memref<16x512xf32, #tpu.memory_space<vmem>>, vector<16x16xf32>,
    %c30 = arith.constant 30 : index
    %c0_92 = arith.constant 0 : index
    %c0_93 = arith.constant 0 : index
    %90 = vector.load %arg1[%c30, %c0_92, %c0_93] : memref<32x16x16xf32, #tpu.memory_space<vmem>>, vector<1x16x16xf32>
    %91 = vector.shape_cast %90 : vector<1x16x16xf32> to vector<16x16xf32>
    %c0_94 = arith.constant 0 : index
    %c480 = arith.constant 480 : index
    %92 = vector.load %arg15[%c0_94, %c480] : memref<16x512xf32, #tpu.memory_space<vmem>>, vector<16x16xf32>
    tpu.vector_store %arg15[%c0_94, %c480], %91 {strides = array<i32>} : memref<16x512xf32, #tpu.memory_space<vmem>>, vector<16x16xf32>,
    %c31 = arith.constant 31 : index
    %c0_95 = arith.constant 0 : index
    %c0_96 = arith.constant 0 : index
    %93 = vector.load %arg1[%c31, %c0_95, %c0_96] : memref<32x16x16xf32, #tpu.memory_space<vmem>>, vector<1x16x16xf32>
    %94 = vector.shape_cast %93 : vector<1x16x16xf32> to vector<16x16xf32>
    %c0_97 = arith.constant 0 : index
    %c496 = arith.constant 496 : index
    %95 = vector.load %arg15[%c0_97, %c496] : memref<16x512xf32, #tpu.memory_space<vmem>>, vector<16x16xf32>
    tpu.vector_store %arg15[%c0_97, %c496], %94 {strides = array<i32>} : memref<16x512xf32, #tpu.memory_space<vmem>>, vector<16x16xf32>,
    %c0_98 = arith.constant 0 : index
    %c0_99 = arith.constant 0 : index
    %96 = vector.load %arg15[%c0_98, %c0_99] : memref<16x512xf32, #tpu.memory_space<vmem>>, vector<16x512xf32>
    %c0_100 = arith.constant 0 : index
    %c0_101 = arith.constant 0 : index
    %97 = vector.load %arg2[%c0_100, %c0_101] : memref<96x16xf32, #tpu.memory_space<vmem>>, vector<96x16xf32>
    %cst = arith.constant dense<0.000000e+00> : vector<96x512xf32>
    %98 = tpu.matmul %97, %96, %cst {dimension_numbers = #tpu.dot_dimension_numbers<[1], [0], [0], [1], [0, 0, 1, 1], [], []>} : vector<96x16xf32>, vector<16x512xf32>, vector<96x512xf32> -> vector<96x512xf32>
    %99 = vector.extract_strided_slice %98 {offsets = [0, 0], sizes = [32, 512], strides = [1, 1]} : vector<96x512xf32> to vector<32x512xf32>
    %c0_102 = arith.constant 0 : index
    %c0_103 = arith.constant 0 : index
    %c0_104 = arith.constant 0 : index
    %100 = vector.load %arg3[%c0_102, %c0_103, %c0_104] : memref<3x512x256xf32, #tpu.memory_space<vmem>>, vector<1x512x256xf32>
    %101 = vector.shape_cast %100 : vector<1x512x256xf32> to vector<512x256xf32>
    %cst_105 = arith.constant dense<0.000000e+00> : vector<32x256xf32>
    %102 = tpu.matmul %99, %101, %cst_105 {dimension_numbers = #tpu.dot_dimension_numbers<[1], [0], [0], [1], [0, 0, 1, 1], [], []>} : vector<32x512xf32>, vector<512x256xf32>, vector<32x256xf32> -> vector<32x256xf32>
    %103 = vector.extract_strided_slice %98 {offsets = [32, 0], sizes = [32, 512], strides = [1, 1]} : vector<96x512xf32> to vector<32x512xf32>
    %c1_106 = arith.constant 1 : index
    %c0_107 = arith.constant 0 : index
    %c0_108 = arith.constant 0 : index
    %104 = vector.load %arg3[%c1_106, %c0_107, %c0_108] : memref<3x512x256xf32, #tpu.memory_space<vmem>>, vector<1x512x256xf32>
    %105 = vector.shape_cast %104 : vector<1x512x256xf32> to vector<512x256xf32>
    %cst_109 = arith.constant dense<0.000000e+00> : vector<32x256xf32>
    %106 = tpu.matmul %103, %105, %cst_109 {dimension_numbers = #tpu.dot_dimension_numbers<[1], [0], [0], [1], [0, 0, 1, 1], [], []>} : vector<32x512xf32>, vector<512x256xf32>, vector<32x256xf32> -> vector<32x256xf32>
    %107 = arith.addf %102, %106 : vector<32x256xf32>
    %108 = vector.extract_strided_slice %98 {offsets = [64, 0], sizes = [32, 512], strides = [1, 1]} : vector<96x512xf32> to vector<32x512xf32>
    %c2_110 = arith.constant 2 : index
    %c0_111 = arith.constant 0 : index
    %c0_112 = arith.constant 0 : index
    %109 = vector.load %arg3[%c2_110, %c0_111, %c0_112] : memref<3x512x256xf32, #tpu.memory_space<vmem>>, vector<1x512x256xf32>
    %110 = vector.shape_cast %109 : vector<1x512x256xf32> to vector<512x256xf32>
    %cst_113 = arith.constant dense<0.000000e+00> : vector<32x256xf32>
    %111 = tpu.matmul %108, %110, %cst_113 {dimension_numbers = #tpu.dot_dimension_numbers<[1], [0], [0], [1], [0, 0, 1, 1], [], []>} : vector<32x512xf32>, vector<512x256xf32>, vector<32x256xf32> -> vector<32x256xf32>
    %112 = arith.addf %107, %111 : vector<32x256xf32>
    %c0_114 = arith.constant 0 : index
    %c0_115 = arith.constant 0 : index
    %113 = vector.load %arg4[%c0_114, %c0_115] : memref<32x1xf32, #tpu.memory_space<vmem>>, vector<32x1xf32>
    %114 = vector.broadcast %113 : vector<32x1xf32> to vector<32x256xf32>
    %115 = arith.addf %112, %114 : vector<32x256xf32>
    %cst_116 = arith.constant 0.000000e+00 : f32
    %116 = vector.broadcast %cst_116 : f32 to vector<32x256xf32>
    %117 = arith.cmpf ogt, %115, %116 : vector<32x256xf32>
    %cst_117 = arith.constant 2.000000e-01 : f32
    %118 = vector.broadcast %cst_117 : f32 to vector<32x256xf32>
    %119 = arith.mulf %118, %115 : vector<32x256xf32>
    %120 = arith.select %117, %115, %119 : vector<32x256xi1>, vector<32x256xf32>
    %c0_118 = arith.constant 0 : index
    %c0_119 = arith.constant 0 : index
    %121 = vector.load %arg5[%c0_118, %c0_119] : memref<96x32xf32, #tpu.memory_space<vmem>>, vector<96x32xf32>
    %cst_120 = arith.constant dense<0.000000e+00> : vector<96x256xf32>
    %122 = tpu.matmul %121, %120, %cst_120 {dimension_numbers = #tpu.dot_dimension_numbers<[1], [0], [0], [1], [0, 0, 1, 1], [], []>} : vector<96x32xf32>, vector<32x256xf32>, vector<96x256xf32> -> vector<96x256xf32>
    %123 = vector.extract_strided_slice %122 {offsets = [0, 0], sizes = [32, 256], strides = [1, 1]} : vector<96x256xf32> to vector<32x256xf32>
    %c0_121 = arith.constant 0 : index
    %c0_122 = arith.constant 0 : index
    %c0_123 = arith.constant 0 : index
    %124 = vector.load %arg6[%c0_121, %c0_122, %c0_123] : memref<3x256x128xf32, #tpu.memory_space<vmem>>, vector<1x256x128xf32>
    %125 = vector.shape_cast %124 : vector<1x256x128xf32> to vector<256x128xf32>
    %cst_124 = arith.constant dense<0.000000e+00> : vector<32x128xf32>
    %126 = tpu.matmul %123, %125, %cst_124 {dimension_numbers = #tpu.dot_dimension_numbers<[1], [0], [0], [1], [0, 0, 1, 1], [], []>} : vector<32x256xf32>, vector<256x128xf32>, vector<32x128xf32> -> vector<32x128xf32>
    %127 = vector.extract_strided_slice %122 {offsets = [32, 0], sizes = [32, 256], strides = [1, 1]} : vector<96x256xf32> to vector<32x256xf32>
    %c1_125 = arith.constant 1 : index
    %c0_126 = arith.constant 0 : index
    %c0_127 = arith.constant 0 : index
    %128 = vector.load %arg6[%c1_125, %c0_126, %c0_127] : memref<3x256x128xf32, #tpu.memory_space<vmem>>, vector<1x256x128xf32>
    %129 = vector.shape_cast %128 : vector<1x256x128xf32> to vector<256x128xf32>
    %cst_128 = arith.constant dense<0.000000e+00> : vector<32x128xf32>
    %130 = tpu.matmul %127, %129, %cst_128 {dimension_numbers = #tpu.dot_dimension_numbers<[1], [0], [0], [1], [0, 0, 1, 1], [], []>} : vector<32x256xf32>, vector<256x128xf32>, vector<32x128xf32> -> vector<32x128xf32>
    %131 = arith.addf %126, %130 : vector<32x128xf32>
    %132 = vector.extract_strided_slice %122 {offsets = [64, 0], sizes = [32, 256], strides = [1, 1]} : vector<96x256xf32> to vector<32x256xf32>
    %c2_129 = arith.constant 2 : index
    %c0_130 = arith.constant 0 : index
    %c0_131 = arith.constant 0 : index
    %133 = vector.load %arg6[%c2_129, %c0_130, %c0_131] : memref<3x256x128xf32, #tpu.memory_space<vmem>>, vector<1x256x128xf32>
    %134 = vector.shape_cast %133 : vector<1x256x128xf32> to vector<256x128xf32>
    %cst_132 = arith.constant dense<0.000000e+00> : vector<32x128xf32>
    %135 = tpu.matmul %132, %134, %cst_132 {dimension_numbers = #tpu.dot_dimension_numbers<[1], [0], [0], [1], [0, 0, 1, 1], [], []>} : vector<32x256xf32>, vector<256x128xf32>, vector<32x128xf32> -> vector<32x128xf32>
    %136 = arith.addf %131, %135 : vector<32x128xf32>
    %c0_133 = arith.constant 0 : index
    %c0_134 = arith.constant 0 : index
    %137 = vector.load %arg7[%c0_133, %c0_134] : memref<32x1xf32, #tpu.memory_space<vmem>>, vector<32x1xf32>
    %138 = vector.broadcast %137 : vector<32x1xf32> to vector<32x128xf32>
    %139 = arith.addf %136, %138 : vector<32x128xf32>
    %cst_135 = arith.constant 0.000000e+00 : f32
    %140 = vector.broadcast %cst_135 : f32 to vector<32x128xf32>
    %141 = arith.cmpf ogt, %139, %140 : vector<32x128xf32>
    %cst_136 = arith.constant 2.000000e-01 : f32
    %142 = vector.broadcast %cst_136 : f32 to vector<32x128xf32>
    %143 = arith.mulf %142, %139 : vector<32x128xf32>
    %144 = arith.select %141, %139, %143 : vector<32x128xi1>, vector<32x128xf32>
    %c0_137 = arith.constant 0 : index
    %c0_138 = arith.constant 0 : index
    %145 = vector.load %arg8[%c0_137, %c0_138] : memref<96x32xf32, #tpu.memory_space<vmem>>, vector<96x32xf32>
    %cst_139 = arith.constant dense<0.000000e+00> : vector<96x128xf32>
    %146 = tpu.matmul %145, %144, %cst_139 {dimension_numbers = #tpu.dot_dimension_numbers<[1], [0], [0], [1], [0, 0, 1, 1], [], []>} : vector<96x32xf32>, vector<32x128xf32>, vector<96x128xf32> -> vector<96x128xf32>
    %147 = vector.extract_strided_slice %146 {offsets = [0, 0], sizes = [32, 128], strides = [1, 1]} : vector<96x128xf32> to vector<32x128xf32>
    %c0_140 = arith.constant 0 : index
    %c0_141 = arith.constant 0 : index
    %c0_142 = arith.constant 0 : index
    %148 = vector.load %arg9[%c0_140, %c0_141, %c0_142] : memref<3x128x256xf32, #tpu.memory_space<vmem>>, vector<1x128x256xf32>
    %149 = vector.shape_cast %148 : vector<1x128x256xf32> to vector<128x256xf32>
    %cst_143 = arith.constant dense<0.000000e+00> : vector<32x256xf32>
    %150 = tpu.matmul %147, %149, %cst_143 {dimension_numbers = #tpu.dot_dimension_numbers<[1], [0], [0], [1], [0, 0, 1, 1], [], []>} : vector<32x128xf32>, vector<128x256xf32>, vector<32x256xf32> -> vector<32x256xf32>
    %151 = vector.extract_strided_slice %146 {offsets = [32, 0], sizes = [32, 128], strides = [1, 1]} : vector<96x128xf32> to vector<32x128xf32>
    %c1_144 = arith.constant 1 : index
    %c0_145 = arith.constant 0 : index
    %c0_146 = arith.constant 0 : index
    %152 = vector.load %arg9[%c1_144, %c0_145, %c0_146] : memref<3x128x256xf32, #tpu.memory_space<vmem>>, vector<1x128x256xf32>
    %153 = vector.shape_cast %152 : vector<1x128x256xf32> to vector<128x256xf32>
    %cst_147 = arith.constant dense<0.000000e+00> : vector<32x256xf32>
    %154 = tpu.matmul %151, %153, %cst_147 {dimension_numbers = #tpu.dot_dimension_numbers<[1], [0], [0], [1], [0, 0, 1, 1], [], []>} : vector<32x128xf32>, vector<128x256xf32>, vector<32x256xf32> -> vector<32x256xf32>
    %155 = arith.addf %150, %154 : vector<32x256xf32>
    %156 = vector.extract_strided_slice %146 {offsets = [64, 0], sizes = [32, 128], strides = [1, 1]} : vector<96x128xf32> to vector<32x128xf32>
    %c2_148 = arith.constant 2 : index
    %c0_149 = arith.constant 0 : index
    %c0_150 = arith.constant 0 : index
    %157 = vector.load %arg9[%c2_148, %c0_149, %c0_150] : memref<3x128x256xf32, #tpu.memory_space<vmem>>, vector<1x128x256xf32>
    %158 = vector.shape_cast %157 : vector<1x128x256xf32> to vector<128x256xf32>
    %cst_151 = arith.constant dense<0.000000e+00> : vector<32x256xf32>
    %159 = tpu.matmul %156, %158, %cst_151 {dimension_numbers = #tpu.dot_dimension_numbers<[1], [0], [0], [1], [0, 0, 1, 1], [], []>} : vector<32x128xf32>, vector<128x256xf32>, vector<32x256xf32> -> vector<32x256xf32>
    %160 = arith.addf %155, %159 : vector<32x256xf32>
    %c0_152 = arith.constant 0 : index
    %c0_153 = arith.constant 0 : index
    %161 = vector.load %arg10[%c0_152, %c0_153] : memref<32x1xf32, #tpu.memory_space<vmem>>, vector<32x1xf32>
    %162 = vector.broadcast %161 : vector<32x1xf32> to vector<32x256xf32>
    %163 = arith.addf %160, %162 : vector<32x256xf32>
    %cst_154 = arith.constant 0.000000e+00 : f32
    %164 = vector.broadcast %cst_154 : f32 to vector<32x256xf32>
    %165 = arith.cmpf ogt, %163, %164 : vector<32x256xf32>
    %cst_155 = arith.constant 2.000000e-01 : f32
    %166 = vector.broadcast %cst_155 : f32 to vector<32x256xf32>
    %167 = arith.mulf %166, %163 : vector<32x256xf32>
    %168 = arith.select %165, %163, %167 : vector<32x256xi1>, vector<32x256xf32>
    %c0_156 = arith.constant 0 : index
    %c0_157 = arith.constant 0 : index
    %169 = vector.load %arg11[%c0_156, %c0_157] : memref<48x32xf32, #tpu.memory_space<vmem>>, vector<48x32xf32>
    %cst_158 = arith.constant dense<0.000000e+00> : vector<48x256xf32>
    %170 = tpu.matmul %169, %168, %cst_158 {dimension_numbers = #tpu.dot_dimension_numbers<[1], [0], [0], [1], [0, 0, 1, 1], [], []>} : vector<48x32xf32>, vector<32x256xf32>, vector<48x256xf32> -> vector<48x256xf32>
    %171 = vector.extract_strided_slice %170 {offsets = [0, 0], sizes = [16, 256], strides = [1, 1]} : vector<48x256xf32> to vector<16x256xf32>
    %c0_159 = arith.constant 0 : index
    %c0_160 = arith.constant 0 : index
    %c0_161 = arith.constant 0 : index
    %172 = vector.load %arg12[%c0_159, %c0_160, %c0_161] : memref<3x256x512xf32, #tpu.memory_space<vmem>>, vector<1x256x512xf32>
    %173 = vector.shape_cast %172 : vector<1x256x512xf32> to vector<256x512xf32>
    %cst_162 = arith.constant dense<0.000000e+00> : vector<16x512xf32>
    %174 = tpu.matmul %171, %173, %cst_162 {dimension_numbers = #tpu.dot_dimension_numbers<[1], [0], [0], [1], [0, 0, 1, 1], [], []>} : vector<16x256xf32>, vector<256x512xf32>, vector<16x512xf32> -> vector<16x512xf32>
    %175 = vector.extract_strided_slice %170 {offsets = [16, 0], sizes = [16, 256], strides = [1, 1]} : vector<48x256xf32> to vector<16x256xf32>
    %c1_163 = arith.constant 1 : index
    %c0_164 = arith.constant 0 : index
    %c0_165 = arith.constant 0 : index
    %176 = vector.load %arg12[%c1_163, %c0_164, %c0_165] : memref<3x256x512xf32, #tpu.memory_space<vmem>>, vector<1x256x512xf32>
    %177 = vector.shape_cast %176 : vector<1x256x512xf32> to vector<256x512xf32>
    %cst_166 = arith.constant dense<0.000000e+00> : vector<16x512xf32>
    %178 = tpu.matmul %175, %177, %cst_166 {dimension_numbers = #tpu.dot_dimension_numbers<[1], [0], [0], [1], [0, 0, 1, 1], [], []>} : vector<16x256xf32>, vector<256x512xf32>, vector<16x512xf32> -> vector<16x512xf32>
    %179 = arith.addf %174, %178 : vector<16x512xf32>
    %180 = vector.extract_strided_slice %170 {offsets = [32, 0], sizes = [16, 256], strides = [1, 1]} : vector<48x256xf32> to vector<16x256xf32>
    %c2_167 = arith.constant 2 : index
    %c0_168 = arith.constant 0 : index
    %c0_169 = arith.constant 0 : index
    %181 = vector.load %arg12[%c2_167, %c0_168, %c0_169] : memref<3x256x512xf32, #tpu.memory_space<vmem>>, vector<1x256x512xf32>
    %182 = vector.shape_cast %181 : vector<1x256x512xf32> to vector<256x512xf32>
    %cst_170 = arith.constant dense<0.000000e+00> : vector<16x512xf32>
    %183 = tpu.matmul %180, %182, %cst_170 {dimension_numbers = #tpu.dot_dimension_numbers<[1], [0], [0], [1], [0, 0, 1, 1], [], []>} : vector<16x256xf32>, vector<256x512xf32>, vector<16x512xf32> -> vector<16x512xf32>
    %184 = arith.addf %179, %183 : vector<16x512xf32>
    %c0_171 = arith.constant 0 : index
    %c0_172 = arith.constant 0 : index
    %185 = vector.load %arg13[%c0_171, %c0_172] : memref<16x1xf32, #tpu.memory_space<vmem>>, vector<16x1xf32>
    %186 = vector.broadcast %185 : vector<16x1xf32> to vector<16x512xf32>
    %187 = arith.addf %184, %186 : vector<16x512xf32>
    %c0_173 = arith.constant 0 : index
    %c0_174 = arith.constant 0 : index
    %188 = vector.load %arg16[%c0_173, %c0_174] : memref<16x512xf32, #tpu.memory_space<vmem>>, vector<16x512xf32>
    tpu.vector_store %arg16[%c0_173, %c0_174], %187 {strides = array<i32>} : memref<16x512xf32, #tpu.memory_space<vmem>>, vector<16x512xf32>,
    %c0_175 = arith.constant 0 : index
    %c0_176 = arith.constant 0 : index
    %189 = vector.load %arg16[%c0_175, %c0_176] : memref<16x512xf32, #tpu.memory_space<vmem>>, vector<16x16xf32>
    %c0_177 = arith.constant 0 : index
    %c0_178 = arith.constant 0 : index
    %c0_179 = arith.constant 0 : index
    %190 = vector.load %arg14[%c0_177, %c0_178, %c0_179] : memref<32x16x16xf32, #tpu.memory_space<vmem>>, vector<1x16x16xf32>
    %191 = vector.shape_cast %190 : vector<1x16x16xf32> to vector<16x16xf32>
    %192 = vector.shape_cast %189 : vector<16x16xf32> to vector<1x16x16xf32>
    tpu.vector_store %arg14[%c0_177, %c0_178, %c0_179], %192 {strides = array<i32>} : memref<32x16x16xf32, #tpu.memory_space<vmem>>, vector<1x16x16xf32>,
    %c0_180 = arith.constant 0 : index
    %c16_181 = arith.constant 16 : index
    %193 = vector.load %arg16[%c0_180, %c16_181] : memref<16x512xf32, #tpu.memory_space<vmem>>, vector<16x16xf32>
    %c1_182 = arith.constant 1 : index
    %c0_183 = arith.constant 0 : index
    %c0_184 = arith.constant 0 : index
    %194 = vector.load %arg14[%c1_182, %c0_183, %c0_184] : memref<32x16x16xf32, #tpu.memory_space<vmem>>, vector<1x16x16xf32>
    %195 = vector.shape_cast %194 : vector<1x16x16xf32> to vector<16x16xf32>
    %196 = vector.shape_cast %193 : vector<16x16xf32> to vector<1x16x16xf32>
    tpu.vector_store %arg14[%c1_182, %c0_183, %c0_184], %196 {strides = array<i32>} : memref<32x16x16xf32, #tpu.memory_space<vmem>>, vector<1x16x16xf32>,
    %c0_185 = arith.constant 0 : index
    %c32_186 = arith.constant 32 : index
    %197 = vector.load %arg16[%c0_185, %c32_186] : memref<16x512xf32, #tpu.memory_space<vmem>>, vector<16x16xf32>
    %c2_187 = arith.constant 2 : index
    %c0_188 = arith.constant 0 : index
    %c0_189 = arith.constant 0 : index
    %198 = vector.load %arg14[%c2_187, %c0_188, %c0_189] : memref<32x16x16xf32, #tpu.memory_space<vmem>>, vector<1x16x16xf32>
    %199 = vector.shape_cast %198 : vector<1x16x16xf32> to vector<16x16xf32>
    %200 = vector.shape_cast %197 : vector<16x16xf32> to vector<1x16x16xf32>
    tpu.vector_store %arg14[%c2_187, %c0_188, %c0_189], %200 {strides = array<i32>} : memref<32x16x16xf32, #tpu.memory_space<vmem>>, vector<1x16x16xf32>,
    %c0_190 = arith.constant 0 : index
    %c48_191 = arith.constant 48 : index
    %201 = vector.load %arg16[%c0_190, %c48_191] : memref<16x512xf32, #tpu.memory_space<vmem>>, vector<16x16xf32>
    %c3_192 = arith.constant 3 : index
    %c0_193 = arith.constant 0 : index
    %c0_194 = arith.constant 0 : index
    %202 = vector.load %arg14[%c3_192, %c0_193, %c0_194] : memref<32x16x16xf32, #tpu.memory_space<vmem>>, vector<1x16x16xf32>
    %203 = vector.shape_cast %202 : vector<1x16x16xf32> to vector<16x16xf32>
    %204 = vector.shape_cast %201 : vector<16x16xf32> to vector<1x16x16xf32>
    tpu.vector_store %arg14[%c3_192, %c0_193, %c0_194], %204 {strides = array<i32>} : memref<32x16x16xf32, #tpu.memory_space<vmem>>, vector<1x16x16xf32>,
    %c0_195 = arith.constant 0 : index
    %c64_196 = arith.constant 64 : index
    %205 = vector.load %arg16[%c0_195, %c64_196] : memref<16x512xf32, #tpu.memory_space<vmem>>, vector<16x16xf32>
    %c4_197 = arith.constant 4 : index
    %c0_198 = arith.constant 0 : index
    %c0_199 = arith.constant 0 : index
    %206 = vector.load %arg14[%c4_197, %c0_198, %c0_199] : memref<32x16x16xf32, #tpu.memory_space<vmem>>, vector<1x16x16xf32>
    %207 = vector.shape_cast %206 : vector<1x16x16xf32> to vector<16x16xf32>
    %208 = vector.shape_cast %205 : vector<16x16xf32> to vector<1x16x16xf32>
    tpu.vector_store %arg14[%c4_197, %c0_198, %c0_199], %208 {strides = array<i32>} : memref<32x16x16xf32, #tpu.memory_space<vmem>>, vector<1x16x16xf32>,
    %c0_200 = arith.constant 0 : index
    %c80_201 = arith.constant 80 : index
    %209 = vector.load %arg16[%c0_200, %c80_201] : memref<16x512xf32, #tpu.memory_space<vmem>>, vector<16x16xf32>
    %c5_202 = arith.constant 5 : index
    %c0_203 = arith.constant 0 : index
    %c0_204 = arith.constant 0 : index
    %210 = vector.load %arg14[%c5_202, %c0_203, %c0_204] : memref<32x16x16xf32, #tpu.memory_space<vmem>>, vector<1x16x16xf32>
    %211 = vector.shape_cast %210 : vector<1x16x16xf32> to vector<16x16xf32>
    %212 = vector.shape_cast %209 : vector<16x16xf32> to vector<1x16x16xf32>
    tpu.vector_store %arg14[%c5_202, %c0_203, %c0_204], %212 {strides = array<i32>} : memref<32x16x16xf32, #tpu.memory_space<vmem>>, vector<1x16x16xf32>,
    %c0_205 = arith.constant 0 : index
    %c96_206 = arith.constant 96 : index
    %213 = vector.load %arg16[%c0_205, %c96_206] : memref<16x512xf32, #tpu.memory_space<vmem>>, vector<16x16xf32>
    %c6_207 = arith.constant 6 : index
    %c0_208 = arith.constant 0 : index
    %c0_209 = arith.constant 0 : index
    %214 = vector.load %arg14[%c6_207, %c0_208, %c0_209] : memref<32x16x16xf32, #tpu.memory_space<vmem>>, vector<1x16x16xf32>
    %215 = vector.shape_cast %214 : vector<1x16x16xf32> to vector<16x16xf32>
    %216 = vector.shape_cast %213 : vector<16x16xf32> to vector<1x16x16xf32>
    tpu.vector_store %arg14[%c6_207, %c0_208, %c0_209], %216 {strides = array<i32>} : memref<32x16x16xf32, #tpu.memory_space<vmem>>, vector<1x16x16xf32>,
    %c0_210 = arith.constant 0 : index
    %c112_211 = arith.constant 112 : index
    %217 = vector.load %arg16[%c0_210, %c112_211] : memref<16x512xf32, #tpu.memory_space<vmem>>, vector<16x16xf32>
    %c7_212 = arith.constant 7 : index
    %c0_213 = arith.constant 0 : index
    %c0_214 = arith.constant 0 : index
    %218 = vector.load %arg14[%c7_212, %c0_213, %c0_214] : memref<32x16x16xf32, #tpu.memory_space<vmem>>, vector<1x16x16xf32>
    %219 = vector.shape_cast %218 : vector<1x16x16xf32> to vector<16x16xf32>
    %220 = vector.shape_cast %217 : vector<16x16xf32> to vector<1x16x16xf32>
    tpu.vector_store %arg14[%c7_212, %c0_213, %c0_214], %220 {strides = array<i32>} : memref<32x16x16xf32, #tpu.memory_space<vmem>>, vector<1x16x16xf32>,
    %c0_215 = arith.constant 0 : index
    %c128_216 = arith.constant 128 : index
    %221 = vector.load %arg16[%c0_215, %c128_216] : memref<16x512xf32, #tpu.memory_space<vmem>>, vector<16x16xf32>
    %c8_217 = arith.constant 8 : index
    %c0_218 = arith.constant 0 : index
    %c0_219 = arith.constant 0 : index
    %222 = vector.load %arg14[%c8_217, %c0_218, %c0_219] : memref<32x16x16xf32, #tpu.memory_space<vmem>>, vector<1x16x16xf32>
    %223 = vector.shape_cast %222 : vector<1x16x16xf32> to vector<16x16xf32>
    %224 = vector.shape_cast %221 : vector<16x16xf32> to vector<1x16x16xf32>
    tpu.vector_store %arg14[%c8_217, %c0_218, %c0_219], %224 {strides = array<i32>} : memref<32x16x16xf32, #tpu.memory_space<vmem>>, vector<1x16x16xf32>,
    %c0_220 = arith.constant 0 : index
    %c144_221 = arith.constant 144 : index
    %225 = vector.load %arg16[%c0_220, %c144_221] : memref<16x512xf32, #tpu.memory_space<vmem>>, vector<16x16xf32>
    %c9_222 = arith.constant 9 : index
    %c0_223 = arith.constant 0 : index
    %c0_224 = arith.constant 0 : index
    %226 = vector.load %arg14[%c9_222, %c0_223, %c0_224] : memref<32x16x16xf32, #tpu.memory_space<vmem>>, vector<1x16x16xf32>
    %227 = vector.shape_cast %226 : vector<1x16x16xf32> to vector<16x16xf32>
    %228 = vector.shape_cast %225 : vector<16x16xf32> to vector<1x16x16xf32>
    tpu.vector_store %arg14[%c9_222, %c0_223, %c0_224], %228 {strides = array<i32>} : memref<32x16x16xf32, #tpu.memory_space<vmem>>, vector<1x16x16xf32>,
    %c0_225 = arith.constant 0 : index
    %c160_226 = arith.constant 160 : index
    %229 = vector.load %arg16[%c0_225, %c160_226] : memref<16x512xf32, #tpu.memory_space<vmem>>, vector<16x16xf32>
    %c10_227 = arith.constant 10 : index
    %c0_228 = arith.constant 0 : index
    %c0_229 = arith.constant 0 : index
    %230 = vector.load %arg14[%c10_227, %c0_228, %c0_229] : memref<32x16x16xf32, #tpu.memory_space<vmem>>, vector<1x16x16xf32>
    %231 = vector.shape_cast %230 : vector<1x16x16xf32> to vector<16x16xf32>
    %232 = vector.shape_cast %229 : vector<16x16xf32> to vector<1x16x16xf32>
    tpu.vector_store %arg14[%c10_227, %c0_228, %c0_229], %232 {strides = array<i32>} : memref<32x16x16xf32, #tpu.memory_space<vmem>>, vector<1x16x16xf32>,
    %c0_230 = arith.constant 0 : index
    %c176_231 = arith.constant 176 : index
    %233 = vector.load %arg16[%c0_230, %c176_231] : memref<16x512xf32, #tpu.memory_space<vmem>>, vector<16x16xf32>
    %c11_232 = arith.constant 11 : index
    %c0_233 = arith.constant 0 : index
    %c0_234 = arith.constant 0 : index
    %234 = vector.load %arg14[%c11_232, %c0_233, %c0_234] : memref<32x16x16xf32, #tpu.memory_space<vmem>>, vector<1x16x16xf32>
    %235 = vector.shape_cast %234 : vector<1x16x16xf32> to vector<16x16xf32>
    %236 = vector.shape_cast %233 : vector<16x16xf32> to vector<1x16x16xf32>
    tpu.vector_store %arg14[%c11_232, %c0_233, %c0_234], %236 {strides = array<i32>} : memref<32x16x16xf32, #tpu.memory_space<vmem>>, vector<1x16x16xf32>,
    %c0_235 = arith.constant 0 : index
    %c192_236 = arith.constant 192 : index
    %237 = vector.load %arg16[%c0_235, %c192_236] : memref<16x512xf32, #tpu.memory_space<vmem>>, vector<16x16xf32>
    %c12_237 = arith.constant 12 : index
    %c0_238 = arith.constant 0 : index
    %c0_239 = arith.constant 0 : index
    %238 = vector.load %arg14[%c12_237, %c0_238, %c0_239] : memref<32x16x16xf32, #tpu.memory_space<vmem>>, vector<1x16x16xf32>
    %239 = vector.shape_cast %238 : vector<1x16x16xf32> to vector<16x16xf32>
    %240 = vector.shape_cast %237 : vector<16x16xf32> to vector<1x16x16xf32>
    tpu.vector_store %arg14[%c12_237, %c0_238, %c0_239], %240 {strides = array<i32>} : memref<32x16x16xf32, #tpu.memory_space<vmem>>, vector<1x16x16xf32>,
    %c0_240 = arith.constant 0 : index
    %c208_241 = arith.constant 208 : index
    %241 = vector.load %arg16[%c0_240, %c208_241] : memref<16x512xf32, #tpu.memory_space<vmem>>, vector<16x16xf32>
    %c13_242 = arith.constant 13 : index
    %c0_243 = arith.constant 0 : index
    %c0_244 = arith.constant 0 : index
    %242 = vector.load %arg14[%c13_242, %c0_243, %c0_244] : memref<32x16x16xf32, #tpu.memory_space<vmem>>, vector<1x16x16xf32>
    %243 = vector.shape_cast %242 : vector<1x16x16xf32> to vector<16x16xf32>
    %244 = vector.shape_cast %241 : vector<16x16xf32> to vector<1x16x16xf32>
    tpu.vector_store %arg14[%c13_242, %c0_243, %c0_244], %244 {strides = array<i32>} : memref<32x16x16xf32, #tpu.memory_space<vmem>>, vector<1x16x16xf32>,
    %c0_245 = arith.constant 0 : index
    %c224_246 = arith.constant 224 : index
    %245 = vector.load %arg16[%c0_245, %c224_246] : memref<16x512xf32, #tpu.memory_space<vmem>>, vector<16x16xf32>
    %c14_247 = arith.constant 14 : index
    %c0_248 = arith.constant 0 : index
    %c0_249 = arith.constant 0 : index
    %246 = vector.load %arg14[%c14_247, %c0_248, %c0_249] : memref<32x16x16xf32, #tpu.memory_space<vmem>>, vector<1x16x16xf32>
    %247 = vector.shape_cast %246 : vector<1x16x16xf32> to vector<16x16xf32>
    %248 = vector.shape_cast %245 : vector<16x16xf32> to vector<1x16x16xf32>
    tpu.vector_store %arg14[%c14_247, %c0_248, %c0_249], %248 {strides = array<i32>} : memref<32x16x16xf32, #tpu.memory_space<vmem>>, vector<1x16x16xf32>,
    %c0_250 = arith.constant 0 : index
    %c240_251 = arith.constant 240 : index
    %249 = vector.load %arg16[%c0_250, %c240_251] : memref<16x512xf32, #tpu.memory_space<vmem>>, vector<16x16xf32>
    %c15_252 = arith.constant 15 : index
    %c0_253 = arith.constant 0 : index
    %c0_254 = arith.constant 0 : index
    %250 = vector.load %arg14[%c15_252, %c0_253, %c0_254] : memref<32x16x16xf32, #tpu.memory_space<vmem>>, vector<1x16x16xf32>
    %251 = vector.shape_cast %250 : vector<1x16x16xf32> to vector<16x16xf32>
    %252 = vector.shape_cast %249 : vector<16x16xf32> to vector<1x16x16xf32>
    tpu.vector_store %arg14[%c15_252, %c0_253, %c0_254], %252 {strides = array<i32>} : memref<32x16x16xf32, #tpu.memory_space<vmem>>, vector<1x16x16xf32>,
    %c0_255 = arith.constant 0 : index
    %c256_256 = arith.constant 256 : index
    %253 = vector.load %arg16[%c0_255, %c256_256] : memref<16x512xf32, #tpu.memory_space<vmem>>, vector<16x16xf32>
    %c16_257 = arith.constant 16 : index
    %c0_258 = arith.constant 0 : index
    %c0_259 = arith.constant 0 : index
    %254 = vector.load %arg14[%c16_257, %c0_258, %c0_259] : memref<32x16x16xf32, #tpu.memory_space<vmem>>, vector<1x16x16xf32>
    %255 = vector.shape_cast %254 : vector<1x16x16xf32> to vector<16x16xf32>
    %256 = vector.shape_cast %253 : vector<16x16xf32> to vector<1x16x16xf32>
    tpu.vector_store %arg14[%c16_257, %c0_258, %c0_259], %256 {strides = array<i32>} : memref<32x16x16xf32, #tpu.memory_space<vmem>>, vector<1x16x16xf32>,
    %c0_260 = arith.constant 0 : index
    %c272_261 = arith.constant 272 : index
    %257 = vector.load %arg16[%c0_260, %c272_261] : memref<16x512xf32, #tpu.memory_space<vmem>>, vector<16x16xf32>
    %c17_262 = arith.constant 17 : index
    %c0_263 = arith.constant 0 : index
    %c0_264 = arith.constant 0 : index
    %258 = vector.load %arg14[%c17_262, %c0_263, %c0_264] : memref<32x16x16xf32, #tpu.memory_space<vmem>>, vector<1x16x16xf32>
    %259 = vector.shape_cast %258 : vector<1x16x16xf32> to vector<16x16xf32>
    %260 = vector.shape_cast %257 : vector<16x16xf32> to vector<1x16x16xf32>
    tpu.vector_store %arg14[%c17_262, %c0_263, %c0_264], %260 {strides = array<i32>} : memref<32x16x16xf32, #tpu.memory_space<vmem>>, vector<1x16x16xf32>,
    %c0_265 = arith.constant 0 : index
    %c288_266 = arith.constant 288 : index
    %261 = vector.load %arg16[%c0_265, %c288_266] : memref<16x512xf32, #tpu.memory_space<vmem>>, vector<16x16xf32>
    %c18_267 = arith.constant 18 : index
    %c0_268 = arith.constant 0 : index
    %c0_269 = arith.constant 0 : index
    %262 = vector.load %arg14[%c18_267, %c0_268, %c0_269] : memref<32x16x16xf32, #tpu.memory_space<vmem>>, vector<1x16x16xf32>
    %263 = vector.shape_cast %262 : vector<1x16x16xf32> to vector<16x16xf32>
    %264 = vector.shape_cast %261 : vector<16x16xf32> to vector<1x16x16xf32>
    tpu.vector_store %arg14[%c18_267, %c0_268, %c0_269], %264 {strides = array<i32>} : memref<32x16x16xf32, #tpu.memory_space<vmem>>, vector<1x16x16xf32>,
    %c0_270 = arith.constant 0 : index
    %c304_271 = arith.constant 304 : index
    %265 = vector.load %arg16[%c0_270, %c304_271] : memref<16x512xf32, #tpu.memory_space<vmem>>, vector<16x16xf32>
    %c19_272 = arith.constant 19 : index
    %c0_273 = arith.constant 0 : index
    %c0_274 = arith.constant 0 : index
    %266 = vector.load %arg14[%c19_272, %c0_273, %c0_274] : memref<32x16x16xf32, #tpu.memory_space<vmem>>, vector<1x16x16xf32>
    %267 = vector.shape_cast %266 : vector<1x16x16xf32> to vector<16x16xf32>
    %268 = vector.shape_cast %265 : vector<16x16xf32> to vector<1x16x16xf32>
    tpu.vector_store %arg14[%c19_272, %c0_273, %c0_274], %268 {strides = array<i32>} : memref<32x16x16xf32, #tpu.memory_space<vmem>>, vector<1x16x16xf32>,
    %c0_275 = arith.constant 0 : index
    %c320_276 = arith.constant 320 : index
    %269 = vector.load %arg16[%c0_275, %c320_276] : memref<16x512xf32, #tpu.memory_space<vmem>>, vector<16x16xf32>
    %c20_277 = arith.constant 20 : index
    %c0_278 = arith.constant 0 : index
    %c0_279 = arith.constant 0 : index
    %270 = vector.load %arg14[%c20_277, %c0_278, %c0_279] : memref<32x16x16xf32, #tpu.memory_space<vmem>>, vector<1x16x16xf32>
    %271 = vector.shape_cast %270 : vector<1x16x16xf32> to vector<16x16xf32>
    %272 = vector.shape_cast %269 : vector<16x16xf32> to vector<1x16x16xf32>
    tpu.vector_store %arg14[%c20_277, %c0_278, %c0_279], %272 {strides = array<i32>} : memref<32x16x16xf32, #tpu.memory_space<vmem>>, vector<1x16x16xf32>,
    %c0_280 = arith.constant 0 : index
    %c336_281 = arith.constant 336 : index
    %273 = vector.load %arg16[%c0_280, %c336_281] : memref<16x512xf32, #tpu.memory_space<vmem>>, vector<16x16xf32>
    %c21_282 = arith.constant 21 : index
    %c0_283 = arith.constant 0 : index
    %c0_284 = arith.constant 0 : index
    %274 = vector.load %arg14[%c21_282, %c0_283, %c0_284] : memref<32x16x16xf32, #tpu.memory_space<vmem>>, vector<1x16x16xf32>
    %275 = vector.shape_cast %274 : vector<1x16x16xf32> to vector<16x16xf32>
    %276 = vector.shape_cast %273 : vector<16x16xf32> to vector<1x16x16xf32>
    tpu.vector_store %arg14[%c21_282, %c0_283, %c0_284], %276 {strides = array<i32>} : memref<32x16x16xf32, #tpu.memory_space<vmem>>, vector<1x16x16xf32>,
    %c0_285 = arith.constant 0 : index
    %c352_286 = arith.constant 352 : index
    %277 = vector.load %arg16[%c0_285, %c352_286] : memref<16x512xf32, #tpu.memory_space<vmem>>, vector<16x16xf32>
    %c22_287 = arith.constant 22 : index
    %c0_288 = arith.constant 0 : index
    %c0_289 = arith.constant 0 : index
    %278 = vector.load %arg14[%c22_287, %c0_288, %c0_289] : memref<32x16x16xf32, #tpu.memory_space<vmem>>, vector<1x16x16xf32>
    %279 = vector.shape_cast %278 : vector<1x16x16xf32> to vector<16x16xf32>
    %280 = vector.shape_cast %277 : vector<16x16xf32> to vector<1x16x16xf32>
    tpu.vector_store %arg14[%c22_287, %c0_288, %c0_289], %280 {strides = array<i32>} : memref<32x16x16xf32, #tpu.memory_space<vmem>>, vector<1x16x16xf32>,
    %c0_290 = arith.constant 0 : index
    %c368_291 = arith.constant 368 : index
    %281 = vector.load %arg16[%c0_290, %c368_291] : memref<16x512xf32, #tpu.memory_space<vmem>>, vector<16x16xf32>
    %c23_292 = arith.constant 23 : index
    %c0_293 = arith.constant 0 : index
    %c0_294 = arith.constant 0 : index
    %282 = vector.load %arg14[%c23_292, %c0_293, %c0_294] : memref<32x16x16xf32, #tpu.memory_space<vmem>>, vector<1x16x16xf32>
    %283 = vector.shape_cast %282 : vector<1x16x16xf32> to vector<16x16xf32>
    %284 = vector.shape_cast %281 : vector<16x16xf32> to vector<1x16x16xf32>
    tpu.vector_store %arg14[%c23_292, %c0_293, %c0_294], %284 {strides = array<i32>} : memref<32x16x16xf32, #tpu.memory_space<vmem>>, vector<1x16x16xf32>,
    %c0_295 = arith.constant 0 : index
    %c384_296 = arith.constant 384 : index
    %285 = vector.load %arg16[%c0_295, %c384_296] : memref<16x512xf32, #tpu.memory_space<vmem>>, vector<16x16xf32>
    %c24_297 = arith.constant 24 : index
    %c0_298 = arith.constant 0 : index
    %c0_299 = arith.constant 0 : index
    %286 = vector.load %arg14[%c24_297, %c0_298, %c0_299] : memref<32x16x16xf32, #tpu.memory_space<vmem>>, vector<1x16x16xf32>
    %287 = vector.shape_cast %286 : vector<1x16x16xf32> to vector<16x16xf32>
    %288 = vector.shape_cast %285 : vector<16x16xf32> to vector<1x16x16xf32>
    tpu.vector_store %arg14[%c24_297, %c0_298, %c0_299], %288 {strides = array<i32>} : memref<32x16x16xf32, #tpu.memory_space<vmem>>, vector<1x16x16xf32>,
    %c0_300 = arith.constant 0 : index
    %c400_301 = arith.constant 400 : index
    %289 = vector.load %arg16[%c0_300, %c400_301] : memref<16x512xf32, #tpu.memory_space<vmem>>, vector<16x16xf32>
    %c25_302 = arith.constant 25 : index
    %c0_303 = arith.constant 0 : index
    %c0_304 = arith.constant 0 : index
    %290 = vector.load %arg14[%c25_302, %c0_303, %c0_304] : memref<32x16x16xf32, #tpu.memory_space<vmem>>, vector<1x16x16xf32>
    %291 = vector.shape_cast %290 : vector<1x16x16xf32> to vector<16x16xf32>
    %292 = vector.shape_cast %289 : vector<16x16xf32> to vector<1x16x16xf32>
    tpu.vector_store %arg14[%c25_302, %c0_303, %c0_304], %292 {strides = array<i32>} : memref<32x16x16xf32, #tpu.memory_space<vmem>>, vector<1x16x16xf32>,
    %c0_305 = arith.constant 0 : index
    %c416_306 = arith.constant 416 : index
    %293 = vector.load %arg16[%c0_305, %c416_306] : memref<16x512xf32, #tpu.memory_space<vmem>>, vector<16x16xf32>
    %c26_307 = arith.constant 26 : index
    %c0_308 = arith.constant 0 : index
    %c0_309 = arith.constant 0 : index
    %294 = vector.load %arg14[%c26_307, %c0_308, %c0_309] : memref<32x16x16xf32, #tpu.memory_space<vmem>>, vector<1x16x16xf32>
    %295 = vector.shape_cast %294 : vector<1x16x16xf32> to vector<16x16xf32>
    %296 = vector.shape_cast %293 : vector<16x16xf32> to vector<1x16x16xf32>
    tpu.vector_store %arg14[%c26_307, %c0_308, %c0_309], %296 {strides = array<i32>} : memref<32x16x16xf32, #tpu.memory_space<vmem>>, vector<1x16x16xf32>,
    %c0_310 = arith.constant 0 : index
    %c432_311 = arith.constant 432 : index
    %297 = vector.load %arg16[%c0_310, %c432_311] : memref<16x512xf32, #tpu.memory_space<vmem>>, vector<16x16xf32>
    %c27_312 = arith.constant 27 : index
    %c0_313 = arith.constant 0 : index
    %c0_314 = arith.constant 0 : index
    %298 = vector.load %arg14[%c27_312, %c0_313, %c0_314] : memref<32x16x16xf32, #tpu.memory_space<vmem>>, vector<1x16x16xf32>
    %299 = vector.shape_cast %298 : vector<1x16x16xf32> to vector<16x16xf32>
    %300 = vector.shape_cast %297 : vector<16x16xf32> to vector<1x16x16xf32>
    tpu.vector_store %arg14[%c27_312, %c0_313, %c0_314], %300 {strides = array<i32>} : memref<32x16x16xf32, #tpu.memory_space<vmem>>, vector<1x16x16xf32>,
    %c0_315 = arith.constant 0 : index
    %c448_316 = arith.constant 448 : index
    %301 = vector.load %arg16[%c0_315, %c448_316] : memref<16x512xf32, #tpu.memory_space<vmem>>, vector<16x16xf32>
    %c28_317 = arith.constant 28 : index
    %c0_318 = arith.constant 0 : index
    %c0_319 = arith.constant 0 : index
    %302 = vector.load %arg14[%c28_317, %c0_318, %c0_319] : memref<32x16x16xf32, #tpu.memory_space<vmem>>, vector<1x16x16xf32>
    %303 = vector.shape_cast %302 : vector<1x16x16xf32> to vector<16x16xf32>
    %304 = vector.shape_cast %301 : vector<16x16xf32> to vector<1x16x16xf32>
    tpu.vector_store %arg14[%c28_317, %c0_318, %c0_319], %304 {strides = array<i32>} : memref<32x16x16xf32, #tpu.memory_space<vmem>>, vector<1x16x16xf32>,
    %c0_320 = arith.constant 0 : index
    %c464_321 = arith.constant 464 : index
    %305 = vector.load %arg16[%c0_320, %c464_321] : memref<16x512xf32, #tpu.memory_space<vmem>>, vector<16x16xf32>
    %c29_322 = arith.constant 29 : index
    %c0_323 = arith.constant 0 : index
    %c0_324 = arith.constant 0 : index
    %306 = vector.load %arg14[%c29_322, %c0_323, %c0_324] : memref<32x16x16xf32, #tpu.memory_space<vmem>>, vector<1x16x16xf32>
    %307 = vector.shape_cast %306 : vector<1x16x16xf32> to vector<16x16xf32>
    %308 = vector.shape_cast %305 : vector<16x16xf32> to vector<1x16x16xf32>
    tpu.vector_store %arg14[%c29_322, %c0_323, %c0_324], %308 {strides = array<i32>} : memref<32x16x16xf32, #tpu.memory_space<vmem>>, vector<1x16x16xf32>,
    %c0_325 = arith.constant 0 : index
    %c480_326 = arith.constant 480 : index
    %309 = vector.load %arg16[%c0_325, %c480_326] : memref<16x512xf32, #tpu.memory_space<vmem>>, vector<16x16xf32>
    %c30_327 = arith.constant 30 : index
    %c0_328 = arith.constant 0 : index
    %c0_329 = arith.constant 0 : index
    %310 = vector.load %arg14[%c30_327, %c0_328, %c0_329] : memref<32x16x16xf32, #tpu.memory_space<vmem>>, vector<1x16x16xf32>
    %311 = vector.shape_cast %310 : vector<1x16x16xf32> to vector<16x16xf32>
    %312 = vector.shape_cast %309 : vector<16x16xf32> to vector<1x16x16xf32>
    tpu.vector_store %arg14[%c30_327, %c0_328, %c0_329], %312 {strides = array<i32>} : memref<32x16x16xf32, #tpu.memory_space<vmem>>, vector<1x16x16xf32>,
    %c0_330 = arith.constant 0 : index
    %c496_331 = arith.constant 496 : index
    %313 = vector.load %arg16[%c0_330, %c496_331] : memref<16x512xf32, #tpu.memory_space<vmem>>, vector<16x16xf32>
    %c31_332 = arith.constant 31 : index
    %c0_333 = arith.constant 0 : index
    %c0_334 = arith.constant 0 : index
    %314 = vector.load %arg14[%c31_332, %c0_333, %c0_334] : memref<32x16x16xf32, #tpu.memory_space<vmem>>, vector<1x16x16xf32>
    %315 = vector.shape_cast %314 : vector<1x16x16xf32> to vector<16x16xf32>
    %316 = vector.shape_cast %313 : vector<16x16xf32> to vector<1x16x16xf32>
    tpu.vector_store %arg14[%c31_332, %c0_333, %c0_334], %316 {strides = array<i32>} : memref<32x16x16xf32, #tpu.memory_space<vmem>>, vector<1x16x16xf32>,
    return
  }
  func.func @transform_0(%arg0: i32) -> (i32, i32, i32) {
    %c0_i32 = arith.constant 0 : i32
    %c0_i32_0 = arith.constant 0 : i32
    %c0_i32_1 = arith.constant 0 : i32
    return %arg0, %c0_i32, %c0_i32_0 : i32, i32, i32
  }
  func.func @transform_1(%arg0: i32) -> (i32, i32) {
    %c0_i32 = arith.constant 0 : i32
    %c0_i32_0 = arith.constant 0 : i32
    %c0_i32_1 = arith.constant 0 : i32
    return %c0_i32, %c0_i32_0 : i32, i32
  }
  func.func @transform_2(%arg0: i32) -> (i32, i32, i32) {
    %c0_i32 = arith.constant 0 : i32
    %c0_i32_0 = arith.constant 0 : i32
    %c0_i32_1 = arith.constant 0 : i32
    %c0_i32_2 = arith.constant 0 : i32
    return %c0_i32, %c0_i32_0, %c0_i32_1 : i32, i32, i32
  }
  func.func @transform_3(%arg0: i32) -> (i32, i32) {
    %c0_i32 = arith.constant 0 : i32
    %c0_i32_0 = arith.constant 0 : i32
    %c0_i32_1 = arith.constant 0 : i32
    return %c0_i32, %c0_i32_0 : i32, i32
  }
  func.func @transform_4(%arg0: i32) -> (i32, i32) {
    %c0_i32 = arith.constant 0 : i32
    %c0_i32_0 = arith.constant 0 : i32
    %c0_i32_1 = arith.constant 0 : i32
    return %c0_i32, %c0_i32_0 : i32, i32
  }
  func.func @transform_5(%arg0: i32) -> (i32, i32, i32) {
    %c0_i32 = arith.constant 0 : i32
    %c0_i32_0 = arith.constant 0 : i32
    %c0_i32_1 = arith.constant 0 : i32
    %c0_i32_2 = arith.constant 0 : i32
    return %c0_i32, %c0_i32_0, %c0_i32_1 : i32, i32, i32
  }
  func.func @transform_6(%arg0: i32) -> (i32, i32) {
    %c0_i32 = arith.constant 0 : i32
    %c0_i32_0 = arith.constant 0 : i32
    %c0_i32_1 = arith.constant 0 : i32
    return %c0_i32, %c0_i32_0 : i32, i32
  }
  func.func @transform_7(%arg0: i32) -> (i32, i32) {
    %c0_i32 = arith.constant 0 : i32
    %c0_i32_0 = arith.constant 0 : i32
    %c0_i32_1 = arith.constant 0 : i32
    return %c0_i32, %c0_i32_0 : i32, i32
  }
  func.func @transform_8(%arg0: i32) -> (i32, i32, i32) {
    %c0_i32 = arith.constant 0 : i32
    %c0_i32_0 = arith.constant 0 : i32
    %c0_i32_1 = arith.constant 0 : i32
    %c0_i32_2 = arith.constant 0 : i32
    return %c0_i32, %c0_i32_0, %c0_i32_1 : i32, i32, i32
  }
  func.func @transform_9(%arg0: i32) -> (i32, i32) {
    %c0_i32 = arith.constant 0 : i32
    %c0_i32_0 = arith.constant 0 : i32
    %c0_i32_1 = arith.constant 0 : i32
    return %c0_i32, %c0_i32_0 : i32, i32
  }
  func.func @transform_10(%arg0: i32) -> (i32, i32) {
    %c0_i32 = arith.constant 0 : i32
    %c0_i32_0 = arith.constant 0 : i32
    %c0_i32_1 = arith.constant 0 : i32
    return %c0_i32, %c0_i32_0 : i32, i32
  }
  func.func @transform_11(%arg0: i32) -> (i32, i32, i32) {
    %c0_i32 = arith.constant 0 : i32
    %c0_i32_0 = arith.constant 0 : i32
    %c0_i32_1 = arith.constant 0 : i32
    %c0_i32_2 = arith.constant 0 : i32
    return %c0_i32, %c0_i32_0, %c0_i32_1 : i32, i32, i32
  }
  func.func @transform_12(%arg0: i32) -> (i32, i32) {
    %c0_i32 = arith.constant 0 : i32
    %c0_i32_0 = arith.constant 0 : i32
    %c0_i32_1 = arith.constant 0 : i32
    return %c0_i32, %c0_i32_0 : i32, i32
  }
  func.func @transform_13(%arg0: i32) -> (i32, i32, i32) {
    %c0_i32 = arith.constant 0 : i32
    %c0_i32_0 = arith.constant 0 : i32
    %c0_i32_1 = arith.constant 0 : i32
    return %arg0, %c0_i32, %c0_i32_0 : i32, i32, i32
  }
}

</mosaic_0001>

<bundles_post_ra>
// kernel: _lambda_.1
= control target key start
LH: loop header
LB: loop body
LE: loop exit
PB: predicated region body
PF: predicated region fallthrough
CT: control target
= control target key end

     0   :  { %s6966_s25 = smov 0   ;;  %s10755_s0 = inlined_call_operand.vmem [shape: f32[64,16,16], index: 0, kind: input, shape index: {}]   ;;  %s10756_s1 = inlined_call_operand.vmem [shape: f32[96,16], index: 1, kind: input, shape index: {}]   ;;  %s10757_s2 = inlined_call_operand.vmem [shape: f32[3,512,256], index: 2, kind: input, shape index: {}]   ;;  %s10758_s3 = inlined_call_operand.vmem [shape: f32[32,1], index: 3, kind: input, shape index: {}]   ;;  %s10759_s4 = inlined_call_operand.vmem [shape: f32[96,32], index: 4, kind: input, shape index: {}]   ;;  %s10760_s5 = inlined_call_operand.vmem [shape: f32[3,256,128], index: 5, kind: input, shape index: {}]   ;;  %s10761_s6 = inlined_call_operand.vmem [shape: f32[32,1], index: 6, kind: input, shape index: {}]   ;;  %s10762_s7 = inlined_call_operand.vmem [shape: f32[96,32], index: 7, kind: input, shape index: {}]   ;;  %s10763_s8 = inlined_call_operand.vmem [shape: f32[3,128,256], index: 8, kind: input, shape index: {}]   ;;  %s10764_s9 = inlined_call_operand.vmem [shape: f32[32,1], index: 9, kind: input, shape index: {}]   ;;  %s10765_s10 = inlined_call_operand.vmem [shape: f32[48,32], index: 10, kind: input, shape index: {}]   ;;  %s10766_s11 = inlined_call_operand.vmem [shape: f32[3,256,512], index: 11, kind: input, shape index: {}]   ;;  %s10767_s12 = inlined_call_operand.vmem [shape: f32[16,1], index: 12, kind: input, shape index: {}]   ;;  %s10768_s13 = inlined_call_operand.vmem [shape: f32[64,16,16], index: 13, kind: output, shape index: {}]  }
   0x1 LB: > { %s4789_s26 = sadd.s32 4294967295, %s6885_s25   ;;  %p4793_p0 = scmp.ge.s32.totalorder %s6885_s25, 1  ;;  %s6885_s25 = sphi %s6966_s25, %s23_s25  }
   0x2   : > { %p389_p1 = scmp.lt.s32.totalorder %s6885_s25, 3 }
   0x4   : > { %p390_p2 = pnand %p4793_p0, %p389_p1 }
   0x5   : > { %s4794_s27 = sshll.u32 (!%p390_p2), %s4789_s26, 5  ;;  %s10769_s15 = smov (!%p390_p2), 16   ;;  %vm451_vm0 = vcmask (!%p390_p2), 130048   ;;  %v6894_v34 = vmov (!%p390_p2), 0.0   ;;  %vm465_vm1 = vcmask (!%p390_p2), 261248   ;;  %vm479_vm2 = vcmask (!%p390_p2), 392448  }
   0x6   : > { %393 = sbr.rel (%p390_p2) target bundleno = 2833 (0xb11), region = 72  ;;  %p436_p3 = scmp.lt.s32.totalorder (!%p390_p2), %s4794_s27, 63  ;;  %960 = vmatprep.mubr.f32.mxu0 (!%p390_p2), %v6894_v34  ;;  %1097 = vmatprep.mubr.f32.mxu1 (!%p390_p2), %v6894_v34  ;;  %vm493_vm3 = vcmask (!%p390_p2), 523648   ;;  %vm507_vm4 = vcmask (!%p390_p2), 654848   ;;  %vm521_vm5 = vcmask (!%p390_p2), 786048   ;;  %vm535_vm6 = vcmask (!%p390_p2), 917248  }
   0x7   : > { %s10771_s16 = smov (!%p390_p2), 32   ;;  %s10773_s17 = smov (!%p390_p2), 48   ;;  %vm549_vm7 = vcmask (!%p390_p2), 1048448  }
   0x8   : > { %s10775_s18 = smov (!%p390_p2), 64   ;;  %s6891_s19 = smov (!%p390_p2), 80  }
   0x9   : > { %s6892_s20 = smov (!%p390_p2), 96   ;;  %s6893_s21 = smov (!%p390_p2), 112  }
   0xa   : > { %s10779_s26 = smov (!%p390_p2), 32   ;;  %s10780_s29 = smov (!%p390_p2), 16  }
   0xd   : > { %s10782_s27 = smov (!%p436_p3, %s4794_s27), 63 }
   0xe   : > { %s5620_s28 = sshll.u32 %s10782_s27, 4  ;;  %s10777_s27 = smov 64  }
   0xf   : > { %s6982_s14 = scalar_lea.vmem %s10755_s0, %s5620_s28  ;;  %s10566_s24 = scalar_lea.vmem %s10768_s13, %s5620_s28 }
  0x10   : > { %v4816_v0 = vld [vmem:[%s6982_s14 + $0x90] sm:$0xff]  ;;  %v4817_v2 = vld [vmem:[%s6982_s14 + $0x98] sm:$0xff]  ;;  %v4818_v4 = vld [vmem:[%s6982_s14 + $0xa0] sm:$0xff]  ;;  %s10778_s28 = smov 48  }
  0x11   : > { %v4800_v1 = vld [vmem:[%s6982_s14 + $0x10] sm:$0xff]  ;;  %562 = vrot.lane.b32.xlu0 %v4816_v0, %s10769_s15  ;;  %v4801_v3 = vld [vmem:[%s6982_s14 + $0x18] sm:$0xff]  ;;  %v4819_v5 = vld [vmem:[%s6982_s14 + $0xa8] sm:$0xff] }
  0x12   : > { %459 = vrot.lane.b32.xlu1 %v4800_v1, %s10769_s15  ;;  %v4802_v6 = vld [vmem:[%s6982_s14 + $0x20] sm:$0xff]  ;;  %v4803_v7 = vld [vmem:[%s6982_s14 + $0x28] sm:$0xff]  ;;  %v4820_v8 = vld [vmem:[%s6982_s14 + $0xb0] sm:$0xff] }
  0x13   : > { %v4821_v9 = vld [vmem:[%s6982_s14 + $0xb8] sm:$0xff]  ;;  %v4804_v10 = vld [vmem:[%s6982_s14 + $0x30] sm:$0xff]  ;;  %v4814_v12 = vld [vmem:[%s6982_s14 + $0x80] sm:$0xff] }
  0x14   : > { %v4805_v11 = vld [vmem:[%s6982_s14 + $0x38] sm:$0xff]  ;;  %555 = vst.msk [vmem:[#allocation2 + $0x8] sm:$0xff] %vm451_vm0, %v4814_v12  ;;  %v449_v13 = vld [vmem:[%s6982_s14] sm:$0xff]  ;;  %v4815_v14 = vld [vmem:[%s6982_s14 + $0x88] sm:$0xff] }
  0x15   : > { %564 = vrot.lane.b32.xlu0 %v4817_v2, %s10769_s15  ;;  %452 = vst.msk [vmem:[#allocation2] sm:$0xff] %vm451_vm0, %v449_v13  ;;  %v450_v15 = vld [vmem:[%s6982_s14 + $0x8] sm:$0xff]  ;;  %v4822_v16 = vld [vmem:[%s6982_s14 + $0xc0] sm:$0xff]  ;;  %556 = vst.msk [vmem:[#allocation2 + $0x28] sm:$0xff] %vm451_vm0, %v4815_v14 }
  0x16   : > { %461 = vrot.lane.b32.xlu1 %v4801_v3, %s10769_s15  ;;  %v4823_v17 = vld [vmem:[%s6982_s14 + $0xc8] sm:$0xff]  ;;  %453 = vst.msk [vmem:[#allocation2 + $0x20] sm:$0xff] %vm451_vm0, %v450_v15  ;;  %v4806_v18 = vld [vmem:[%s6982_s14 + $0x40] sm:$0xff]  ;;  %v4824_v20 = vld [vmem:[%s6982_s14 + $0xd0] sm:$0xff] }
  0x17   : > { %v4807_v19 = vld [vmem:[%s6982_s14 + $0x48] sm:$0xff]  ;;  %v4825_v21 = vld [vmem:[%s6982_s14 + $0xd8] sm:$0xff]  ;;  %v4808_v22 = vld [vmem:[%s6982_s14 + $0x50] sm:$0xff] }
  0x18   : > { %v4809_v23 = vld [vmem:[%s6982_s14 + $0x58] sm:$0xff]  ;;  %v4826_v24 = vld [vmem:[%s6982_s14 + $0xe0] sm:$0xff]  ;;  %v4827_v25 = vld [vmem:[%s6982_s14 + $0xe8] sm:$0xff] }
  0x19   : > { %575 = vrot.lane.b32.xlu0 %v4818_v4, %s10771_s16  ;;  %v4810_v26 = vld [vmem:[%s6982_s14 + $0x60] sm:$0xff]  ;;  %v4811_v27 = vld [vmem:[%s6982_s14 + $0x68] sm:$0xff]  ;;  %v4828_v28 = vld [vmem:[%s6982_s14 + $0xf0] sm:$0xff] }
  0x1a   : > { %577 = vrot.lane.b32.xlu1 %v4819_v5, %s10771_s16  ;;  %v4829_v29 = vld [vmem:[%s6982_s14 + $0xf8] sm:$0xff]  ;;  %v4846_v30 = vld [vmem:[%s6982_s14 + $0x180] sm:$0xff]  ;;  %v4847_v31 = vld [vmem:[%s6982_s14 + $0x188] sm:$0xff] }
  0x1b   : > { %747 = vst.msk [vmem:[#allocation2 + $0x18] sm:$0xff] %vm451_vm0, %v4846_v30  ;;  %748 = vst.msk [vmem:[#allocation2 + $0x38] sm:$0xff] %vm451_vm0, %v4847_v31  ;;  %v4812_v32 = vld [vmem:[%s6982_s14 + $0x70] sm:$0xff]  ;;  %v4813_v33 = vld [vmem:[%s6982_s14 + $0x78] sm:$0xff] }
  0x1c   : > { %v4830_v35 = vld [vmem:[%s6982_s14 + $0x100] sm:$0xff]  ;;  %v4831_v36 = vld [vmem:[%s6982_s14 + $0x108] sm:$0xff]  ;;  %v4848_v37 = vld [vmem:[%s6982_s14 + $0x190] sm:$0xff] }
  0x1d   : > { %473 = vrot.lane.b32.xlu0 %v4802_v6, %s10771_s16  ;;  %v4849_v38 = vld [vmem:[%s6982_s14 + $0x198] sm:$0xff]  ;;  %651 = vst.msk [vmem:[#allocation2 + $0x10] sm:$0xff] %vm451_vm0, %v4830_v35  ;;  %652 = vst.msk [vmem:[#allocation2 + $0x30] sm:$0xff] %vm451_vm0, %v4831_v36  ;;  %v4832_v39 = vld [vmem:[%s6982_s14 + $0x110] sm:$0xff] }
  0x1e   : > { %475 = vrot.lane.b32.xlu1 %v4803_v7, %s10771_s16  ;;  %v4833_v40 = vld [vmem:[%s6982_s14 + $0x118] sm:$0xff]  ;;  %v4850_v41 = vld [vmem:[%s6982_s14 + $0x1a0] sm:$0xff]  ;;  %v4851_v42 = vld [vmem:[%s6982_s14 + $0x1a8] sm:$0xff] }
  0x1f   : > { %v4834_v43 = vld [vmem:[%s6982_s14 + $0x120] sm:$0xff]  ;;  %v4835_v44 = vld [vmem:[%s6982_s14 + $0x128] sm:$0xff]  ;;  %v4852_v45 = vld [vmem:[%s6982_s14 + $0x1b0] sm:$0xff] }
  0x20   : > { %v4853_v46 = vld [vmem:[%s6982_s14 + $0x1b8] sm:$0xff]  ;;  %v4836_v47 = vld [vmem:[%s6982_s14 + $0x130] sm:$0xff]  ;;  %v4854_v49 = vld [vmem:[%s6982_s14 + $0x1c0] sm:$0xff] }
  0x21   : > { %588 = vrot.lane.b32.xlu0 %v4820_v8, %s10773_s17  ;;  %v4837_v48 = vld [vmem:[%s6982_s14 + $0x138] sm:$0xff]  ;;  %v4855_v50 = vld [vmem:[%s6982_s14 + $0x1c8] sm:$0xff]  ;;  %v4838_v51 = vld [vmem:[%s6982_s14 + $0x140] sm:$0xff] }
  0x22   : > { %590 = vrot.lane.b32.xlu1 %v4821_v9, %s10773_s17  ;;  %v4839_v52 = vld [vmem:[%s6982_s14 + $0x148] sm:$0xff]  ;;  %v4856_v53 = vld [vmem:[%s6982_s14 + $0x1d0] sm:$0xff]  ;;  %v4857_v54 = vld [vmem:[%s6982_s14 + $0x1d8] sm:$0xff] }
  0x23   : > { %v4840_v55 = vld [vmem:[%s6982_s14 + $0x150] sm:$0xff]  ;;  %v4841_v56 = vld [vmem:[%s6982_s14 + $0x158] sm:$0xff]  ;;  %v4858_v57 = vld [vmem:[%s6982_s14 + $0x1e0] sm:$0xff] }
  0x24   : > { %v4859_v58 = vld [vmem:[%s6982_s14 + $0x1e8] sm:$0xff]  ;;  %v4842_v59 = vld [vmem:[%s6982_s14 + $0x160] sm:$0xff]  ;;  %v4860_v61 = vld [vmem:[%s6982_s14 + $0x1f0] sm:$0xff] }
  0x25   : > { %487 = vrot.lane.b32.xlu0 %v4804_v10, %s10773_s17  ;;  %v4843_v60 = vld [vmem:[%s6982_s14 + $0x168] sm:$0xff]  ;;  %v4861_v62 = vld [vmem:[%s6982_s14 + $0x1f8] sm:$0xff]  ;;  %v4844_v63 = vld [vmem:[%s6982_s14 + $0x170] sm:$0xff] }
  0x26   : > { %489 = vrot.lane.b32.xlu1 %v4805_v11, %s10773_s17  ;;  %v4845_v0 = vld [vmem:[%s6982_s14 + $0x178] sm:$0xff]  ;;  %v4887_v35 = vld [vmem:[%s10757_s2 + $0x408] sm:$0xff] }
  0x27   : > { %v4889_v36 = vld [vmem:[%s10757_s2 + $0x418] sm:$0xff] }
  0x29   : > { %601 = vrot.lane.b32.xlu0 %v4822_v16, %s10775_s18 }
  0x2a   : > { %603 = vrot.lane.b32.xlu1 %v4823_v17, %s10775_s18 }
  0x2d   : > { %501 = vrot.lane.b32.xlu0 %v4806_v18, %s10775_s18 }
  0x2e   : > { %503 = vrot.lane.b32.xlu1 %v4807_v19, %s10775_s18 }
  0x31   : > { %614 = vrot.lane.b32.xlu0 %v4824_v20, %s6891_s19 }
  0x32   : > { %616 = vrot.lane.b32.xlu1 %v4825_v21, %s6891_s19 }
  0x35   : > { %515 = vrot.lane.b32.xlu0 %v4808_v22, %s6891_s19 }
  0x36   : > { %517 = vrot.lane.b32.xlu1 %v4809_v23, %s6891_s19 }
  0x39   : > { %627 = vrot.lane.b32.xlu0 %v4826_v24, %s6892_s20 }
  0x3a   : > { %629 = vrot.lane.b32.xlu1 %v4827_v25, %s6892_s20 }
  0x3d   : > { %529 = vrot.lane.b32.xlu0 %v4810_v26, %s6892_s20 }
  0x3e   : > { %531 = vrot.lane.b32.xlu1 %v4811_v27, %s6892_s20 }
  0x41   : > { %640 = vrot.lane.b32.xlu0 %v4828_v28, %s6893_s21 }
  0x42   : > { %642 = vrot.lane.b32.xlu1 %v4829_v29, %s6893_s21 }
  0x45   : > { %543 = vrot.lane.b32.xlu0 %v4812_v32, %s6893_s21 }
  0x46   : > { %545 = vrot.lane.b32.xlu1 %v4813_v33, %s6893_s21 }
  0x49   : > { %754 = vrot.lane.b32.xlu0 %v4848_v37, %s10769_s15  ;;  %v4886_v37 = vld [vmem:[%s10757_s2 + $0x400] sm:$0xff] }
  0x4a   : > { %756 = vrot.lane.b32.xlu1 %v4849_v38, %s10769_s15 }
  0x4d   : > { %658 = vrot.lane.b32.xlu0 %v4832_v39, %s10769_s15 }
  0x4e   : > { %660 = vrot.lane.b32.xlu1 %v4833_v40, %s10769_s15 }
  0x51   : > { %767 = vrot.lane.b32.xlu0 %v4850_v41, %s10771_s16 }
  0x52   : > { %769 = vrot.lane.b32.xlu1 %v4851_v42, %s10771_s16  ;;  %v5804_v42 = vpack.c.bf16 %v4889_v36, %v4887_v35  ;;  %v4912_v35 = vld [vmem:[%s10757_s2 + $0x4d0] sm:$0xff]  ;;  %v4915_v36 = vld [vmem:[%s10757_s2 + $0x4e8] sm:$0xff] }
  0x55   : > { %671 = vrot.lane.b32.xlu0 %v4834_v43, %s10771_s16  ;;  %v4888_v43 = vld [vmem:[%s10757_s2 + $0x410] sm:$0xff] }
  0x56   : > { %673 = vrot.lane.b32.xlu1 %v4835_v44, %s10771_s16 }
  0x59   : > { %780 = vrot.lane.b32.xlu0 %v4852_v45, %s10773_s17  ;;  %v4891_v45 = vld [vmem:[%s10757_s2 + $0x428] sm:$0xff] }
  0x5a   : > { %782 = vrot.lane.b32.xlu1 %v4853_v46, %s10773_s17  ;;  %v4893_v46 = vld [vmem:[%s10757_s2 + $0x438] sm:$0xff] }
  0x5d   : > { %684 = vrot.lane.b32.xlu0 %v4836_v47, %s10773_s17  ;;  %v7167_v47 = vld [vmem:[%s10756_s1] sm:$0xff] }
  0x5e   : > { %686 = vrot.lane.b32.xlu1 %v4837_v48, %s10773_s17  ;;  %v5806_v48 = vpack.c.bf16 %v4888_v43, %v4886_v37  ;;  %v4917_v37 = vld [vmem:[%s10757_s2 + $0x4f8] sm:$0xff]  ;;  %v4914_v43 = vld [vmem:[%s10757_s2 + $0x4e0] sm:$0xff] }
  0x61   : > { %793 = vrot.lane.b32.xlu0 %v4854_v49, %s10775_s18 }
  0x62   : > { %795 = vrot.lane.b32.xlu1 %v4855_v50, %s10775_s18 }
  0x65   : > { %697 = vrot.lane.b32.xlu0 %v4838_v51, %s10775_s18  ;;  %v5808_v51 = vpack.c.bf16 %v4893_v46, %v4891_v45  ;;  %v4919_v45 = vld [vmem:[%s10757_s2 + $0x508] sm:$0xff]  ;;  %v4921_v46 = vld [vmem:[%s10757_s2 + $0x518] sm:$0xff] }
  0x66   : > { %699 = vrot.lane.b32.xlu1 %v4839_v52, %s10775_s18  ;;  %v4890_v52 = vld [vmem:[%s10757_s2 + $0x420] sm:$0xff] }
  0x69   : > { %806 = vrot.lane.b32.xlu0 %v4856_v53, %s6891_s19  ;;  %v4892_v53 = vld [vmem:[%s10757_s2 + $0x430] sm:$0xff] }
  0x6a   : > { %808 = vrot.lane.b32.xlu1 %v4857_v54, %s6891_s19  ;;  %v4895_v54 = vld [vmem:[%s10757_s2 + $0x448] sm:$0xff] }
  0x6d   : > { %710 = vrot.lane.b32.xlu0 %v4840_v55, %s6891_s19  ;;  %v4897_v55 = vld [vmem:[%s10757_s2 + $0x458] sm:$0xff] }
  0x6e   : > { %712 = vrot.lane.b32.xlu1 %v4841_v56, %s6891_s19  ;;  %v7189_v56 = vld [vmem:[%s10756_s1 + $0x8] sm:$0xff] }
  0x71   : > { %819 = vrot.lane.b32.xlu0 %v4858_v57, %s6892_s20  ;;  %v5810_v57 = vpack.c.bf16 %v4892_v53, %v4890_v52  ;;  %v5836_v52 = vpack.c.bf16 %v4921_v46, %v4919_v45  ;;  %v4918_v53 = vld [vmem:[%s10757_s2 + $0x500] sm:$0xff]  ;;  %v4947_v45 = vld [vmem:[%s10757_s2 + $0x5e8] sm:$0xff]  ;;  %v4949_v46 = vld [vmem:[%s10757_s2 + $0x5f8] sm:$0xff] }
  0x72   : > { %821 = vrot.lane.b32.xlu1 %v4859_v58, %s6892_s20 }
  0x75   : > { %723 = vrot.lane.b32.xlu0 %v4842_v59, %s6892_s20 }
  0x76   : > { %725 = vrot.lane.b32.xlu1 %v4843_v60, %s6892_s20  ;;  %v5812_v60 = vpack.c.bf16 %v4897_v55, %v4895_v54  ;;  %v4920_v54 = vld [vmem:[%s10757_s2 + $0x510] sm:$0xff]  ;;  %v4923_v55 = vld [vmem:[%s10757_s2 + $0x528] sm:$0xff] }
  0x79   : > { %832 = vrot.lane.b32.xlu0 %v4860_v61, %s6893_s21  ;;  %v4894_v61 = vld [vmem:[%s10757_s2 + $0x440] sm:$0xff] }
  0x7a   : > { %834 = vrot.lane.b32.xlu1 %v4861_v62, %s6893_s21  ;;  %v4896_v62 = vld [vmem:[%s10757_s2 + $0x450] sm:$0xff] }
  0x7d   : > { %736 = vrot.lane.b32.xlu0 %v4844_v63, %s6893_s21  ;;  %v4899_v63 = vld [vmem:[%s10757_s2 + $0x468] sm:$0xff] }
  0x7e   : > { %738 = vrot.lane.b32.xlu1 %v4845_v0, %s6893_s21  ;;  %v4901_v0 = vld [vmem:[%s10757_s2 + $0x478] sm:$0xff] }
  0x83   : > { %v563_v1 = vpop.permute.xlu0 %562 }
  0x84   : > { %v460_v2 = vpop.permute.xlu1 %459  ;;  %568 = vst.msk [vmem:[#allocation2 + $0x8] sm:$0xff] %vm465_vm1, %v563_v1  ;;  %v7211_v1 = vld [vmem:[%s10756_s1 + $0x10] sm:$0xff] }
  0x85   : > { %466 = vst.msk [vmem:[#allocation2] sm:$0xff] %vm465_vm1, %v460_v2  ;;  %v5814_v2 = vpack.c.bf16 %v4896_v62, %v4894_v61  ;;  %v4922_v62 = vld [vmem:[%s10757_s2 + $0x520] sm:$0xff] }
  0x87   : > { %v565_v3 = vpop.permute.xlu0 %564 }
  0x88   : > { %v462_v4 = vpop.permute.xlu1 %461  ;;  %569 = vst.msk [vmem:[#allocation2 + $0x28] sm:$0xff] %vm465_vm1, %v565_v3 }
  0x89   : > { %467 = vst.msk [vmem:[#allocation2 + $0x20] sm:$0xff] %vm465_vm1, %v462_v4 }
  0x8b   : > { %v576_v5 = vpop.permute.xlu0 %575 }
  0x8c   : > { %v578_v6 = vpop.permute.xlu1 %577  ;;  %581 = vst.msk [vmem:[#allocation2 + $0x8] sm:$0xff] %vm479_vm2, %v576_v5  ;;  %v5816_v5 = vpack.c.bf16 %v4901_v0, %v4899_v63  ;;  %v4924_v63 = vld [vmem:[%s10757_s2 + $0x530] sm:$0xff]  ;;  %v4927_v0 = vld [vmem:[%s10757_s2 + $0x548] sm:$0xff] }
  0x8d   : > { %582 = vst.msk [vmem:[#allocation2 + $0x28] sm:$0xff] %vm479_vm2, %v578_v6  ;;  %v4898_v6 = vld [vmem:[%s10757_s2 + $0x460] sm:$0xff] }
  0x8f   : > { %v474_v7 = vpop.permute.xlu0 %473 }
  0x90   : > { %v476_v8 = vpop.permute.xlu1 %475  ;;  %480 = vst.msk [vmem:[#allocation2] sm:$0xff] %vm479_vm2, %v474_v7  ;;  %v4900_v7 = vld [vmem:[%s10757_s2 + $0x470] sm:$0xff] }
  0x91   : > { %481 = vst.msk [vmem:[#allocation2 + $0x20] sm:$0xff] %vm479_vm2, %v476_v8  ;;  %v4903_v8 = vld [vmem:[%s10757_s2 + $0x488] sm:$0xff] }
  0x93   : > { %v589_v9 = vpop.permute.xlu0 %588 }
  0x94   : > { %v591_v10 = vpop.permute.xlu1 %590  ;;  %594 = vst.msk [vmem:[#allocation2 + $0x8] sm:$0xff] %vm493_vm3, %v589_v9  ;;  %v4905_v9 = vld [vmem:[%s10757_s2 + $0x498] sm:$0xff] }
  0x95   : > { %595 = vst.msk [vmem:[#allocation2 + $0x28] sm:$0xff] %vm493_vm3, %v591_v10  ;;  %v7233_v10 = vld [vmem:[%s10756_s1 + $0x18] sm:$0xff] }
  0x97   : > { %v488_v11 = vpop.permute.xlu0 %487 }
  0x98   : > { %v490_v12 = vpop.permute.xlu1 %489  ;;  %494 = vst.msk [vmem:[#allocation2] sm:$0xff] %vm493_vm3, %v488_v11  ;;  %v5818_v11 = vpack.c.bf16 %v4900_v7, %v4898_v6  ;;  %v4926_v7 = vld [vmem:[%s10757_s2 + $0x540] sm:$0xff] }
  0x99   : > { %495 = vst.msk [vmem:[#allocation2 + $0x20] sm:$0xff] %vm493_vm3, %v490_v12 }
  0x9b   : > { %v602_v13 = vpop.permute.xlu0 %601 }
  0x9c   : > { %v604_v14 = vpop.permute.xlu1 %603  ;;  %607 = vst.msk [vmem:[#allocation2 + $0x8] sm:$0xff] %vm507_vm4, %v602_v13 }
  0x9d   : > { %608 = vst.msk [vmem:[#allocation2 + $0x28] sm:$0xff] %vm507_vm4, %v604_v14  ;;  %v5820_v14 = vpack.c.bf16 %v4905_v9, %v4903_v8  ;;  %v4928_v8 = vld [vmem:[%s10757_s2 + $0x550] sm:$0xff]  ;;  %v4931_v9 = vld [vmem:[%s10757_s2 + $0x568] sm:$0xff] }
  0x9f   : > { %v502_v15 = vpop.permute.xlu0 %501 }
  0xa0   : > { %v504_v16 = vpop.permute.xlu1 %503  ;;  %508 = vst.msk [vmem:[#allocation2] sm:$0xff] %vm507_vm4, %v502_v15  ;;  %v4902_v15 = vld [vmem:[%s10757_s2 + $0x480] sm:$0xff] }
  0xa1   : > { %509 = vst.msk [vmem:[#allocation2 + $0x20] sm:$0xff] %vm507_vm4, %v504_v16  ;;  %v4904_v16 = vld [vmem:[%s10757_s2 + $0x490] sm:$0xff] }
  0xa3   : > { %v615_v17 = vpop.permute.xlu0 %614 }
  0xa4   : > { %v617_v18 = vpop.permute.xlu1 %616  ;;  %620 = vst.msk [vmem:[#allocation2 + $0x8] sm:$0xff] %vm521_vm5, %v615_v17  ;;  %v4907_v17 = vld [vmem:[%s10757_s2 + $0x4a8] sm:$0xff] }
  0xa5   : > { %621 = vst.msk [vmem:[#allocation2 + $0x28] sm:$0xff] %vm521_vm5, %v617_v18  ;;  %v4909_v18 = vld [vmem:[%s10757_s2 + $0x4b8] sm:$0xff] }
  0xa7   : > { %v516_v19 = vpop.permute.xlu0 %515 }
  0xa8   : > { %v518_v20 = vpop.permute.xlu1 %517  ;;  %522 = vst.msk [vmem:[#allocation2] sm:$0xff] %vm521_vm5, %v516_v19  ;;  %v7255_v19 = vld [vmem:[%s10756_s1 + $0x20] sm:$0xff] }
  0xa9   : > { %523 = vst.msk [vmem:[#allocation2 + $0x20] sm:$0xff] %vm521_vm5, %v518_v20  ;;  %v5822_v20 = vpack.c.bf16 %v4904_v16, %v4902_v15  ;;  %v4930_v16 = vld [vmem:[%s10757_s2 + $0x560] sm:$0xff] }
  0xab   : > { %v628_v21 = vpop.permute.xlu0 %627 }
  0xac   : > { %v630_v22 = vpop.permute.xlu1 %629  ;;  %633 = vst.msk [vmem:[#allocation2 + $0x8] sm:$0xff] %vm535_vm6, %v628_v21 }
  0xad   : > { %634 = vst.msk [vmem:[#allocation2 + $0x28] sm:$0xff] %vm535_vm6, %v630_v22 }
  0xaf   : > { %v530_v23 = vpop.permute.xlu0 %529 }
  0xb0   : > { %v532_v24 = vpop.permute.xlu1 %531  ;;  %536 = vst.msk [vmem:[#allocation2] sm:$0xff] %vm535_vm6, %v530_v23  ;;  %v5824_v23 = vpack.c.bf16 %v4909_v18, %v4907_v17  ;;  %v4932_v17 = vld [vmem:[%s10757_s2 + $0x570] sm:$0xff] }
  0xb1   : > { %537 = vst.msk [vmem:[#allocation2 + $0x20] sm:$0xff] %vm535_vm6, %v532_v24  ;;  %v4906_v24 = vld [vmem:[%s10757_s2 + $0x4a0] sm:$0xff]  ;;  %v5850_v18 = vpack.c.bf16 %v4932_v17, %v4930_v16 }
  0xb3   : > { %v641_v25 = vpop.permute.xlu0 %640 }
  0xb4   : > { %v643_v26 = vpop.permute.xlu1 %642  ;;  %646 = vst.msk [vmem:[#allocation2 + $0x8] sm:$0xff] %vm549_vm7, %v641_v25  ;;  %v4908_v25 = vld [vmem:[%s10757_s2 + $0x4b0] sm:$0xff] }
  0xb5   : > { %647 = vst.msk [vmem:[#allocation2 + $0x28] sm:$0xff] %vm549_vm7, %v643_v26  ;;  %v4911_v26 = vld [vmem:[%s10757_s2 + $0x4c8] sm:$0xff] }
  0xb7   : > { %v544_v27 = vpop.permute.xlu0 %543 }
  0xb8   : > { %v546_v28 = vpop.permute.xlu1 %545  ;;  %550 = vst.msk [vmem:[#allocation2] sm:$0xff] %vm549_vm7, %v544_v27  ;;  %v4913_v27 = vld [vmem:[%s10757_s2 + $0x4d8] sm:$0xff] }
  0xb9   : > { %551 = vst.msk [vmem:[#allocation2 + $0x20] sm:$0xff] %vm549_vm7, %v546_v28  ;;  %v7277_v28 = vld [vmem:[%s10756_s1 + $0x28] sm:$0xff] }
  0xbb   : > { %v841_v29 = vld [vmem:[#allocation2 + $0x8] sm:$0xff]  ;;  %v755_v31 = vpop.permute.xlu0 %754 }
  0xbc   : > { %v845_v30 = vld [vmem:[#allocation2 + $0x28] sm:$0xff]  ;;  %v757_v32 = vpop.permute.xlu1 %756  ;;  %760 = vst.msk [vmem:[#allocation2 + $0x18] sm:$0xff] %vm465_vm1, %v755_v31 }
  0xbd   : > { %v5796_v33 = vpack.c.bf16 %v845_v30, %v841_v29  ;;  %761 = vst.msk [vmem:[#allocation2 + $0x38] sm:$0xff] %vm465_vm1, %v757_v32  ;;  %v5826_v29 = vpack.c.bf16 %v4908_v25, %v4906_v24  ;;  %v5828_v32 = vpack.c.bf16 %v4913_v27, %v4911_v26 }
  0xbf   : > { %5797 = vmatprep.subr.bf16.mxu0 %v5796_v33  ;;  %v840_v38 = vld [vmem:[#allocation2] sm:$0xff]  ;;  %v659_v40 = vpop.permute.xlu0 %658 }
  0xc0   : > { %v844_v39 = vld [vmem:[#allocation2 + $0x20] sm:$0xff]  ;;  %v661_v41 = vpop.permute.xlu1 %660  ;;  %664 = vst.msk [vmem:[#allocation2 + $0x10] sm:$0xff] %vm465_vm1, %v659_v40 }
  0xc1   : > { %v5798_v44 = vpack.c.bf16 %v844_v39, %v840_v38  ;;  %665 = vst.msk [vmem:[#allocation2 + $0x30] sm:$0xff] %vm465_vm1, %v661_v41  ;;  %v4910_v33 = vld [vmem:[%s10757_s2 + $0x4c0] sm:$0xff]  ;;  %v7299_v38 = vld [vmem:[%s10756_s1 + $0x30] sm:$0xff]  ;;  %vm2166_vm1 = vcmask 261120  }
  0xc2   : > { %v5830_v39 = vpack.c.bf16 %v4912_v35, %v4910_v33  ;;  %v4938_v33 = vld [vmem:[%s10757_s2 + $0x5a0] sm:$0xff]  ;;  %v4940_v35 = vld [vmem:[%s10757_s2 + $0x5b0] sm:$0xff] }
  0xc3   : > { %5799 = vmatpush1.bf16.msra.mxu0 %v5798_v44  ;;  %v768_v49 = vpop.permute.xlu0 %767  ;;  %v4916_v44 = vld [vmem:[%s10757_s2 + $0x4f0] sm:$0xff] }
  0xc4   : > { %v770_v50 = vpop.permute.xlu1 %769  ;;  %5805 = vmatprep.subr.bf16.mxu0 %v5804_v42  ;;  %773 = vst.msk [vmem:[#allocation2 + $0x18] sm:$0xff] %vm479_vm2, %v768_v49  ;;  %v5832_v42 = vpack.c.bf16 %v4917_v37, %v4915_v36  ;;  %v5834_v49 = vpack.c.bf16 %v4916_v44, %v4914_v43  ;;  %v857_v36 = vld [vmem:[%s10756_s1 + $0x48] sm:$0xff]  ;;  %v5858_v37 = vpack.c.bf16 %v4940_v35, %v4938_v33  ;;  %v858_v43 = vld [vmem:[%s10756_s1 + $0x50] sm:$0xff]  ;;  %v4973_v35 = vld [vmem:[%s10757_s2 + $0x6b8] sm:$0xff] }
  0xc5   : > { %774 = vst.msk [vmem:[#allocation2 + $0x38] sm:$0xff] %vm479_vm2, %v770_v50  ;;  %v4971_v33 = vld [vmem:[%s10757_s2 + $0x6a8] sm:$0xff] }
  0xc6   : > { %4862 = vmatmul.mubr.msk.f32.vlgmr.msra.gmra.mrb[0].mxu0 %vm451_vm0, %v7167_v47 }
  0xc7   : > { %966 = vmatprep.mubr.f32.mxu0 %v6894_v34  ;;  %5807 = vmatpush1.bf16.msra.mxu0 %v5806_v48  ;;  %v672_v58 = vpop.permute.xlu0 %671  ;;  %v7321_v48 = vld [vmem:[%s10756_s1 + $0x38] sm:$0xff] }
  0xc8   : > { %v674_v59 = vpop.permute.xlu1 %673  ;;  %5809 = vmatprep.subr.bf16.mxu0 %v5808_v51  ;;  %677 = vst.msk [vmem:[#allocation2 + $0x10] sm:$0xff] %vm479_vm2, %v672_v58  ;;  %v5838_v58 = vpack.c.bf16 %v4920_v54, %v4918_v53  ;;  %v4951_v53 = vld [vmem:[%s10757_s2 + $0x608] sm:$0xff]  ;;  %v4953_v54 = vld [vmem:[%s10757_s2 + $0x618] sm:$0xff] }
  0xc9   : > { %678 = vst.msk [vmem:[#allocation2 + $0x30] sm:$0xff] %vm479_vm2, %v674_v59 }
  0xca   : > { %4863 = vmatmul.mubr.msk.f32.gmra.mrb[2].mxu0 %vm451_vm0, %v7189_v56 }
  0xcb   : > { %972 = vmatprep.mubr.f32.mxu0 %v6894_v34  ;;  %5811 = vmatpush1.bf16.msra.mxu0 %v5810_v57  ;;  %v781_v3 = vpop.permute.xlu0 %780  ;;  %v4925_v57 = vld [vmem:[%s10757_s2 + $0x538] sm:$0xff] }
  0xcc   : > { %v783_v4 = vpop.permute.xlu1 %782  ;;  %5813 = vmatprep.subr.bf16.mxu0 %v5812_v60  ;;  %786 = vst.msk [vmem:[#allocation2 + $0x18] sm:$0xff] %vm493_vm3, %v781_v3  ;;  %v5840_v61 = vpack.c.bf16 %v4925_v57, %v4923_v55  ;;  %v5842_v3 = vpack.c.bf16 %v4924_v63, %v4922_v62  ;;  %v5868_v55 = vpack.c.bf16 %v4953_v54, %v4951_v53  ;;  %v4983_v53 = vld [vmem:[%s10757_s2 + $0x708] sm:$0xff]  ;;  %v4985_v54 = vld [vmem:[%s10757_s2 + $0x718] sm:$0xff] }
  0xcd   : > { %787 = vst.msk [vmem:[#allocation2 + $0x38] sm:$0xff] %vm493_vm3, %v783_v4 }
  0xce   : > { %4864 = vmatmul.mubr.msk.f32.gmra.mrb[4].mxu0 %vm451_vm0, %v7211_v1 }
  0xcf   : > { %978 = vmatprep.mubr.f32.mxu0 %v6894_v34  ;;  %5815 = vmatpush1.bf16.msra.mxu0 %v5814_v2  ;;  %v685_v12 = vpop.permute.xlu0 %684  ;;  %v4929_v2 = vld [vmem:[%s10757_s2 + $0x558] sm:$0xff] }
  0xd0   : > { %v687_v13 = vpop.permute.xlu1 %686  ;;  %5817 = vmatprep.subr.bf16.mxu0 %v5816_v5  ;;  %690 = vst.msk [vmem:[#allocation2 + $0x10] sm:$0xff] %vm493_vm3, %v685_v12  ;;  %v5844_v6 = vpack.c.bf16 %v4929_v2, %v4927_v0  ;;  %v5846_v12 = vpack.c.bf16 %v4928_v8, %v4926_v7  ;;  %v4950_v2 = vld [vmem:[%s10757_s2 + $0x600] sm:$0xff] }
  0xd1   : > { %691 = vst.msk [vmem:[#allocation2 + $0x30] sm:$0xff] %vm493_vm3, %v687_v13 }
  0xd2   : > { %4865 = vmatmul.mubr.msk.f32.gmra.mrb[6].mxu0 %vm451_vm0, %v7233_v10 }
  0xd3   : > { %984 = vmatprep.mubr.f32.mxu0 %v6894_v34  ;;  %5819 = vmatpush1.bf16.msra.mxu0 %v5818_v11  ;;  %v794_v21 = vpop.permute.xlu0 %793  ;;  %v4933_v11 = vld [vmem:[%s10757_s2 + $0x578] sm:$0xff] }
  0xd4   : > { %v796_v22 = vpop.permute.xlu1 %795  ;;  %5821 = vmatprep.subr.bf16.mxu0 %v5820_v14  ;;  %799 = vst.msk [vmem:[#allocation2 + $0x18] sm:$0xff] %vm507_vm4, %v794_v21  ;;  %v5848_v15 = vpack.c.bf16 %v4933_v11, %v4931_v9  ;;  %v4954_v11 = vld [vmem:[%s10757_s2 + $0x620] sm:$0xff] }
  0xd5   : > { %800 = vst.msk [vmem:[#allocation2 + $0x38] sm:$0xff] %vm507_vm4, %v796_v22 }
  0xd6   : > { %4866 = vmatmul.mubr.msk.f32.gmra.mrb[8].mxu0 %vm451_vm0, %v7255_v19 }
  0xd7   : > { %990 = vmatprep.mubr.f32.mxu0 %v6894_v34  ;;  %5823 = vmatpush1.bf16.msra.mxu0 %v5822_v20  ;;  %v698_v30 = vpop.permute.xlu0 %697 }
  0xd8   : > { %v700_v31 = vpop.permute.xlu1 %699  ;;  %5825 = vmatprep.subr.bf16.mxu0 %v5824_v23  ;;  %703 = vst.msk [vmem:[#allocation2 + $0x10] sm:$0xff] %vm507_vm4, %v698_v30  ;;  %v4939_v30 = vld [vmem:[%s10757_s2 + $0x5a8] sm:$0xff] }
  0xd9   : > { %704 = vst.msk [vmem:[#allocation2 + $0x30] sm:$0xff] %vm507_vm4, %v700_v31  ;;  %v4941_v31 = vld [vmem:[%s10757_s2 + $0x5b8] sm:$0xff] }
  0xda   : > { %4867 = vmatmul.mubr.msk.f32.gmra.mrb[10].mxu0 %vm451_vm0, %v7277_v28 }
  0xdb   : > { %996 = vmatprep.mubr.f32.mxu0 %v6894_v34  ;;  %5827 = vmatpush1.bf16.msra.mxu0 %v5826_v29  ;;  %v807_v40 = vpop.permute.xlu0 %806 }
  0xdc   : > { %v809_v41 = vpop.permute.xlu1 %808  ;;  %5829 = vmatprep.subr.bf16.mxu0 %v5828_v32  ;;  %812 = vst.msk [vmem:[#allocation2 + $0x18] sm:$0xff] %vm521_vm5, %v807_v40  ;;  %v5856_v32 = vpack.c.bf16 %v4941_v31, %v4939_v30  ;;  %v4966_v30 = vld [vmem:[%s10757_s2 + $0x680] sm:$0xff]  ;;  %v4968_v31 = vld [vmem:[%s10757_s2 + $0x690] sm:$0xff] }
  0xdd   : > { %813 = vst.msk [vmem:[#allocation2 + $0x38] sm:$0xff] %vm521_vm5, %v809_v41  ;;  %v4942_v41 = vld [vmem:[%s10757_s2 + $0x5c0] sm:$0xff] }
  0xde   : > { %4868 = vmatmul.mubr.msk.f32.gmra.mrb[12].mxu0 %vm451_vm0, %v7299_v38 }
  0xdf   : > { %1002 = vmatprep.mubr.f32.mxu0 %v6894_v34  ;;  %5831 = vmatpush1.bf16.msra.mxu0 %v5830_v39  ;;  %v711_v50 = vpop.permute.xlu0 %710  ;;  %v4945_v39 = vld [vmem:[%s10757_s2 + $0x5d8] sm:$0xff] }
  0xe0   : > { %v713_v51 = vpop.permute.xlu1 %712  ;;  %5833 = vmatprep.subr.bf16.mxu0 %v5832_v42  ;;  %716 = vst.msk [vmem:[#allocation2 + $0x10] sm:$0xff] %vm521_vm5, %v711_v50  ;;  %v4944_v42 = vld [vmem:[%s10757_s2 + $0x5d0] sm:$0xff] }
  0xe1   : > { %717 = vst.msk [vmem:[#allocation2 + $0x30] sm:$0xff] %vm521_vm5, %v713_v51  ;;  %v5862_v44 = vpack.c.bf16 %v4944_v42, %v4942_v41  ;;  %v4948_v50 = vld [vmem:[%s10757_s2 + $0x5f0] sm:$0xff]  ;;  %v859_v51 = vld [vmem:[%s10756_s1 + $0x58] sm:$0xff] }
  0xe2   : > { %4869 = vmatmul.mubr.msk.f32.gmra.mrb[14].mxu0 %vm451_vm0, %v7321_v48  ;;  %v4977_v41 = vld [vmem:[%s10757_s2 + $0x6d8] sm:$0xff] }
  0xe3   : > { %5835 = vmatpush1.bf16.msra.mxu0 %v5834_v49  ;;  %1008 = vmatprep.mubr.f32.mxu0 %v6894_v34  ;;  %v820_v59 = vpop.permute.xlu0 %819  ;;  %v4946_v49 = vld [vmem:[%s10757_s2 + $0x5e0] sm:$0xff] }
  0xe4   : > { %v822_v60 = vpop.permute.xlu1 %821  ;;  %5837 = vmatprep.subr.bf16.mxu0 %v5836_v52  ;;  %825 = vst.msk [vmem:[#allocation2 + $0x18] sm:$0xff] %vm535_vm6, %v820_v59  ;;  %v5866_v52 = vpack.c.bf16 %v4948_v50, %v4946_v49 }
  0xe5   : > { %826 = vst.msk [vmem:[#allocation2 + $0x38] sm:$0xff] %vm535_vm6, %v822_v60 }
  0xe7   : > { %5839 = vmatpush1.bf16.msra.mxu0 %v5838_v58  ;;  %v724_v4 = vpop.permute.xlu0 %723 }
  0xe8   : > { %v726_v5 = vpop.permute.xlu1 %725  ;;  %5841 = vmatprep.subr.bf16.mxu0 %v5840_v61  ;;  %729 = vst.msk [vmem:[#allocation2 + $0x10] sm:$0xff] %vm535_vm6, %v724_v4  ;;  %v4955_v4 = vld [vmem:[%s10757_s2 + $0x628] sm:$0xff] }
  0xe9   : > { %730 = vst.msk [vmem:[#allocation2 + $0x30] sm:$0xff] %vm535_vm6, %v726_v5  ;;  %v4957_v5 = vld [vmem:[%s10757_s2 + $0x638] sm:$0xff] }
  0xea   : > { %v5872_v9 = vpack.c.bf16 %v4957_v5, %v4955_v4  ;;  %v4984_v4 = vld [vmem:[%s10757_s2 + $0x710] sm:$0xff]  ;;  %v4987_v5 = vld [vmem:[%s10757_s2 + $0x728] sm:$0xff] }
  0xeb   : > { %5843 = vmatpush1.bf16.msra.mxu0 %v5842_v3  ;;  %v833_v13 = vpop.permute.xlu0 %832  ;;  %v4952_v3 = vld [vmem:[%s10757_s2 + $0x610] sm:$0xff] }
  0xec   : > { %v835_v14 = vpop.permute.xlu1 %834  ;;  %5845 = vmatprep.subr.bf16.mxu0 %v5844_v6  ;;  %838 = vst.msk [vmem:[#allocation2 + $0x18] sm:$0xff] %vm549_vm7, %v833_v13  ;;  %v5870_v7 = vpack.c.bf16 %v4952_v3, %v4950_v2  ;;  %v4959_v13 = vld [vmem:[%s10757_s2 + $0x648] sm:$0xff]  ;;  %v5900_v2 = vpack.c.bf16 %v4985_v54, %v4983_v53  ;;  %v4982_v3 = vld [vmem:[%s10757_s2 + $0x700] sm:$0xff]  ;;  %v5012_v54 = vld [vmem:[%s10757_s2 + $0x7f0] sm:$0xff] }
  0xed   : > { %839 = vst.msk [vmem:[#allocation2 + $0x38] sm:$0xff] %vm549_vm7, %v835_v14  ;;  %v4961_v14 = vld [vmem:[%s10757_s2 + $0x658] sm:$0xff]  ;;  %v5010_v53 = vld [vmem:[%s10757_s2 + $0x7e0] sm:$0xff] }
  0xee   : > { %v5876_v17 = vpack.c.bf16 %v4961_v14, %v4959_v13  ;;  %v4993_v13 = vld [vmem:[%s10757_s2 + $0x758] sm:$0xff] }
  0xef   : > { %5847 = vmatpush1.bf16.msra.mxu0 %v5846_v12  ;;  %v737_v20 = vpop.permute.xlu0 %736  ;;  %v4956_v12 = vld [vmem:[%s10757_s2 + $0x630] sm:$0xff] }
  0xf0   : > { %v739_v21 = vpop.permute.xlu1 %738  ;;  %5849 = vmatprep.subr.bf16.mxu0 %v5848_v15  ;;  %742 = vst.msk [vmem:[#allocation2 + $0x10] sm:$0xff] %vm549_vm7, %v737_v20  ;;  %v5874_v15 = vpack.c.bf16 %v4956_v12, %v4954_v11  ;;  %v4960_v20 = vld [vmem:[%s10757_s2 + $0x650] sm:$0xff]  ;;  %v4991_v12 = vld [vmem:[%s10757_s2 + $0x748] sm:$0xff] }
  0xf1   : > { %743 = vst.msk [vmem:[#allocation2 + $0x30] sm:$0xff] %vm549_vm7, %v739_v21  ;;  %v4988_v11 = vld [vmem:[%s10757_s2 + $0x730] sm:$0xff] }
  0xf3   : > { %5851 = vmatpush1.bf16.msra.mxu0 %v5850_v18  ;;  %v843_v22 = vld [vmem:[#allocation2 + $0x18] sm:$0xff]  ;;  %v4958_v18 = vld [vmem:[%s10757_s2 + $0x640] sm:$0xff] }
  0xf4   : > { %v847_v23 = vld [vmem:[#allocation2 + $0x38] sm:$0xff] }
  0xf5   : > { %v5800_v24 = vpack.c.bf16 %v847_v23, %v843_v22  ;;  %v4963_v22 = vld [vmem:[%s10757_s2 + $0x668] sm:$0xff]  ;;  %v4965_v23 = vld [vmem:[%s10757_s2 + $0x678] sm:$0xff] }
  0xf7   : > { %5801 = vmatprep.subr.bf16.mxu1 %v5800_v24  ;;  %v842_v25 = vld [vmem:[#allocation2 + $0x10] sm:$0xff]  ;;  %v5878_v24 = vpack.c.bf16 %v4960_v20, %v4958_v18  ;;  %v4995_v18 = vld [vmem:[%s10757_s2 + $0x768] sm:$0xff]  ;;  %v4997_v20 = vld [vmem:[%s10757_s2 + $0x778] sm:$0xff] }
  0xf8   : > { %v846_v26 = vld [vmem:[#allocation2 + $0x30] sm:$0xff] }
  0xf9   : > { %v5802_v27 = vpack.c.bf16 %v846_v26, %v842_v25  ;;  %v5880_v26 = vpack.c.bf16 %v4965_v23, %v4963_v22  ;;  %v5912_v23 = vpack.c.bf16 %v4997_v20, %v4995_v18  ;;  %v1179_v20 = vld [vmem:[%s10757_s2 + $0x48] sm:$0xff] }
  0xfb   : > { %5803 = vmatpush1.bf16.msra.mxu1 %v5802_v27  ;;  %v4962_v27 = vld [vmem:[%s10757_s2 + $0x660] sm:$0xff] }
  0xfe   : > { %4874 = vmatmul.mubr.msk.f32.vlgmr.msra.gmra.mrb[0].mxu1 %vm451_vm0, %v7167_v47  ;;  %v4935_v47 = vld [vmem:[%s10757_s2 + $0x588] sm:$0xff] }
  0xff   : > { %1103 = vmatprep.mubr.f32.mxu1 %v6894_v34 }
 0x102   : > { %4875 = vmatmul.mubr.msk.f32.gmra.mrb[2].mxu1 %vm451_vm0, %v7189_v56  ;;  %v4937_v56 = vld [vmem:[%s10757_s2 + $0x598] sm:$0xff] }
 0x103   : > { %1109 = vmatprep.mubr.f32.mxu1 %v6894_v34 }
 0x106   : > { %4876 = vmatmul.mubr.msk.f32.gmra.mrb[4].mxu1 %vm451_vm0, %v7211_v1  ;;  %v5852_v1 = vpack.c.bf16 %v4937_v56, %v4935_v47  ;;  %v4964_v47 = vld [vmem:[%s10757_s2 + $0x670] sm:$0xff] }
 0x107   : > { %1115 = vmatprep.mubr.f32.mxu1 %v6894_v34 }
 0x108   : > { %5853 = vmatprep.subr.bf16.mxu0 %v5852_v1  ;;  %v4967_v1 = vld [vmem:[%s10757_s2 + $0x688] sm:$0xff] }
 0x10a   : > { %4877 = vmatmul.mubr.msk.f32.gmra.mrb[6].mxu1 %vm451_vm0, %v7233_v10  ;;  %v4934_v10 = vld [vmem:[%s10757_s2 + $0x580] sm:$0xff] }
 0x10b   : > { %1121 = vmatprep.mubr.f32.mxu1 %v6894_v34 }
 0x10e   : > { %4878 = vmatmul.mubr.msk.f32.gmra.mrb[8].mxu1 %vm451_vm0, %v7255_v19  ;;  %v4936_v19 = vld [vmem:[%s10757_s2 + $0x590] sm:$0xff] }
 0x10f   : > { %1127 = vmatprep.mubr.f32.mxu1 %v6894_v34  ;;  %v5854_v29 = vpack.c.bf16 %v4936_v19, %v4934_v10  ;;  %v4969_v10 = vld [vmem:[%s10757_s2 + $0x698] sm:$0xff]  ;;  %v5882_v19 = vpack.c.bf16 %v4964_v47, %v4962_v27  ;;  %v4999_v27 = vld [vmem:[%s10757_s2 + $0x788] sm:$0xff] }
 0x110   : > { %v5001_v47 = vld [vmem:[%s10757_s2 + $0x798] sm:$0xff] }
 0x111   : > { %5855 = vmatpush1.bf16.msra.mxu0 %v5854_v29  ;;  %v5884_v29 = vpack.c.bf16 %v4969_v10, %v4967_v1  ;;  %v5916_v10 = vpack.c.bf16 %v5001_v47, %v4999_v27  ;;  %v1178_v27 = vld [vmem:[%s10757_s2 + $0x40] sm:$0xff]  ;;  %v1180_v47 = vld [vmem:[%s10757_s2 + $0x50] sm:$0xff] }
 0x112   : > { %4879 = vmatmul.mubr.msk.f32.gmra.mrb[10].mxu1 %vm451_vm0, %v7277_v28  ;;  %v856_v28 = vld [vmem:[%s10756_s1 + $0x40] sm:$0xff]  ;;  %5857 = vmatprep.subr.bf16.mxu0 %v5856_v32 }
 0x113   : > { %1133 = vmatprep.mubr.f32.mxu1 %v6894_v34  ;;  %4870 = vmatmul.mubr.msk.f32.gmra.mrb[16].mxu0 %vm451_vm0, %v856_v28 }
 0x114   : > { %1014 = vmatprep.mubr.f32.mxu0 %v6894_v34 }
 0x115   : > { %5859 = vmatpush1.bf16.msra.mxu0 %v5858_v37  ;;  %v5888_v37 = vpack.c.bf16 %v4973_v35, %v4971_v33 }
 0x116   : > { %4880 = vmatmul.mubr.msk.f32.gmra.mrb[12].mxu1 %vm451_vm0, %v7299_v38  ;;  %v4943_v38 = vld [vmem:[%s10757_s2 + $0x5c8] sm:$0xff] }
 0x117   : > { %1139 = vmatprep.mubr.f32.mxu1 %v6894_v34  ;;  %4871 = vmatmul.mubr.msk.f32.gmra.mrb[18].mxu0 %vm451_vm0, %v857_v36  ;;  %v5860_v40 = vpack.c.bf16 %v4945_v39, %v4943_v38  ;;  %v4970_v38 = vld [vmem:[%s10757_s2 + $0x6a0] sm:$0xff]  ;;  %v4972_v39 = vld [vmem:[%s10757_s2 + $0x6b0] sm:$0xff] }
 0x118   : > { %1020 = vmatprep.mubr.f32.mxu0 %v6894_v34  ;;  %v5890_v42 = vpack.c.bf16 %v4972_v39, %v4970_v38  ;;  %v5007_v39 = vld [vmem:[%s10757_s2 + $0x7c8] sm:$0xff] }
 0x119   : > { %5861 = vmatprep.subr.bf16.mxu0 %v5860_v40  ;;  %v4975_v40 = vld [vmem:[%s10757_s2 + $0x6c8] sm:$0xff] }
 0x11a   : > { %4881 = vmatmul.mubr.msk.f32.gmra.mrb[14].mxu1 %vm451_vm0, %v7321_v48  ;;  %5863 = vmatpush1.bf16.msra.mxu0 %v5862_v44  ;;  %v5864_v48 = vpack.c.bf16 %v4949_v46, %v4947_v45  ;;  %v4974_v44 = vld [vmem:[%s10757_s2 + $0x6c0] sm:$0xff]  ;;  %v4976_v45 = vld [vmem:[%s10757_s2 + $0x6d0] sm:$0xff]  ;;  %v4979_v46 = vld [vmem:[%s10757_s2 + $0x6e8] sm:$0xff] }
 0x11b   : > { %1145 = vmatprep.mubr.f32.mxu1 %v6894_v34  ;;  %4872 = vmatmul.mubr.msk.f32.gmra.mrb[20].mxu0 %vm451_vm0, %v858_v43  ;;  %v5894_v49 = vpack.c.bf16 %v4976_v45, %v4974_v44  ;;  %v5006_v44 = vld [vmem:[%s10757_s2 + $0x7c0] sm:$0xff]  ;;  %v5008_v45 = vld [vmem:[%s10757_s2 + $0x7d0] sm:$0xff] }
 0x11c   : > { %1026 = vmatprep.mubr.f32.mxu0 %v6894_v34  ;;  %5865 = vmatprep.subr.bf16.mxu0 %v5864_v48  ;;  %v4981_v48 = vld [vmem:[%s10757_s2 + $0x6f8] sm:$0xff] }
 0x11d   : > { %v5896_v50 = vpack.c.bf16 %v4981_v48, %v4979_v46  ;;  %v5011_v48 = vld [vmem:[%s10757_s2 + $0x7e8] sm:$0xff] }
 0x11e   : > { %4882 = vmatmul.mubr.msk.f32.gmra.mrb[16].mxu1 %vm451_vm0, %v856_v28  ;;  %5867 = vmatpush1.bf16.msra.mxu0 %v5866_v52  ;;  %v4980_v52 = vld [vmem:[%s10757_s2 + $0x6f0] sm:$0xff] }
 0x11f   : > { %1151 = vmatprep.mubr.f32.mxu1 %v6894_v34  ;;  %4873 = vmatmul.mubr.msk.f32.gmra.mrb[22].mxu0 %vm451_vm0, %v859_v51 }
 0x120   : > { %5869 = vmatprep.subr.bf16.mxu0 %v5868_v55 }
 0x122   : > { %4883 = vmatmul.mubr.msk.f32.gmra.mrb[18].mxu1 %vm451_vm0, %v857_v36  ;;  %v5886_v36 = vpack.c.bf16 %v4968_v31, %v4966_v30  ;;  %v5003_v30 = vld [vmem:[%s10757_s2 + $0x7a8] sm:$0xff]  ;;  %v5005_v31 = vld [vmem:[%s10757_s2 + $0x7b8] sm:$0xff] }
 0x123   : > { %1157 = vmatprep.mubr.f32.mxu1 %v6894_v34  ;;  %v5920_v35 = vpack.c.bf16 %v5005_v31, %v5003_v30  ;;  %v5942_v31 = vpack.c.bf16 %v1180_v47, %v1178_v27  ;;  %v1209_v27 = vld [vmem:[%s10757_s2 + $0x138] sm:$0xff] }
 0x126   : > { %4884 = vmatmul.mubr.msk.f32.gmra.mrb[20].mxu1 %vm451_vm0, %v858_v43  ;;  %v5892_v43 = vpack.c.bf16 %v4977_v41, %v4975_v40  ;;  %v5009_v40 = vld [vmem:[%s10757_s2 + $0x7d8] sm:$0xff] }
 0x127   : > { %1163 = vmatprep.mubr.f32.mxu1 %v6894_v34 }
 0x12a   : > { %4885 = vmatmul.mubr.msk.f32.gmra.mrb[22].mxu1 %vm451_vm0, %v859_v51  ;;  %v4978_v51 = vld [vmem:[%s10757_s2 + $0x6e0] sm:$0xff] }
 0x12b   : > { %v5898_v55 = vpack.c.bf16 %v4980_v52, %v4978_v51 }
 0x199   : > { %v7482_v57 = vpop.f32.mrb[0].mxu0 }
 0x19a   : > { %v7484_v58 = vpop.f32.mrb[1].mxu0 }
 0x19d   : > { %v7486_v59 = vpop.f32.mrb[2].mxu0 }
 0x19e   : > { %v7488_v60 = vpop.f32.mrb[3].mxu0 }
 0x1a1   : > { %v7490_v61 = vpop.f32.mrb[4].mxu0 }
 0x1a2   : > { %v7492_v62 = vpop.f32.mrb[5].mxu0 }
 0x1a5   : > { %v7494_v63 = vpop.f32.mrb[6].mxu0 }
 0x1a6   : > { %v7496_v0 = vpop.f32.mrb[7].mxu0 }
 0x1a9   : > { %v986_v6 = vpop.f32.mrb[8].mxu0 }
 0x1aa   : > { %v988_v8 = vpop.f32.mrb[9].mxu0 }
 0x1ab   : > { %1491 = vmatprep.mubr.f32.mxu0 %v988_v8 }
 0x1ac   : > { %1492 = vmatmul.mubr.f32.vlgmr.msra.gmra.mrb[24].mxu0 %v986_v6  ;;  %v4989_v6 = vld [vmem:[%s10757_s2 + $0x738] sm:$0xff] }
 0x1ad   : > { %5871 = vmatpush1.bf16.msra.mxu0 %v5870_v7  ;;  %v992_v16 = vpop.f32.mrb[10].mxu0  ;;  %v5902_v7 = vpack.c.bf16 %v4984_v4, %v4982_v3  ;;  %v5904_v8 = vpack.c.bf16 %v4989_v6, %v4987_v5  ;;  %v1173_v3 = vld [vmem:[%s10757_s2 + $0x18] sm:$0xff]  ;;  %v5930_v4 = vpack.c.bf16 %v5012_v54, %v5010_v53 }
 0x1ae   : > { %5873 = vmatprep.subr.bf16.mxu0 %v5872_v9  ;;  %v994_v21 = vpop.f32.mrb[11].mxu0  ;;  %v4986_v9 = vld [vmem:[%s10757_s2 + $0x720] sm:$0xff] }
 0x1af   : > { %1497 = vmatprep.mubr.f32.mxu0 %v994_v21  ;;  %v5906_v14 = vpack.c.bf16 %v4988_v11, %v4986_v9  ;;  %v1175_v11 = vld [vmem:[%s10757_s2 + $0x28] sm:$0xff] }
 0x1b0   : > { %1498 = vmatmul.mubr.f32.gmra.mrb[26].mxu0 %v992_v16  ;;  %v4990_v16 = vld [vmem:[%s10757_s2 + $0x740] sm:$0xff] }
 0x1b1   : > { %5875 = vmatpush1.bf16.msra.mxu0 %v5874_v15  ;;  %v998_v25 = vpop.f32.mrb[12].mxu0  ;;  %v5908_v15 = vpack.c.bf16 %v4993_v13, %v4991_v12  ;;  %v1177_v12 = vld [vmem:[%s10757_s2 + $0x38] sm:$0xff] }
 0x1b2   : > { %5877 = vmatprep.subr.bf16.mxu0 %v5876_v17  ;;  %v1000_v56 = vpop.f32.mrb[13].mxu0  ;;  %v4992_v17 = vld [vmem:[%s10757_s2 + $0x750] sm:$0xff] }
 0x1b3   : > { %1503 = vmatprep.mubr.f32.mxu0 %v1000_v56  ;;  %v5910_v21 = vpack.c.bf16 %v4992_v17, %v4990_v16  ;;  %v1174_v16 = vld [vmem:[%s10757_s2 + $0x20] sm:$0xff]  ;;  %v1176_v17 = vld [vmem:[%s10757_s2 + $0x30] sm:$0xff] }
 0x1b4   : > { %1504 = vmatmul.mubr.f32.gmra.mrb[28].mxu0 %v998_v25  ;;  %v4996_v25 = vld [vmem:[%s10757_s2 + $0x770] sm:$0xff] }
 0x1b5   : > { %5879 = vmatpush1.bf16.msra.mxu0 %v5878_v24  ;;  %v1004_v28 = vpop.f32.mrb[14].mxu0  ;;  %v4994_v24 = vld [vmem:[%s10757_s2 + $0x760] sm:$0xff] }
 0x1b6   : > { %5881 = vmatprep.subr.bf16.mxu0 %v5880_v26  ;;  %v1006_v32 = vpop.f32.mrb[15].mxu0  ;;  %v5914_v56 = vpack.c.bf16 %v4996_v25, %v4994_v24 }
 0x1b7   : > { %1509 = vmatprep.mubr.f32.mxu0 %v1006_v32 }
 0x1b8   : > { %1510 = vmatmul.mubr.f32.gmra.mrb[30].mxu0 %v1004_v28  ;;  %v5000_v28 = vld [vmem:[%s10757_s2 + $0x790] sm:$0xff] }
 0x1b9   : > { %5883 = vmatpush1.bf16.msra.mxu0 %v5882_v19  ;;  %v4998_v19 = vld [vmem:[%s10757_s2 + $0x780] sm:$0xff] }
 0x1ba   : > { %5885 = vmatprep.subr.bf16.mxu0 %v5884_v29  ;;  %v5918_v32 = vpack.c.bf16 %v5000_v28, %v4998_v19  ;;  %v1183_v19 = vld [vmem:[%s10757_s2 + $0x68] sm:$0xff]  ;;  %v1185_v28 = vld [vmem:[%s10757_s2 + $0x78] sm:$0xff] }
 0x1bd   : > { %5887 = vmatpush1.bf16.msra.mxu0 %v5886_v36  ;;  %v5002_v36 = vld [vmem:[%s10757_s2 + $0x7a0] sm:$0xff] }
 0x1be   : > { %5889 = vmatprep.subr.bf16.mxu0 %v5888_v37  ;;  %v5004_v37 = vld [vmem:[%s10757_s2 + $0x7b0] sm:$0xff] }
 0x1bf   : > { %v5922_v41 = vpack.c.bf16 %v5004_v37, %v5002_v36  ;;  %v1184_v36 = vld [vmem:[%s10757_s2 + $0x70] sm:$0xff] }
 0x1c1   : > { %5891 = vmatpush1.bf16.msra.mxu0 %v5890_v42 }
 0x1c2   : > { %5893 = vmatprep.subr.bf16.mxu0 %v5892_v43  ;;  %v5924_v43 = vpack.c.bf16 %v5009_v40, %v5007_v39  ;;  %v1187_v39 = vld [vmem:[%s10757_s2 + $0x88] sm:$0xff]  ;;  %v1189_v40 = vld [vmem:[%s10757_s2 + $0x98] sm:$0xff] }
 0x1c5   : > { %5895 = vmatpush1.bf16.msra.mxu0 %v5894_v49  ;;  %v5013_v49 = vld [vmem:[%s10757_s2 + $0x7f8] sm:$0xff] }
 0x1c6   : > { %5897 = vmatprep.subr.bf16.mxu0 %v5896_v50  ;;  %v5926_v50 = vpack.c.bf16 %v5008_v45, %v5006_v44  ;;  %v5928_v52 = vpack.c.bf16 %v5013_v49, %v5011_v48  ;;  %v5948_v44 = vpack.c.bf16 %v1189_v40, %v1187_v39  ;;  %v1186_v45 = vld [vmem:[%s10757_s2 + $0x80] sm:$0xff]  ;;  %v1188_v48 = vld [vmem:[%s10757_s2 + $0x90] sm:$0xff] }
 0x1c7   : > { %v5950_v53 = vpack.c.bf16 %v1188_v48, %v1186_v45  ;;  %v1210_v39 = vld [vmem:[%s10757_s2 + $0x140] sm:$0xff]  ;;  %v1212_v40 = vld [vmem:[%s10757_s2 + $0x150] sm:$0xff] }
 0x1c8   : > { %v5974_v45 = vpack.c.bf16 %v1212_v40, %v1210_v39 }
 0x1c9   : > { %5899 = vmatpush1.bf16.msra.mxu0 %v5898_v55 }
 0x1ca   : > { %5901 = vmatprep.subr.bf16.mxu0 %v5900_v2  ;;  %v1171_v2 = vld [vmem:[%s10757_s2 + $0x8] sm:$0xff] }
 0x1cb   : > { %v5932_v6 = vpack.c.bf16 %v1173_v3, %v1171_v2  ;;  %v1192_v2 = vld [vmem:[%s10757_s2 + $0xb0] sm:$0xff] }
 0x1cd   : > { %5903 = vmatpush1.bf16.msra.mxu0 %v5902_v7  ;;  %v1170_v7 = vld [vmem:[%s10757_s2] sm:$0xff] }
 0x1ce   : > { %5905 = vmatprep.subr.bf16.mxu0 %v5904_v8  ;;  %v1172_v8 = vld [vmem:[%s10757_s2 + $0x10] sm:$0xff] }
 0x1cf   : > { %v5934_v13 = vpack.c.bf16 %v1172_v8, %v1170_v7  ;;  %v1194_v8 = vld [vmem:[%s10757_s2 + $0xc0] sm:$0xff] }
 0x1d1   : > { %5907 = vmatpush1.bf16.msra.mxu0 %v5906_v14  ;;  %v7630_v22 = vpop.f32.mrb[0].mxu1 }
 0x1d2   : > { %5909 = vmatprep.subr.bf16.mxu0 %v5908_v15  ;;  %v7638_v26 = vpop.f32.mrb[1].mxu1  ;;  %v5936_v15 = vpack.c.bf16 %v1177_v12, %v1175_v11  ;;  %v1199_v11 = vld [vmem:[%s10757_s2 + $0xe8] sm:$0xff]  ;;  %v1201_v12 = vld [vmem:[%s10757_s2 + $0xf8] sm:$0xff] }
 0x1d5   : > { %5911 = vmatpush1.bf16.msra.mxu0 %v5910_v21  ;;  %v7646_v1 = vpop.f32.mrb[2].mxu1  ;;  %v1181_v21 = vld [vmem:[%s10757_s2 + $0x58] sm:$0xff] }
 0x1d6   : > { %5913 = vmatprep.subr.bf16.mxu0 %v5912_v23  ;;  %v7654_v29 = vpop.f32.mrb[3].mxu1  ;;  %v5938_v23 = vpack.c.bf16 %v1176_v17, %v1174_v16  ;;  %v5940_v25 = vpack.c.bf16 %v1181_v21, %v1179_v20  ;;  %v1200_v16 = vld [vmem:[%s10757_s2 + $0xf0] sm:$0xff]  ;;  %v1203_v17 = vld [vmem:[%s10757_s2 + $0x108] sm:$0xff] }
 0x1d9   : > { %5915 = vmatpush1.bf16.msra.mxu0 %v5914_v56  ;;  %v7662_v33 = vpop.f32.mrb[4].mxu1 }
 0x1da   : > { %5917 = vmatprep.subr.bf16.mxu0 %v5916_v10  ;;  %v7670_v38 = vpop.f32.mrb[5].mxu1 }
 0x1dd   : > { %5919 = vmatpush1.bf16.msra.mxu0 %v5918_v32  ;;  %v7678_v42 = vpop.f32.mrb[6].mxu1  ;;  %v5944_v32 = vpack.c.bf16 %v1185_v28, %v1183_v19  ;;  %v1206_v19 = vld [vmem:[%s10757_s2 + $0x120] sm:$0xff]  ;;  %v1208_v28 = vld [vmem:[%s10757_s2 + $0x130] sm:$0xff] }
 0x1de   : > { %5921 = vmatprep.subr.bf16.mxu0 %v5920_v35  ;;  %v7686_v46 = vpop.f32.mrb[7].mxu1  ;;  %v1182_v35 = vld [vmem:[%s10757_s2 + $0x60] sm:$0xff] }
 0x1e1   : > { %5923 = vmatpush1.bf16.msra.mxu0 %v5922_v41  ;;  %v1123_v51 = vpop.f32.mrb[8].mxu1 }
 0x1e2   : > { %5925 = vmatprep.subr.bf16.mxu0 %v5924_v43  ;;  %v1125_v55 = vpop.f32.mrb[9].mxu1  ;;  %v5946_v43 = vpack.c.bf16 %v1184_v36, %v1182_v35  ;;  %v5970_v35 = vpack.c.bf16 %v1208_v28, %v1206_v19 }
 0x1e3   : > { %1580 = vmatprep.mubr.f32.mxu0 %v1125_v55  ;;  %v1190_v55 = vld [vmem:[%s10757_s2 + $0xa0] sm:$0xff] }
 0x1e5   : > { %5927 = vmatpush1.bf16.msra.mxu0 %v5926_v50  ;;  %v1129_v5 = vpop.f32.mrb[10].mxu1  ;;  %v1191_v50 = vld [vmem:[%s10757_s2 + $0xa8] sm:$0xff] }
 0x1e6   : > { %5929 = vmatprep.subr.bf16.mxu0 %v5928_v52  ;;  %v1131_v9 = vpop.f32.mrb[11].mxu1  ;;  %v7736_v10 = vpop.f32.mrb[16].mxu0 }
 0x1e7   : > { %v7744_v30 = vpop.f32.mrb[17].mxu0 }
 0x1e9   : > { %5931 = vmatpush1.bf16.msra.mxu0 %v5930_v4  ;;  %v1135_v14 = vpop.f32.mrb[12].mxu1  ;;  %v1195_v4 = vld [vmem:[%s10757_s2 + $0xc8] sm:$0xff] }
 0x1ea   : > { %5933 = vmatprep.subr.bf16.mxu0 %v5932_v6  ;;  %v1137_v18 = vpop.f32.mrb[13].mxu1  ;;  %v7752_v37 = vpop.f32.mrb[18].mxu0  ;;  %v5954_v6 = vpack.c.bf16 %v1192_v2, %v1190_v55 }
 0x1eb   : > { %v7760_v41 = vpop.f32.mrb[19].mxu0 }
 0x1ec   : > { %1581 = vmatmul.mubr.f32.vlgmr.msra.gmra.mrb[24].mxu0 %v1123_v51  ;;  %v1193_v51 = vld [vmem:[%s10757_s2 + $0xb8] sm:$0xff] }
 0x1ed   : > { %5935 = vmatpush1.bf16.msra.mxu0 %v5934_v13  ;;  %1586 = vmatprep.mubr.f32.mxu0 %v1131_v9  ;;  %v1141_v24 = vpop.f32.mrb[14].mxu1  ;;  %v5952_v54 = vpack.c.bf16 %v1193_v51, %v1191_v50  ;;  %v1196_v9 = vld [vmem:[%s10757_s2 + $0xd0] sm:$0xff]  ;;  %v1214_v50 = vld [vmem:[%s10757_s2 + $0x160] sm:$0xff] }
 0x1ee   : > { %5937 = vmatprep.subr.bf16.mxu0 %v5936_v15  ;;  %v1143_v56 = vpop.f32.mrb[15].mxu1  ;;  %v7768_v49 = vpop.f32.mrb[20].mxu0  ;;  %v5958_v13 = vpack.c.bf16 %v1196_v9, %v1194_v8  ;;  %v1198_v15 = vld [vmem:[%s10757_s2 + $0xe0] sm:$0xff]  ;;  %v1216_v51 = vld [vmem:[%s10757_s2 + $0x170] sm:$0xff] }
 0x1ef   : > { %v7776_v52 = vpop.f32.mrb[21].mxu0  ;;  %v5962_v20 = vpack.c.bf16 %v1200_v16, %v1198_v15  ;;  %v5978_v55 = vpack.c.bf16 %v1216_v51, %v1214_v50 }
 0x1f0   : > { %1587 = vmatmul.mubr.f32.gmra.mrb[26].mxu0 %v1129_v5 }
 0x1f1   : > { %5939 = vmatpush1.bf16.msra.mxu0 %v5938_v23  ;;  %1592 = vmatprep.mubr.f32.mxu0 %v1137_v18  ;;  %v1205_v18 = vld [vmem:[%s10757_s2 + $0x118] sm:$0xff]  ;;  %v1202_v23 = vld [vmem:[%s10757_s2 + $0x100] sm:$0xff] }
 0x1f2   : > { %5941 = vmatprep.subr.bf16.mxu0 %v5940_v25  ;;  %v7785_v3 = vpop.f32.mrb[22].mxu0  ;;  %v5964_v21 = vpack.c.bf16 %v1205_v18, %v1203_v17  ;;  %v1207_v25 = vld [vmem:[%s10757_s2 + $0x128] sm:$0xff]  ;;  %v1226_v17 = vld [vmem:[%s10757_s2 + $0x1c0] sm:$0xff]  ;;  %v1228_v18 = vld [vmem:[%s10757_s2 + $0x1d0] sm:$0xff] }
 0x1f3   : > { %v7793_v5 = vpop.f32.mrb[23].mxu0 }
 0x1f4   : > { %1593 = vmatmul.mubr.f32.gmra.mrb[28].mxu0 %v1135_v14  ;;  %v5960_v14 = vpack.c.bf16 %v1201_v12, %v1199_v11  ;;  %v1222_v11 = vld [vmem:[%s10757_s2 + $0x1a0] sm:$0xff]  ;;  %v1224_v12 = vld [vmem:[%s10757_s2 + $0x1b0] sm:$0xff] }
 0x1f5   : > { %5943 = vmatpush1.bf16.msra.mxu0 %v5942_v31  ;;  %1598 = vmatprep.mubr.f32.mxu0 %v1143_v56  ;;  %v5968_v56 = vpack.c.bf16 %v1209_v27, %v1207_v25  ;;  %v1211_v31 = vld [vmem:[%s10757_s2 + $0x148] sm:$0xff]  ;;  %v5986_v15 = vpack.c.bf16 %v1224_v12, %v1222_v11  ;;  %v1230_v25 = vld [vmem:[%s10757_s2 + $0x1e0] sm:$0xff]  ;;  %v1232_v27 = vld [vmem:[%s10757_s2 + $0x1f0] sm:$0xff] }
 0x1f6   : > { %5945 = vmatprep.subr.bf16.mxu0 %v5944_v32  ;;  %v1213_v32 = vld [vmem:[%s10757_s2 + $0x158] sm:$0xff]  ;;  %v5994_v19 = vpack.c.bf16 %v1232_v27, %v1230_v25  ;;  %v1255_v11 = vld [vmem:[%s10757_s2 + $0x2a8] sm:$0xff]  ;;  %v1262_v25 = vld [vmem:[%s10757_s2 + $0x2e0] sm:$0xff] }
 0x1f7   : > { %v5972_v36 = vpack.c.bf16 %v1213_v32, %v1211_v31  ;;  %v1234_v31 = vld [vmem:[%s10757_s2 + $0x200] sm:$0xff]  ;;  %v1236_v32 = vld [vmem:[%s10757_s2 + $0x210] sm:$0xff] }
 0x1f8   : > { %1599 = vmatmul.mubr.f32.gmra.mrb[30].mxu0 %v1141_v24  ;;  %v1204_v24 = vld [vmem:[%s10757_s2 + $0x110] sm:$0xff]  ;;  %v5998_v39 = vpack.c.bf16 %v1236_v32, %v1234_v31  ;;  %v1266_v31 = vld [vmem:[%s10757_s2 + $0x300] sm:$0xff] }
 0x1f9   : > { %5947 = vmatpush1.bf16.msra.mxu0 %v5946_v43  ;;  %1669 = vmatprep.mubr.f32.mxu0 %v7484_v58  ;;  %v1197_v58 = vld [vmem:[%s10757_s2 + $0xd8] sm:$0xff]  ;;  %v5966_v47 = vpack.c.bf16 %v1204_v24, %v1202_v23  ;;  %v1215_v43 = vld [vmem:[%s10757_s2 + $0x168] sm:$0xff]  ;;  %v5990_v23 = vpack.c.bf16 %v1228_v18, %v1226_v17  ;;  %v1258_v17 = vld [vmem:[%s10757_s2 + $0x2c0] sm:$0xff] }
 0x1fa   : > { %5949 = vmatprep.subr.bf16.mxu0 %v5948_v44  ;;  %v5956_v7 = vpack.c.bf16 %v1197_v58, %v1195_v4  ;;  %v1217_v44 = vld [vmem:[%s10757_s2 + $0x178] sm:$0xff]  ;;  %v1218_v4 = vld [vmem:[%s10757_s2 + $0x180] sm:$0xff]  ;;  %v1220_v58 = vld [vmem:[%s10757_s2 + $0x190] sm:$0xff] }
 0x1fb   : > { %v5976_v48 = vpack.c.bf16 %v1217_v44, %v1215_v43  ;;  %v5982_v8 = vpack.c.bf16 %v1220_v58, %v1218_v4  ;;  %v1238_v43 = vld [vmem:[%s10757_s2 + $0x220] sm:$0xff]  ;;  %v1240_v44 = vld [vmem:[%s10757_s2 + $0x230] sm:$0xff] }
 0x1fc   : > { %v6002_v50 = vpack.c.bf16 %v1240_v44, %v1238_v43  ;;  %v1246_v4 = vld [vmem:[%s10757_s2 + $0x260] sm:$0xff]  ;;  %v1248_v58 = vld [vmem:[%s10757_s2 + $0x270] sm:$0xff] }
 0x1fd   : > { %5951 = vmatpush1.bf16.msra.mxu0 %v5950_v53  ;;  %v1219_v53 = vld [vmem:[%s10757_s2 + $0x188] sm:$0xff]  ;;  %v1260_v18 = vld [vmem:[%s10757_s2 + $0x2d0] sm:$0xff]  ;;  %v1270_v43 = vld [vmem:[%s10757_s2 + $0x320] sm:$0xff] }
 0x1fe   : > { %5953 = vmatprep.subr.bf16.mxu0 %v5952_v54  ;;  %v1221_v54 = vld [vmem:[%s10757_s2 + $0x198] sm:$0xff]  ;;  %v1264_v27 = vld [vmem:[%s10757_s2 + $0x2f0] sm:$0xff] }
 0x1ff   : > { %v5980_v2 = vpack.c.bf16 %v1221_v54, %v1219_v53  ;;  %v1242_v53 = vld [vmem:[%s10757_s2 + $0x240] sm:$0xff]  ;;  %v1244_v54 = vld [vmem:[%s10757_s2 + $0x250] sm:$0xff] }
 0x200   : > { %v1268_v32 = vld [vmem:[%s10757_s2 + $0x310] sm:$0xff] }
 0x201   : > { %5955 = vmatpush1.bf16.msra.mxu0 %v5954_v6  ;;  %v1223_v6 = vld [vmem:[%s10757_s2 + $0x1a8] sm:$0xff]  ;;  %v1272_v44 = vld [vmem:[%s10757_s2 + $0x330] sm:$0xff] }
 0x202   : > { %5957 = vmatprep.subr.bf16.mxu0 %v5956_v7  ;;  %v1225_v7 = vld [vmem:[%s10757_s2 + $0x1b8] sm:$0xff] }
 0x203   : > { %v5984_v9 = vpack.c.bf16 %v1225_v7, %v1223_v6  ;;  %v1251_v6 = vld [vmem:[%s10757_s2 + $0x288] sm:$0xff] }
 0x205   : > { %5959 = vmatpush1.bf16.msra.mxu0 %v5958_v13  ;;  %v1227_v13 = vld [vmem:[%s10757_s2 + $0x1c8] sm:$0xff] }
 0x206   : > { %5961 = vmatprep.subr.bf16.mxu0 %v5960_v14  ;;  %v1229_v14 = vld [vmem:[%s10757_s2 + $0x1d8] sm:$0xff] }
 0x207   : > { %v5988_v16 = vpack.c.bf16 %v1229_v14, %v1227_v13  ;;  %v1254_v13 = vld [vmem:[%s10757_s2 + $0x2a0] sm:$0xff]  ;;  %v1256_v14 = vld [vmem:[%s10757_s2 + $0x2b0] sm:$0xff] }
 0x209   : > { %5963 = vmatpush1.bf16.msra.mxu0 %v5962_v20  ;;  %v1231_v20 = vld [vmem:[%s10757_s2 + $0x1e8] sm:$0xff] }
 0x20a   : > { %5965 = vmatprep.subr.bf16.mxu0 %v5964_v21  ;;  %v1233_v21 = vld [vmem:[%s10757_s2 + $0x1f8] sm:$0xff] }
 0x20b   : > { %v5992_v24 = vpack.c.bf16 %v1233_v21, %v1231_v20  ;;  %v1263_v20 = vld [vmem:[%s10757_s2 + $0x2e8] sm:$0xff]  ;;  %v1265_v21 = vld [vmem:[%s10757_s2 + $0x2f8] sm:$0xff] }
 0x20d   : > { %5967 = vmatpush1.bf16.msra.mxu0 %v5966_v47  ;;  %v1235_v47 = vld [vmem:[%s10757_s2 + $0x208] sm:$0xff] }
 0x20e   : > { %5969 = vmatprep.subr.bf16.mxu0 %v5968_v56  ;;  %v1237_v56 = vld [vmem:[%s10757_s2 + $0x218] sm:$0xff] }
 0x20f   : > { %v5996_v28 = vpack.c.bf16 %v1237_v56, %v1235_v47  ;;  %v1267_v47 = vld [vmem:[%s10757_s2 + $0x308] sm:$0xff]  ;;  %v1269_v56 = vld [vmem:[%s10757_s2 + $0x318] sm:$0xff] }
 0x211   : > { %5971 = vmatpush1.bf16.msra.mxu0 %v5970_v35  ;;  %v1239_v35 = vld [vmem:[%s10757_s2 + $0x228] sm:$0xff] }
 0x212   : > { %5973 = vmatprep.subr.bf16.mxu0 %v5972_v36  ;;  %v1241_v36 = vld [vmem:[%s10757_s2 + $0x238] sm:$0xff] }
 0x213   : > { %v6000_v40 = vpack.c.bf16 %v1241_v36, %v1239_v35  ;;  %v1271_v35 = vld [vmem:[%s10757_s2 + $0x328] sm:$0xff]  ;;  %v1273_v36 = vld [vmem:[%s10757_s2 + $0x338] sm:$0xff] }
 0x215   : > { %5975 = vmatpush1.bf16.msra.mxu0 %v5974_v45  ;;  %v1243_v45 = vld [vmem:[%s10757_s2 + $0x248] sm:$0xff] }
 0x216   : > { %5977 = vmatprep.subr.bf16.mxu0 %v5976_v48  ;;  %v1245_v48 = vld [vmem:[%s10757_s2 + $0x258] sm:$0xff] }
 0x217   : > { %v6004_v51 = vpack.c.bf16 %v1245_v48, %v1243_v45  ;;  %v1275_v45 = vld [vmem:[%s10757_s2 + $0x348] sm:$0xff]  ;;  %v1277_v48 = vld [vmem:[%s10757_s2 + $0x358] sm:$0xff] }
 0x219   : > { %5979 = vmatpush1.bf16.msra.mxu0 %v5978_v55  ;;  %v1247_v55 = vld [vmem:[%s10757_s2 + $0x268] sm:$0xff] }
 0x21a   : > { %5981 = vmatprep.subr.bf16.mxu0 %v5980_v2 }
 0x21d   : > { %5983 = vmatpush1.bf16.msra.mxu0 %v5982_v8  ;;  %v1250_v8 = vld [vmem:[%s10757_s2 + $0x280] sm:$0xff] }
 0x21e   : > { %5985 = vmatprep.subr.bf16.mxu0 %v5984_v9  ;;  %v1252_v9 = vld [vmem:[%s10757_s2 + $0x290] sm:$0xff] }
 0x221   : > { %5987 = vmatpush1.bf16.msra.mxu0 %v5986_v15  ;;  %v1259_v15 = vld [vmem:[%s10757_s2 + $0x2c8] sm:$0xff] }
 0x222   : > { %5989 = vmatprep.subr.bf16.mxu0 %v5988_v16 }
 0x225   : > { %5991 = vmatpush1.bf16.msra.mxu0 %v5990_v23  ;;  %v6022_v23 = vpack.c.bf16 %v1260_v18, %v1258_v17  ;;  %v1290_v17 = vld [vmem:[%s10757_s2 + $0x3c0] sm:$0xff]  ;;  %v1292_v18 = vld [vmem:[%s10757_s2 + $0x3d0] sm:$0xff] }
 0x226   : > { %5993 = vmatprep.subr.bf16.mxu0 %v5992_v24  ;;  %v6024_v24 = vpack.c.bf16 %v1265_v21, %v1263_v20  ;;  %v1295_v20 = vld [vmem:[%s10757_s2 + $0x3e8] sm:$0xff]  ;;  %v1297_v21 = vld [vmem:[%s10757_s2 + $0x3f8] sm:$0xff] }
 0x229   : > { %5995 = vmatpush1.bf16.msra.mxu0 %v5994_v19  ;;  %v6026_v19 = vpack.c.bf16 %v1264_v27, %v1262_v25  ;;  %v1294_v25 = vld [vmem:[%s10757_s2 + $0x3e0] sm:$0xff]  ;;  %v1296_v27 = vld [vmem:[%s10757_s2 + $0x3f0] sm:$0xff] }
 0x22a   : > { %5997 = vmatprep.subr.bf16.mxu0 %v5996_v28  ;;  %v6028_v28 = vpack.c.bf16 %v1269_v56, %v1267_v47  ;;  %v5015_v47 = vld [vmem:[%s10757_s2 + $0x808] sm:$0xff]  ;;  %v5017_v56 = vld [vmem:[%s10757_s2 + $0x818] sm:$0xff] }
 0x22c   : > { %1670 = vmatmul.mubr.f32.vlgmr.msra.gmra.mrb[24].mxu0 %v7482_v57  ;;  %v1249_v57 = vld [vmem:[%s10757_s2 + $0x278] sm:$0xff] }
 0x22d   : > { %1675 = vmatprep.mubr.f32.mxu0 %v7488_v60  ;;  %5999 = vmatpush1.bf16.msra.mxu0 %v5998_v39  ;;  %v6006_v60 = vpack.c.bf16 %v1244_v54, %v1242_v53  ;;  %v6008_v2 = vpack.c.bf16 %v1249_v57, %v1247_v55  ;;  %v6030_v39 = vpack.c.bf16 %v1268_v32, %v1266_v31  ;;  %v1274_v53 = vld [vmem:[%s10757_s2 + $0x340] sm:$0xff]  ;;  %v1276_v54 = vld [vmem:[%s10757_s2 + $0x350] sm:$0xff]  ;;  %v1279_v55 = vld [vmem:[%s10757_s2 + $0x368] sm:$0xff] }
 0x22e   : > { %6001 = vmatprep.subr.bf16.mxu0 %v6000_v40  ;;  %v6032_v40 = vpack.c.bf16 %v1273_v36, %v1271_v35  ;;  %v1281_v57 = vld [vmem:[%s10757_s2 + $0x378] sm:$0xff]  ;;  %v6060_v31 = vpack.c.bf16 %v5017_v56, %v5015_v47  ;;  %v5014_v32 = vld [vmem:[%s10757_s2 + $0x800] sm:$0xff]  ;;  %v5016_v35 = vld [vmem:[%s10757_s2 + $0x810] sm:$0xff] }
 0x22f   : > { %v5045_v47 = vld [vmem:[%s10757_s2 + $0x8f8] sm:$0xff]  ;;  %v2697_v56 = vld [vmem:[%s10761_s6] sm:$0xff] }
 0x230   : > { %1676 = vmatmul.mubr.f32.gmra.mrb[26].mxu0 %v7486_v59  ;;  %v1253_v59 = vld [vmem:[%s10757_s2 + $0x298] sm:$0xff] }
 0x231   : > { %1681 = vmatprep.mubr.f32.mxu0 %v7492_v62  ;;  %6003 = vmatpush1.bf16.msra.mxu0 %v6002_v50  ;;  %v6010_v62 = vpack.c.bf16 %v1248_v58, %v1246_v4  ;;  %v6012_v7 = vpack.c.bf16 %v1253_v59, %v1251_v6  ;;  %v6034_v50 = vpack.c.bf16 %v1272_v44, %v1270_v43  ;;  %v1278_v4 = vld [vmem:[%s10757_s2 + $0x360] sm:$0xff]  ;;  %v1280_v58 = vld [vmem:[%s10757_s2 + $0x370] sm:$0xff]  ;;  %v1283_v6 = vld [vmem:[%s10757_s2 + $0x388] sm:$0xff] }
 0x232   : > { %6005 = vmatprep.subr.bf16.mxu0 %v6004_v51  ;;  %v6036_v51 = vpack.c.bf16 %v1277_v48, %v1275_v45  ;;  %v1285_v59 = vld [vmem:[%s10757_s2 + $0x398] sm:$0xff]  ;;  %v6062_v43 = vpack.c.bf16 %v5016_v35, %v5014_v32  ;;  %v5018_v48 = vld [vmem:[%s10757_s2 + $0x820] sm:$0xff] }
 0x233   : > { %v5042_v35 = vld [vmem:[%s10757_s2 + $0x8e0] sm:$0xff] }
 0x234   : > { %1682 = vmatmul.mubr.f32.gmra.mrb[28].mxu0 %v7490_v61  ;;  %v1257_v61 = vld [vmem:[%s10757_s2 + $0x2b8] sm:$0xff] }
 0x235   : > { %1687 = vmatprep.mubr.f32.mxu0 %v7496_v0  ;;  %6007 = vmatpush1.bf16.msra.mxu0 %v6006_v60  ;;  %v6014_v0 = vpack.c.bf16 %v1252_v9, %v1250_v8  ;;  %v6016_v12 = vpack.c.bf16 %v1257_v61, %v1255_v11  ;;  %v6038_v60 = vpack.c.bf16 %v1276_v54, %v1274_v53  ;;  %v1282_v8 = vld [vmem:[%s10757_s2 + $0x380] sm:$0xff]  ;;  %v1284_v9 = vld [vmem:[%s10757_s2 + $0x390] sm:$0xff]  ;;  %v1287_v11 = vld [vmem:[%s10757_s2 + $0x3a8] sm:$0xff] }
 0x236   : > { %6009 = vmatprep.subr.bf16.mxu0 %v6008_v2  ;;  %v6040_v2 = vpack.c.bf16 %v1281_v57, %v1279_v55  ;;  %v1289_v61 = vld [vmem:[%s10757_s2 + $0x3b8] sm:$0xff] }
 0x237   : > { %v5025_v53 = vld [vmem:[%s10757_s2 + $0x858] sm:$0xff] }
 0x238   : > { %1688 = vmatmul.mubr.f32.gmra.mrb[30].mxu0 %v7494_v63  ;;  %v1261_v63 = vld [vmem:[%s10757_s2 + $0x2d8] sm:$0xff] }
 0x239   : > { %6011 = vmatpush1.bf16.msra.mxu0 %v6010_v62  ;;  %1758 = vmatprep.mubr.f32.mxu0 %v7638_v26  ;;  %v6018_v26 = vpack.c.bf16 %v1256_v14, %v1254_v13  ;;  %v6020_v16 = vpack.c.bf16 %v1261_v63, %v1259_v15  ;;  %v6042_v62 = vpack.c.bf16 %v1280_v58, %v1278_v4  ;;  %v1286_v13 = vld [vmem:[%s10757_s2 + $0x3a0] sm:$0xff]  ;;  %v1288_v14 = vld [vmem:[%s10757_s2 + $0x3b0] sm:$0xff]  ;;  %v1291_v15 = vld [vmem:[%s10757_s2 + $0x3c8] sm:$0xff] }
 0x23a   : > { %6013 = vmatprep.subr.bf16.mxu0 %v6012_v7  ;;  %v6044_v7 = vpack.c.bf16 %v1285_v59, %v1283_v6  ;;  %v1293_v63 = vld [vmem:[%s10757_s2 + $0x3d8] sm:$0xff]  ;;  %v5024_v4 = vld [vmem:[%s10757_s2 + $0x850] sm:$0xff] }
 0x23d   : > { %6015 = vmatpush1.bf16.msra.mxu0 %v6014_v0  ;;  %v6046_v0 = vpack.c.bf16 %v1284_v9, %v1282_v8  ;;  %v5028_v8 = vld [vmem:[%s10757_s2 + $0x870] sm:$0xff] }
 0x23e   : > { %6017 = vmatprep.subr.bf16.mxu0 %v6016_v12  ;;  %v6048_v12 = vpack.c.bf16 %v1289_v61, %v1287_v11 }
 0x241   : > { %6019 = vmatpush1.bf16.msra.mxu0 %v6018_v26  ;;  %v6050_v26 = vpack.c.bf16 %v1288_v14, %v1286_v13  ;;  %v2099_v13 = vld [vmem:[%s10758_s3 + $0x8] sm:$0xff] }
 0x242   : > { %6021 = vmatprep.subr.bf16.mxu0 %v6020_v16  ;;  %v6052_v16 = vpack.c.bf16 %v1293_v63, %v1291_v15  ;;  %v2098_v15 = vld [vmem:[%s10758_s3] sm:$0xff] }
 0x245   : > { %6023 = vmatpush1.bf16.msra.mxu0 %v6022_v23  ;;  %v6054_v23 = vpack.c.bf16 %v1292_v18, %v1290_v17  ;;  %v5041_v17 = vld [vmem:[%s10757_s2 + $0x8d8] sm:$0xff]  ;;  %v2100_v18 = vld [vmem:[%s10758_s3 + $0x10] sm:$0xff] }
 0x246   : > { %6025 = vmatprep.subr.bf16.mxu0 %v6024_v24  ;;  %v6056_v24 = vpack.c.bf16 %v1297_v21, %v1295_v20  ;;  %v2101_v21 = vld [vmem:[%s10758_s3 + $0x18] sm:$0xff] }
 0x249   : > { %6027 = vmatpush1.bf16.msra.mxu0 %v6026_v19  ;;  %v6058_v19 = vpack.c.bf16 %v1296_v27, %v1294_v25  ;;  %v5040_v25 = vld [vmem:[%s10757_s2 + $0x8d0] sm:$0xff]  ;;  %v5043_v27 = vld [vmem:[%s10757_s2 + $0x8e8] sm:$0xff] }
 0x24a   : > { %6029 = vmatprep.subr.bf16.mxu0 %v6028_v28  ;;  %v8115_v28 = vpop.f32.mrb[16].mxu1  ;;  %v6088_v32 = vpack.c.bf16 %v5045_v47, %v5043_v27 }
 0x24b   : > { %v8123_v36 = vpop.f32.mrb[17].mxu1 }
 0x24c   : > { %v8131_v44 = vpop.f32.mrb[18].mxu1 }
 0x24d   : > { %6031 = vmatpush1.bf16.msra.mxu0 %v6030_v39  ;;  %v5019_v39 = vld [vmem:[%s10757_s2 + $0x828] sm:$0xff]  ;;  %v8146_v54 = vpop.f32.mrb[19].mxu1 }
 0x24e   : > { %6033 = vmatprep.subr.bf16.mxu0 %v6032_v40  ;;  %v5021_v40 = vld [vmem:[%s10757_s2 + $0x838] sm:$0xff]  ;;  %v8149_v57 = vpop.f32.mrb[20].mxu1 }
 0x24f   : > { %v6064_v45 = vpack.c.bf16 %v5021_v40, %v5019_v39  ;;  %v8164_v58 = vpop.f32.mrb[21].mxu1  ;;  %v5044_v39 = vld [vmem:[%s10757_s2 + $0x8f0] sm:$0xff]  ;;  %v5047_v40 = vld [vmem:[%s10757_s2 + $0x908] sm:$0xff] }
 0x250   : > { %v8167_v59 = vpop.f32.mrb[22].mxu1 }
 0x251   : > { %6035 = vmatpush1.bf16.msra.mxu0 %v6034_v50  ;;  %v5020_v50 = vld [vmem:[%s10757_s2 + $0x830] sm:$0xff]  ;;  %v8182_v9 = vpop.f32.mrb[23].mxu1 }
 0x252   : > { %6037 = vmatprep.subr.bf16.mxu0 %v6036_v51  ;;  %v5023_v51 = vld [vmem:[%s10757_s2 + $0x848] sm:$0xff]  ;;  %v6066_v55 = vpack.c.bf16 %v5020_v50, %v5018_v48  ;;  %v6090_v48 = vpack.c.bf16 %v5044_v39, %v5042_v35  ;;  %v2700_v50 = vld [vmem:[%s10761_s6 + $0x18] sm:$0xff] }
 0x255   : > { %6039 = vmatpush1.bf16.msra.mxu0 %v6038_v60  ;;  %v6068_v60 = vpack.c.bf16 %v5025_v53, %v5023_v51  ;;  %v5046_v53 = vld [vmem:[%s10757_s2 + $0x900] sm:$0xff] }
 0x256   : > { %6041 = vmatprep.subr.bf16.mxu0 %v6040_v2  ;;  %v5022_v2 = vld [vmem:[%s10757_s2 + $0x840] sm:$0xff] }
 0x257   : > { %v6070_v6 = vpack.c.bf16 %v5024_v4, %v5022_v2  ;;  %v5053_v2 = vld [vmem:[%s10757_s2 + $0x938] sm:$0xff]  ;;  %v3283_v4 = vld [vmem:[%s10764_s9] sm:$0xff] }
 0x259   : > { %6043 = vmatpush1.bf16.msra.mxu0 %v6042_v62 }
 0x25a   : > { %6045 = vmatprep.subr.bf16.mxu0 %v6044_v7  ;;  %v5026_v7 = vld [vmem:[%s10757_s2 + $0x860] sm:$0xff] }
 0x25b   : > { %v6074_v11 = vpack.c.bf16 %v5028_v8, %v5026_v7  ;;  %v5052_v7 = vld [vmem:[%s10757_s2 + $0x930] sm:$0xff]  ;;  %v5055_v8 = vld [vmem:[%s10757_s2 + $0x948] sm:$0xff] }
 0x25d   : > { %6047 = vmatpush1.bf16.msra.mxu0 %v6046_v0  ;;  %v5030_v0 = vld [vmem:[%s10757_s2 + $0x880] sm:$0xff] }
 0x25e   : > { %6049 = vmatprep.subr.bf16.mxu0 %v6048_v12  ;;  %v5032_v12 = vld [vmem:[%s10757_s2 + $0x890] sm:$0xff] }
 0x25f   : > { %v6078_v14 = vpack.c.bf16 %v5032_v12, %v5030_v0  ;;  %v5054_v12 = vld [vmem:[%s10757_s2 + $0x940] sm:$0xff] }
 0x261   : > { %6051 = vmatpush1.bf16.msra.mxu0 %v6050_v26  ;;  %v5034_v26 = vld [vmem:[%s10757_s2 + $0x8a0] sm:$0xff] }
 0x262   : > { %6053 = vmatprep.subr.bf16.mxu0 %v6052_v16  ;;  %v6895_v16 = vmov 0  }
 0x263   : > { %6878 = vset.pattern.permute.xlu1 %v6895_v16  ;;  %6877 = vset.pattern.permute.xlu0 %v6895_v16  ;;  %v5060_v16 = vld [vmem:[%s10757_s2 + $0x970] sm:$0xff] }
 0x264   : > { %2109 = vperm.xlu1 %6878, %v2099_v13   ;;  %2104 = vperm.xlu0 %6877, %v2098_v15   ;;  %v5061_v13 = vld [vmem:[%s10757_s2 + $0x978] sm:$0xff] }
 0x265   : > { %6055 = vmatpush1.bf16.msra.mxu0 %v6054_v23 }
 0x266   : > { %6057 = vmatprep.subr.bf16.mxu0 %v6056_v24  ;;  %v5038_v24 = vld [vmem:[%s10757_s2 + $0x8c0] sm:$0xff] }
 0x268   : > { %2114 = vperm.xlu1 %6878, %v2100_v18   ;;  %2119 = vperm.xlu0 %6877, %v2101_v21   ;;  %v5062_v21 = vld [vmem:[%s10757_s2 + $0x980] sm:$0xff] }
 0x269   : > { %6059 = vmatpush1.bf16.msra.mxu0 %v6058_v19  ;;  %v6086_v19 = vpack.c.bf16 %v5040_v25, %v5038_v24  ;;  %v5067_v24 = vld [vmem:[%s10757_s2 + $0x9a8] sm:$0xff]  ;;  %v5069_v25 = vld [vmem:[%s10757_s2 + $0x9b8] sm:$0xff] }
 0x26a   : > { %6061 = vmatprep.subr.bf16.mxu0 %v6060_v31  ;;  %v2698_v31 = vld [vmem:[%s10761_s6 + $0x8] sm:$0xff]  ;;  %v6112_v47 = vpack.c.bf16 %v5069_v25, %v5067_v24 }
 0x26b   : > { %v5103_v24 = vld [vmem:[%s10757_s2 + $0xac8] sm:$0xff] }
 0x26c   : > { %1759 = vmatmul.mubr.f32.vlgmr.msra.gmra.mrb[24].mxu0 %v7630_v22  ;;  %v5027_v22 = vld [vmem:[%s10757_s2 + $0x868] sm:$0xff]  ;;  %2703 = vperm.xlu1 %6878, %v2697_v56   ;;  %v5066_v56 = vld [vmem:[%s10757_s2 + $0x9a0] sm:$0xff] }
 0x26d   : > { %1764 = vmatprep.mubr.f32.mxu0 %v7654_v29  ;;  %6063 = vmatpush1.bf16.msra.mxu0 %v6062_v43  ;;  %v5029_v29 = vld [vmem:[%s10757_s2 + $0x878] sm:$0xff] }
 0x26e   : > { %6065 = vmatprep.subr.bf16.mxu0 %v6064_v45  ;;  %v6072_v62 = vpack.c.bf16 %v5029_v29, %v5027_v22  ;;  %v5049_v43 = vld [vmem:[%s10757_s2 + $0x918] sm:$0xff]  ;;  %2708 = vperm.xlu0 %6877, %v2698_v31   ;;  %v2699_v45 = vld [vmem:[%s10761_s6 + $0x10] sm:$0xff]  ;;  %v3284_v29 = vld [vmem:[%s10764_s9 + $0x8] sm:$0xff] }
 0x26f   : > { %v6092_v51 = vpack.c.bf16 %v5049_v43, %v5047_v40  ;;  %v5071_v31 = vld [vmem:[%s10757_s2 + $0x9c8] sm:$0xff]  ;;  %v5070_v40 = vld [vmem:[%s10757_s2 + $0x9c0] sm:$0xff]  ;;  %v5072_v43 = vld [vmem:[%s10757_s2 + $0x9d0] sm:$0xff] }
 0x270   : > { %1765 = vmatmul.mubr.f32.gmra.mrb[26].mxu0 %v7646_v1  ;;  %v5031_v1 = vld [vmem:[%s10757_s2 + $0x888] sm:$0xff]  ;;  %2713 = vperm.xlu1 %6878, %v2699_v45  }
 0x271   : > { %1770 = vmatprep.mubr.f32.mxu0 %v7670_v38  ;;  %6067 = vmatpush1.bf16.msra.mxu0 %v6066_v55  ;;  %v5033_v38 = vld [vmem:[%s10757_s2 + $0x898] sm:$0xff]  ;;  %v5048_v55 = vld [vmem:[%s10757_s2 + $0x910] sm:$0xff]  ;;  %v5075_v45 = vld [vmem:[%s10757_s2 + $0x9e8] sm:$0xff] }
 0x272   : > { %6069 = vmatprep.subr.bf16.mxu0 %v6068_v60  ;;  %v6076_v61 = vpack.c.bf16 %v5033_v38, %v5031_v1  ;;  %v5051_v60 = vld [vmem:[%s10757_s2 + $0x928] sm:$0xff]  ;;  %2718 = vperm.xlu0 %6877, %v2700_v50   ;;  %v6094_v22 = vpack.c.bf16 %v5048_v55, %v5046_v53  ;;  %v5057_v1 = vld [vmem:[%s10757_s2 + $0x958] sm:$0xff]  ;;  %v3285_v38 = vld [vmem:[%s10764_s9 + $0x10] sm:$0xff]  ;;  %v6118_v50 = vpack.c.bf16 %v5072_v43, %v5070_v40 }
 0x273   : > { %v6100_v0 = vpack.c.bf16 %v5057_v1, %v5055_v8  ;;  %v5074_v53 = vld [vmem:[%s10757_s2 + $0x9e0] sm:$0xff]  ;;  %v5076_v55 = vld [vmem:[%s10757_s2 + $0x9f0] sm:$0xff]  ;;  %v5111_v40 = vld [vmem:[%s10757_s2 + $0xb08] sm:$0xff] }
 0x274   : > { %1771 = vmatmul.mubr.f32.gmra.mrb[28].mxu0 %v7662_v33  ;;  %v5035_v33 = vld [vmem:[%s10757_s2 + $0x8a8] sm:$0xff]  ;;  %3289 = vperm.xlu1 %6878, %v3283_v4   ;;  %v6122_v4 = vpack.c.bf16 %v5076_v55, %v5074_v53  ;;  %v5113_v43 = vld [vmem:[%s10757_s2 + $0xb18] sm:$0xff] }
 0x275   : > { %1776 = vmatprep.mubr.f32.mxu0 %v7686_v46  ;;  %6071 = vmatpush1.bf16.msra.mxu0 %v6070_v6  ;;  %v5037_v46 = vld [vmem:[%s10757_s2 + $0x8b8] sm:$0xff]  ;;  %v6096_v6 = vpack.c.bf16 %v5053_v2, %v5051_v60  ;;  %v5079_v60 = vld [vmem:[%s10757_s2 + $0xa08] sm:$0xff] }
 0x276   : > { %6073 = vmatprep.subr.bf16.mxu0 %v6072_v62  ;;  %v6080_v63 = vpack.c.bf16 %v5037_v46, %v5035_v33  ;;  %v5050_v62 = vld [vmem:[%s10757_s2 + $0x920] sm:$0xff]  ;;  %3294 = vperm.xlu0 %6877, %v3284_v29   ;;  %v5056_v33 = vld [vmem:[%s10757_s2 + $0x950] sm:$0xff]  ;;  %v5059_v46 = vld [vmem:[%s10757_s2 + $0x968] sm:$0xff] }
 0x277   : > { %v6102_v15 = vpack.c.bf16 %v5056_v33, %v5054_v12  ;;  %v5081_v2 = vld [vmem:[%s10757_s2 + $0xa18] sm:$0xff]  ;;  %v5078_v29 = vld [vmem:[%s10757_s2 + $0xa00] sm:$0xff]  ;;  %v5115_v53 = vld [vmem:[%s10757_s2 + $0xb28] sm:$0xff] }
 0x278   : > { %1777 = vmatmul.mubr.f32.gmra.mrb[30].mxu0 %v7678_v42  ;;  %v5036_v42 = vld [vmem:[%s10757_s2 + $0x8b0] sm:$0xff]  ;;  %3299 = vperm.xlu1 %6878, %v3285_v38   ;;  %v5082_v38 = vld [vmem:[%s10757_s2 + $0xa20] sm:$0xff]  ;;  %v5117_v55 = vld [vmem:[%s10757_s2 + $0xb38] sm:$0xff] }
 0x279   : > { %6075 = vmatpush1.bf16.msra.mxu0 %v6074_v11  ;;  %1976 = vmatprep.mubr.f32.mxu0 %v7744_v30  ;;  %v5039_v30 = vld [vmem:[%s10757_s2 + $0x8c8] sm:$0xff]  ;;  %v6082_v20 = vpack.c.bf16 %v5036_v42, %v5034_v26  ;;  %v6098_v11 = vpack.c.bf16 %v5052_v7, %v5050_v62  ;;  %v6104_v26 = vpack.c.bf16 %v5061_v13, %v5059_v46  ;;  %v5058_v42 = vld [vmem:[%s10757_s2 + $0x960] sm:$0xff]  ;;  %v5085_v7 = vld [vmem:[%s10757_s2 + $0xa38] sm:$0xff] }
 0x27a   : > { %6077 = vmatprep.subr.bf16.mxu0 %v6076_v61  ;;  %v6084_v23 = vpack.c.bf16 %v5041_v17, %v5039_v30  ;;  %v3286_v61 = vld [vmem:[%s10764_s9 + $0x18] sm:$0xff]  ;;  %v5063_v30 = vld [vmem:[%s10757_s2 + $0x988] sm:$0xff]  ;;  %v6106_v18 = vpack.c.bf16 %v5060_v16, %v5058_v42  ;;  %v5086_v46 = vld [vmem:[%s10757_s2 + $0xa40] sm:$0xff] }
 0x27b   : > { %3304 = vperm.xlu0 %6877, %v3286_v61   ;;  %v5065_v17 = vld [vmem:[%s10757_s2 + $0x998] sm:$0xff]  ;;  %v5083_v62 = vld [vmem:[%s10757_s2 + $0xa28] sm:$0xff]  ;;  %v5088_v13 = vld [vmem:[%s10757_s2 + $0xa50] sm:$0xff] }
 0x27c   : > { %v6128_v1 = vpack.c.bf16 %v5085_v7, %v5083_v62  ;;  %v5087_v61 = vld [vmem:[%s10757_s2 + $0xa48] sm:$0xff] }
 0x27d   : > { %6079 = vmatpush1.bf16.msra.mxu0 %v6078_v14  ;;  %v4320_v14 = vld [vmem:[%s10767_s12] sm:$0xff]  ;;  %v5095_v42 = vld [vmem:[%s10757_s2 + $0xa88] sm:$0xff] }
 0x27e   : > { %6081 = vmatprep.subr.bf16.mxu0 %v6080_v63  ;;  %v4321_v63 = vld [vmem:[%s10767_s12 + $0x8] sm:$0xff]  ;;  %4324 = vperm.xlu1 %6878, %v4320_v14  }
 0x27f   : > { %4329 = vperm.xlu0 %6877, %v4321_v63   ;;  %v5091_v14 = vld [vmem:[%s10757_s2 + $0xa68] sm:$0xff]  ;;  %v5090_v63 = vld [vmem:[%s10757_s2 + $0xa60] sm:$0xff] }
 0x281   : > { %6083 = vmatpush1.bf16.msra.mxu0 %v6082_v20  ;;  %v6108_v20 = vpack.c.bf16 %v5065_v17, %v5063_v30  ;;  %v5094_v30 = vld [vmem:[%s10757_s2 + $0xa80] sm:$0xff]  ;;  %v5096_v17 = vld [vmem:[%s10757_s2 + $0xa90] sm:$0xff] }
 0x282   : > { %6085 = vmatprep.subr.bf16.mxu0 %v6084_v23  ;;  %v5064_v23 = vld [vmem:[%s10757_s2 + $0x990] sm:$0xff] }
 0x283   : > { %v6110_v27 = vpack.c.bf16 %v5064_v23, %v5062_v21  ;;  %v5098_v21 = vld [vmem:[%s10757_s2 + $0xaa0] sm:$0xff]  ;;  %v5100_v23 = vld [vmem:[%s10757_s2 + $0xab0] sm:$0xff] }
 0x285   : > { %6087 = vmatpush1.bf16.msra.mxu0 %v6086_v19  ;;  %v5068_v19 = vld [vmem:[%s10757_s2 + $0x9b0] sm:$0xff] }
 0x286   : > { %6089 = vmatprep.subr.bf16.mxu0 %v6088_v32  ;;  %v5073_v32 = vld [vmem:[%s10757_s2 + $0x9d8] sm:$0xff]  ;;  %v6114_v35 = vpack.c.bf16 %v5068_v19, %v5066_v56  ;;  %v5107_v56 = vld [vmem:[%s10757_s2 + $0xae8] sm:$0xff] }
 0x287   : > { %v6116_v39 = vpack.c.bf16 %v5073_v32, %v5071_v31  ;;  %v5109_v19 = vld [vmem:[%s10757_s2 + $0xaf8] sm:$0xff] }
 0x288   : > { %v6152_v32 = vpack.c.bf16 %v5109_v19, %v5107_v56  ;;  %v5156_v19 = vld [vmem:[%s10760_s5 + $0x110] sm:$0xff] }
 0x289   : > { %6091 = vmatpush1.bf16.msra.mxu0 %v6090_v48  ;;  %v5077_v48 = vld [vmem:[%s10757_s2 + $0x9f8] sm:$0xff] }
 0x28a   : > { %6093 = vmatprep.subr.bf16.mxu0 %v6092_v51  ;;  %v6120_v51 = vpack.c.bf16 %v5077_v48, %v5075_v45  ;;  %v6156_v48 = vpack.c.bf16 %v5113_v43, %v5111_v40  ;;  %v5158_v43 = vld [vmem:[%s10760_s5 + $0x120] sm:$0xff] }
 0x28d   : > { %6095 = vmatpush1.bf16.msra.mxu0 %v6094_v22  ;;  %v6124_v22 = vpack.c.bf16 %v5081_v2, %v5079_v60  ;;  %v6160_v2 = vpack.c.bf16 %v5117_v55, %v5115_v53  ;;  %v5160_v55 = vld [vmem:[%s10760_s5 + $0x130] sm:$0xff] }
 0x28e   : > { %6097 = vmatprep.subr.bf16.mxu0 %v6096_v6  ;;  %v5080_v6 = vld [vmem:[%s10757_s2 + $0xa10] sm:$0xff] }
 0x28f   : > { %v6126_v8 = vpack.c.bf16 %v5080_v6, %v5078_v29  ;;  %v5119_v29 = vld [vmem:[%s10757_s2 + $0xb48] sm:$0xff]  ;;  %v5121_v6 = vld [vmem:[%s10757_s2 + $0xb58] sm:$0xff] }
 0x290   : > { %v6164_v7 = vpack.c.bf16 %v5121_v6, %v5119_v29 }
 0x291   : > { %6099 = vmatpush1.bf16.msra.mxu0 %v6098_v11  ;;  %v5084_v11 = vld [vmem:[%s10757_s2 + $0xa30] sm:$0xff] }
 0x292   : > { %6101 = vmatprep.subr.bf16.mxu0 %v6100_v0  ;;  %v5089_v0 = vld [vmem:[%s10757_s2 + $0xa58] sm:$0xff]  ;;  %v6130_v12 = vpack.c.bf16 %v5084_v11, %v5082_v38  ;;  %v5123_v38 = vld [vmem:[%s10757_s2 + $0xb68] sm:$0xff] }
 0x293   : > { %v6132_v33 = vpack.c.bf16 %v5089_v0, %v5087_v61  ;;  %v5125_v11 = vld [vmem:[%s10757_s2 + $0xb78] sm:$0xff] }
 0x294   : > { %v6168_v0 = vpack.c.bf16 %v5125_v11, %v5123_v38 }
 0x295   : > { %6103 = vmatpush1.bf16.msra.mxu0 %v6102_v15 }
 0x296   : > { %6105 = vmatprep.subr.bf16.mxu0 %v6104_v26  ;;  %v5092_v26 = vld [vmem:[%s10757_s2 + $0xa70] sm:$0xff] }
 0x299   : > { %6107 = vmatpush1.bf16.msra.mxu0 %v6106_v18  ;;  %v5099_v18 = vld [vmem:[%s10757_s2 + $0xaa8] sm:$0xff] }
 0x29a   : > { %6109 = vmatprep.subr.bf16.mxu0 %v6108_v20 }
 0x29d   : > { %6111 = vmatpush1.bf16.msra.mxu0 %v6110_v27  ;;  %v5102_v27 = vld [vmem:[%s10757_s2 + $0xac0] sm:$0xff] }
 0x29e   : > { %6113 = vmatprep.subr.bf16.mxu0 %v6112_v47  ;;  %v5104_v47 = vld [vmem:[%s10757_s2 + $0xad0] sm:$0xff] }
 0x29f   : > { %v6150_v31 = vpack.c.bf16 %v5104_v47, %v5102_v27  ;;  %v5170_v47 = vld [vmem:[%s10760_s5 + $0x180] sm:$0xff] }
 0x2a1   : > { %6115 = vmatpush1.bf16.msra.mxu0 %v6114_v35  ;;  %v5106_v35 = vld [vmem:[%s10757_s2 + $0xae0] sm:$0xff] }
 0x2a2   : > { %6117 = vmatprep.subr.bf16.mxu0 %v6116_v39  ;;  %v5108_v39 = vld [vmem:[%s10757_s2 + $0xaf0] sm:$0xff] }
 0x2a3   : > { %v6154_v45 = vpack.c.bf16 %v5108_v39, %v5106_v35  ;;  %v5175_v35 = vld [vmem:[%s10760_s5 + $0x1a8] sm:$0xff] }
 0x2a5   : > { %6119 = vmatpush1.bf16.msra.mxu0 %v6118_v50  ;;  %v5110_v50 = vld [vmem:[%s10757_s2 + $0xb00] sm:$0xff] }
 0x2a6   : > { %6121 = vmatprep.subr.bf16.mxu0 %v6120_v51  ;;  %v5112_v51 = vld [vmem:[%s10757_s2 + $0xb10] sm:$0xff] }
 0x2a7   : > { %v6158_v60 = vpack.c.bf16 %v5112_v51, %v5110_v50  ;;  %v5177_v50 = vld [vmem:[%s10760_s5 + $0x1b8] sm:$0xff] }
 0x2a9   : > { %6123 = vmatpush1.bf16.msra.mxu0 %v6122_v4  ;;  %v5114_v4 = vld [vmem:[%s10757_s2 + $0xb20] sm:$0xff] }
 0x2aa   : > { %6125 = vmatprep.subr.bf16.mxu0 %v6124_v22  ;;  %v5116_v22 = vld [vmem:[%s10757_s2 + $0xb30] sm:$0xff] }
 0x2ab   : > { %v6162_v62 = vpack.c.bf16 %v5116_v22, %v5114_v4  ;;  %v5179_v4 = vld [vmem:[%s10760_s5 + $0x1c8] sm:$0xff] }
 0x2ac   : > { %1977 = vmatmul.mubr.f32.vlgmr.msra.gmra.mrb[24].mxu0 %v7736_v10  ;;  %v5093_v10 = vld [vmem:[%s10757_s2 + $0xa78] sm:$0xff] }
 0x2ad   : > { %1982 = vmatprep.mubr.f32.mxu0 %v7760_v41  ;;  %6127 = vmatpush1.bf16.msra.mxu0 %v6126_v8  ;;  %v6134_v41 = vpack.c.bf16 %v5088_v13, %v5086_v46  ;;  %v6136_v15 = vpack.c.bf16 %v5093_v10, %v5091_v14  ;;  %v5118_v8 = vld [vmem:[%s10757_s2 + $0xb40] sm:$0xff]  ;;  %v5127_v46 = vld [vmem:[%s10757_s2 + $0xb88] sm:$0xff]  ;;  %v5129_v13 = vld [vmem:[%s10757_s2 + $0xb98] sm:$0xff] }
 0x2ae   : > { %6129 = vmatprep.subr.bf16.mxu0 %v6128_v1  ;;  %v5120_v1 = vld [vmem:[%s10757_s2 + $0xb50] sm:$0xff]  ;;  %v6172_v10 = vpack.c.bf16 %v5129_v13, %v5127_v46 }
 0x2af   : > { %v6166_v61 = vpack.c.bf16 %v5120_v1, %v5118_v8 }
 0x2b0   : > { %1983 = vmatmul.mubr.f32.gmra.mrb[26].mxu0 %v7752_v37  ;;  %v5097_v37 = vld [vmem:[%s10757_s2 + $0xa98] sm:$0xff] }
 0x2b1   : > { %1988 = vmatprep.mubr.f32.mxu0 %v7776_v52  ;;  %6131 = vmatpush1.bf16.msra.mxu0 %v6130_v12  ;;  %v6138_v52 = vpack.c.bf16 %v5092_v26, %v5090_v63  ;;  %v6140_v16 = vpack.c.bf16 %v5097_v37, %v5095_v42  ;;  %v5122_v12 = vld [vmem:[%s10757_s2 + $0xb60] sm:$0xff]  ;;  %v5131_v63 = vld [vmem:[%s10757_s2 + $0xba8] sm:$0xff]  ;;  %v5133_v26 = vld [vmem:[%s10757_s2 + $0xbb8] sm:$0xff] }
 0x2b2   : > { %6133 = vmatprep.subr.bf16.mxu0 %v6132_v33  ;;  %v5124_v33 = vld [vmem:[%s10757_s2 + $0xb70] sm:$0xff]  ;;  %v6176_v37 = vpack.c.bf16 %v5133_v26, %v5131_v63 }
 0x2b3   : > { %v6170_v14 = vpack.c.bf16 %v5124_v33, %v5122_v12 }
 0x2b4   : > { %1989 = vmatmul.mubr.f32.gmra.mrb[28].mxu0 %v7768_v49  ;;  %v5101_v49 = vld [vmem:[%s10757_s2 + $0xab8] sm:$0xff] }
 0x2b5   : > { %1994 = vmatprep.mubr.f32.mxu0 %v7793_v5  ;;  %6135 = vmatpush1.bf16.msra.mxu0 %v6134_v41  ;;  %v6142_v5 = vpack.c.bf16 %v5096_v17, %v5094_v30  ;;  %v6144_v20 = vpack.c.bf16 %v5101_v49, %v5099_v18  ;;  %v5126_v41 = vld [vmem:[%s10757_s2 + $0xb80] sm:$0xff]  ;;  %v5135_v30 = vld [vmem:[%s10757_s2 + $0xbc8] sm:$0xff]  ;;  %v5137_v17 = vld [vmem:[%s10757_s2 + $0xbd8] sm:$0xff] }
 0x2b6   : > { %6137 = vmatprep.subr.bf16.mxu0 %v6136_v15  ;;  %v5128_v15 = vld [vmem:[%s10757_s2 + $0xb90] sm:$0xff]  ;;  %v6180_v49 = vpack.c.bf16 %v5137_v17, %v5135_v30 }
 0x2b7   : > { %v6174_v42 = vpack.c.bf16 %v5128_v15, %v5126_v41 }
 0x2b8   : > { %1995 = vmatmul.mubr.f32.gmra.mrb[30].mxu0 %v7785_v3  ;;  %v5105_v3 = vld [vmem:[%s10757_s2 + $0xad8] sm:$0xff] }
 0x2b9   : > { %6139 = vmatpush1.bf16.msra.mxu0 %v6138_v52  ;;  %2065 = vmatprep.mubr.f32.mxu0 %v8123_v36  ;;  %v6146_v36 = vpack.c.bf16 %v5100_v23, %v5098_v21  ;;  %v6148_v25 = vpack.c.bf16 %v5105_v3, %v5103_v24  ;;  %v5130_v52 = vld [vmem:[%s10757_s2 + $0xba0] sm:$0xff]  ;;  %v5139_v21 = vld [vmem:[%s10757_s2 + $0xbe8] sm:$0xff]  ;;  %v5141_v23 = vld [vmem:[%s10757_s2 + $0xbf8] sm:$0xff] }
 0x2ba   : > { %6141 = vmatprep.subr.bf16.mxu0 %v6140_v16  ;;  %v5132_v16 = vld [vmem:[%s10757_s2 + $0xbb0] sm:$0xff]  ;;  %v6184_v3 = vpack.c.bf16 %v5141_v23, %v5139_v21 }
 0x2bb   : > { %v6178_v18 = vpack.c.bf16 %v5132_v16, %v5130_v52 }
 0x2bd   : > { %6143 = vmatpush1.bf16.msra.mxu0 %v6142_v5  ;;  %v5134_v5 = vld [vmem:[%s10757_s2 + $0xbc0] sm:$0xff] }
 0x2be   : > { %6145 = vmatprep.subr.bf16.mxu0 %v6144_v20  ;;  %v5136_v20 = vld [vmem:[%s10757_s2 + $0xbd0] sm:$0xff] }
 0x2bf   : > { %v6182_v24 = vpack.c.bf16 %v5136_v20, %v5134_v5 }
 0x2c1   : > { %6147 = vmatpush1.bf16.msra.mxu0 %v6146_v36  ;;  %v5138_v36 = vld [vmem:[%s10757_s2 + $0xbe0] sm:$0xff] }
 0x2c2   : > { %6149 = vmatprep.subr.bf16.mxu0 %v6148_v25  ;;  %v5140_v25 = vld [vmem:[%s10757_s2 + $0xbf0] sm:$0xff] }
 0x2c3   : > { %v6186_v27 = vpack.c.bf16 %v5140_v25, %v5138_v36 }
 0x2c5   : > { %6151 = vmatpush1.bf16.msra.mxu0 %v6150_v31  ;;  %v5157_v31 = vld [vmem:[%s10760_s5 + $0x118] sm:$0xff] }
 0x2c6   : > { %6153 = vmatprep.subr.bf16.mxu0 %v6152_v32  ;;  %v5174_v32 = vld [vmem:[%s10760_s5 + $0x1a0] sm:$0xff]  ;;  %v6202_v39 = vpack.c.bf16 %v5157_v31, %v5156_v19  ;;  %v2159_v19 = vld [vmem:[%s10759_s4 + $0x28] sm:$0xff]  ;;  %v2160_v31 = vld [vmem:[%s10759_s4 + $0x30] sm:$0xff] }
 0x2c7   : > { %v6204_v40 = vpack.c.bf16 %v5175_v35, %v5174_v32  ;;  %v2161_v32 = vld [vmem:[%s10759_s4 + $0x38] sm:$0xff]  ;;  %v2162_v35 = vld [vmem:[%s10759_s4 + $0x40] sm:$0xff] }
 0x2c9   : > { %6155 = vmatpush1.bf16.msra.mxu0 %v6154_v45  ;;  %v5159_v45 = vld [vmem:[%s10760_s5 + $0x128] sm:$0xff] }
 0x2ca   : > { %6157 = vmatprep.subr.bf16.mxu0 %v6156_v48  ;;  %v5176_v48 = vld [vmem:[%s10760_s5 + $0x1b0] sm:$0xff]  ;;  %v6206_v51 = vpack.c.bf16 %v5159_v45, %v5158_v43  ;;  %v2165_v43 = vld [vmem:[%s10759_s4 + $0x58] sm:$0xff]  ;;  %v5162_v45 = vld [vmem:[%s10760_s5 + $0x140] sm:$0xff] }
 0x2cb   : > { %v6208_v53 = vpack.c.bf16 %v5177_v50, %v5176_v48  ;;  %v5163_v48 = vld [vmem:[%s10760_s5 + $0x148] sm:$0xff] }
 0x2cc   : > { %v6214_v50 = vpack.c.bf16 %v5163_v48, %v5162_v45  ;;  %v2348_v48 = vld [vmem:[%s10760_s5 + $0x40] sm:$0xff] }
 0x2cd   : > { %6159 = vmatpush1.bf16.msra.mxu0 %v6158_v60  ;;  %v5161_v60 = vld [vmem:[%s10760_s5 + $0x138] sm:$0xff] }
 0x2ce   : > { %6161 = vmatprep.subr.bf16.mxu0 %v6160_v2  ;;  %v5178_v2 = vld [vmem:[%s10760_s5 + $0x1c0] sm:$0xff]  ;;  %v6210_v22 = vpack.c.bf16 %v5161_v60, %v5160_v55  ;;  %v5164_v60 = vld [vmem:[%s10760_s5 + $0x150] sm:$0xff] }
 0x2cf   : > { %v6212_v29 = vpack.c.bf16 %v5179_v4, %v5178_v2  ;;  %v5165_v2 = vld [vmem:[%s10760_s5 + $0x158] sm:$0xff] }
 0x2d0   : > { %v6218_v4 = vpack.c.bf16 %v5165_v2, %v5164_v60 }
 0x2d1   : > { %6163 = vmatpush1.bf16.msra.mxu0 %v6162_v62 }
 0x2d2   : > { %6165 = vmatprep.subr.bf16.mxu0 %v6164_v7 }
 0x2d5   : > { %6167 = vmatpush1.bf16.msra.mxu0 %v6166_v61 }
 0x2d6   : > { %6169 = vmatprep.subr.bf16.mxu0 %v6168_v0 }
 0x2d9   : > { %6171 = vmatpush1.bf16.msra.mxu0 %v6170_v14 }
 0x2da   : > { %6173 = vmatprep.subr.bf16.mxu0 %v6172_v10 }
 0x2dd   : > { %6175 = vmatpush1.bf16.msra.mxu0 %v6174_v42 }
 0x2de   : > { %6177 = vmatprep.subr.bf16.mxu0 %v6176_v37 }
 0x2e1   : > { %6179 = vmatpush1.bf16.msra.mxu0 %v6178_v18 }
 0x2e2   : > { %6181 = vmatprep.subr.bf16.mxu0 %v6180_v49 }
 0x2e3   : > { %v2105_v6 = vpop.permute.xlu0 %2104  ;;  %v2110_v1 = vpop.permute.xlu1 %2109 }
 0x2e5   : > { %6183 = vmatpush1.bf16.msra.mxu0 %v6182_v24 }
 0x2e6   : > { %6185 = vmatprep.subr.bf16.mxu0 %v6184_v3 }
 0x2e7   : > { %v2115_v14 = vpop.permute.xlu1 %2114  ;;  %v2120_v18 = vpop.permute.xlu0 %2119 }
 0x2e9   : > { %6187 = vmatpush1.bf16.msra.mxu0 %v6186_v27 }
 0x2ec   : > { %2066 = vmatmul.mubr.f32.vlgmr.msra.gmra.mrb[24].mxu0 %v8115_v28  ;;  %v5171_v28 = vld [vmem:[%s10760_s5 + $0x188] sm:$0xff] }
 0x2ed   : > { %2071 = vmatprep.mubr.f32.mxu0 %v8146_v54  ;;  %v6196_v54 = vpack.c.bf16 %v5171_v28, %v5170_v47 }
 0x2ef   : > { %6197 = vmatprep.subr.bf16.mxu1 %v6196_v54 }
 0x2f0   : > { %2072 = vmatmul.mubr.f32.gmra.mrb[26].mxu0 %v8131_v44  ;;  %v5154_v44 = vld [vmem:[%s10760_s5 + $0x100] sm:$0xff] }
 0x2f1   : > { %2077 = vmatprep.mubr.f32.mxu0 %v8164_v58  ;;  %v5172_v58 = vld [vmem:[%s10760_s5 + $0x190] sm:$0xff] }
 0x2f4   : > { %2078 = vmatmul.mubr.f32.gmra.mrb[28].mxu0 %v8149_v57  ;;  %v5155_v57 = vld [vmem:[%s10760_s5 + $0x108] sm:$0xff] }
 0x2f5   : > { %2083 = vmatprep.mubr.f32.mxu0 %v8182_v9  ;;  %v6198_v9 = vpack.c.bf16 %v5155_v57, %v5154_v44  ;;  %v2154_v57 = vld [vmem:[%s10759_s4] sm:$0xff] }
 0x2f7   : > { %6199 = vmatpush3.bf16.msra.mxu1 %v6198_v9  ;;  %v2157_v9 = vld [vmem:[%s10759_s4 + $0x18] sm:$0xff] }
 0x2f8   : > { %2084 = vmatmul.mubr.f32.gmra.mrb[30].mxu0 %v8167_v59  ;;  %v5173_v59 = vld [vmem:[%s10760_s5 + $0x198] sm:$0xff] }
 0x2f9   : > { %2267 = vmatprep.mubr.f32.mxu0 %v6894_v34  ;;  %v6200_v56 = vpack.c.bf16 %v5173_v59, %v5172_v58  ;;  %v2155_v58 = vld [vmem:[%s10759_s4 + $0x8] sm:$0xff]  ;;  %v2156_v59 = vld [vmem:[%s10759_s4 + $0x10] sm:$0xff] }
 0x2fb   : > { %6201 = vmatprep.subr.bf16.mxu1 %v6200_v56  ;;  %v2158_v56 = vld [vmem:[%s10759_s4 + $0x20] sm:$0xff] }
 0x2fc   : > { %6203 = vmatpush3.bf16.msra.mxu1 %v6202_v39  ;;  %v2163_v39 = vld [vmem:[%s10759_s4 + $0x48] sm:$0xff] }
 0x2fd   : > { %6205 = vmatprep.subr.bf16.mxu1 %v6204_v40  ;;  %v2164_v40 = vld [vmem:[%s10759_s4 + $0x50] sm:$0xff] }
 0x300   : > { %6207 = vmatpush3.bf16.msra.mxu1 %v6206_v51  ;;  %v5180_v51 = vld [vmem:[%s10760_s5 + $0x1d0] sm:$0xff] }
 0x301   : > { %6209 = vmatprep.subr.bf16.mxu1 %v6208_v53  ;;  %v5181_v53 = vld [vmem:[%s10760_s5 + $0x1d8] sm:$0xff] }
 0x302   : > { %v6216_v55 = vpack.c.bf16 %v5181_v53, %v5180_v51  ;;  %v2366_v51 = vld [vmem:[%s10760_s5 + $0xd0] sm:$0xff]  ;;  %v2367_v53 = vld [vmem:[%s10760_s5 + $0xd8] sm:$0xff] }
 0x303   : > { %v6248_v2 = vpack.c.bf16 %v2367_v53, %v2366_v51  ;;  %v5214_v51 = vld [vmem:[%s10760_s5 + $0x2e0] sm:$0xff] }
 0x304   : > { %6211 = vmatpush3.bf16.msra.mxu1 %v6210_v22  ;;  %v5182_v22 = vld [vmem:[%s10760_s5 + $0x1e0] sm:$0xff] }
 0x305   : > { %6213 = vmatprep.subr.bf16.mxu1 %v6212_v29  ;;  %v5183_v29 = vld [vmem:[%s10760_s5 + $0x1e8] sm:$0xff] }
 0x308   : > { %6215 = vmatpush3.bf16.msra.mxu1 %v6214_v50  ;;  %v2349_v50 = vld [vmem:[%s10760_s5 + $0x48] sm:$0xff] }
 0x309   : > { %6217 = vmatprep.subr.bf16.mxu1 %v6216_v55  ;;  %v6246_v55 = vpack.c.bf16 %v2349_v50, %v2348_v48  ;;  %v5196_v48 = vld [vmem:[%s10760_s5 + $0x250] sm:$0xff]  ;;  %v5197_v50 = vld [vmem:[%s10760_s5 + $0x258] sm:$0xff] }
 0x30a   : > { %v6282_v53 = vpack.c.bf16 %v5197_v50, %v5196_v48 }
 0x30c   : > { %6219 = vmatpush3.bf16.msra.mxu1 %v6218_v4  ;;  %v2350_v4 = vld [vmem:[%s10760_s5 + $0x50] sm:$0xff] }
 0x3bf   : > { %v2067_v62 = vpop.f32.mrb[24].mxu0 }
 0x3c0   : > { %v2122_v7 = vadd.f32 %v2105_v6, %v2067_v62  ;;  %v2069_v8 = vpop.f32.mrb[25].mxu0  ;;  %v5166_v62 = vld [vmem:[%s10760_s5 + $0x160] sm:$0xff] }
 0x3c1   : > { %v2123_v38 = vadd.f32 %v2105_v6, %v2069_v8  ;;  %v6220_v6 = vpack.c.bf16 %v5183_v29, %v5182_v22  ;;  %v2351_v22 = vld [vmem:[%s10760_s5 + $0x58] sm:$0xff] }
 0x3c2   : > { %v2138_v61 = vmul.f32 0.2, %v2122_v7  ;;  %vm2130_vm8 = vcmp.gt.f32.partialorder %v2122_v7, 0.0 }
 0x3c3   : > { %v2073_v11 = vpop.f32.mrb[26].mxu0  ;;  %v2139_v33 = vmul.f32 0.2, %v2123_v38  ;;  %vm2131_vm9 = vcmp.gt.f32.partialorder %v2123_v38, 0.0  ;;  %6221 = vmatprep.subr.bf16.mxu1 %v6220_v6  ;;  %v2368_v6 = vld [vmem:[%s10760_s5 + $0xe0] sm:$0xff] }
 0x3c4   : > { %v2124_v0 = vadd.f32 %v2110_v1, %v2073_v11  ;;  %v2075_v12 = vpop.f32.mrb[27].mxu0  ;;  %v2146_v15 = vsel %vm2130_vm8, %v2122_v7, %v2138_v61  ;;  %v5167_v7 = vld [vmem:[%s10760_s5 + $0x168] sm:$0xff]  ;;  %v5168_v61 = vld [vmem:[%s10760_s5 + $0x170] sm:$0xff] }
 0x3c5   : > { %v2125_v46 = vadd.f32 %v2110_v1, %v2075_v12  ;;  %v2147_v16 = vsel %vm2131_vm9, %v2123_v38, %v2139_v33  ;;  %v6222_v8 = vpack.c.bf16 %v5167_v7, %v5166_v62  ;;  %v5184_v1 = vld [vmem:[%s10760_s5 + $0x1f0] sm:$0xff]  ;;  %v5185_v38 = vld [vmem:[%s10760_s5 + $0x1f8] sm:$0xff]  ;;  %v2356_v33 = vld [vmem:[%s10760_s5 + $0x80] sm:$0xff]  ;;  %v6250_v7 = vpack.c.bf16 %v2351_v22, %v2350_v4 }
 0x3c6   : > { %vm2132_vm10 = vcmp.gt.f32.partialorder %v2124_v0, 0.0  ;;  %v2140_v13 = vmul.f32 0.2, %v2124_v0  ;;  %v6224_v11 = vpack.c.bf16 %v5185_v38, %v5184_v1  ;;  %v2369_v62 = vld [vmem:[%s10760_s5 + $0xe8] sm:$0xff]  ;;  %v2352_v38 = vld [vmem:[%s10760_s5 + $0x60] sm:$0xff]  ;;  %v5216_v22 = vld [vmem:[%s10760_s5 + $0x2f0] sm:$0xff] }
 0x3c7   : > { %vm2133_vm11 = vcmp.gt.f32.partialorder %v2125_v46, 0.0  ;;  %v2141_v10 = vmul.f32 0.2, %v2125_v46  ;;  %v2079_v41 = vpop.f32.mrb[28].mxu0  ;;  %6223 = vmatpush3.bf16.msra.mxu1 %v6222_v8  ;;  %v6252_v1 = vpack.c.bf16 %v2369_v62, %v2368_v6  ;;  %v5199_v4 = vld [vmem:[%s10760_s5 + $0x268] sm:$0xff] }
 0x3c8   : > { %v2148_v63 = vsel %vm2132_vm10, %v2124_v0, %v2140_v13  ;;  %v2126_v26 = vadd.f32 %v2115_v14, %v2079_v41  ;;  %v2081_v42 = vpop.f32.mrb[29].mxu0  ;;  %v5169_v0 = vld [vmem:[%s10760_s5 + $0x178] sm:$0xff]  ;;  %6225 = vmatprep.subr.bf16.mxu1 %v6224_v11  ;;  %v2353_v11 = vld [vmem:[%s10760_s5 + $0x68] sm:$0xff] }
 0x3c9   : > { %v6190_v37 = vpack.c.bf16 %v2148_v63, %v2146_v15  ;;  %v2127_v52 = vadd.f32 %v2115_v14, %v2081_v42  ;;  %v2149_v30 = vsel %vm2133_vm11, %v2125_v46, %v2141_v10  ;;  %v6226_v12 = vpack.c.bf16 %v5169_v0, %v5168_v61  ;;  %v2357_v46 = vld [vmem:[%s10760_s5 + $0x88] sm:$0xff]  ;;  %v2370_v0 = vld [vmem:[%s10760_s5 + $0xf0] sm:$0xff] }
 0x3ca   : > { %v6188_v17 = vpack.c.bf16 %v2149_v30, %v2147_v16  ;;  %v2142_v5 = vmul.f32 0.2, %v2126_v26  ;;  %vm2134_vm12 = vcmp.gt.f32.partialorder %v2126_v26, 0.0  ;;  %v6228_v13 = vpack.c.bf16 %v2357_v46, %v2356_v33  ;;  %v2341_v16 = vld [vmem:[%s10760_s5 + $0x8] sm:$0xff]  ;;  %v2358_v30 = vld [vmem:[%s10760_s5 + $0x90] sm:$0xff] }
 0x3cb   : > { %v2085_v49 = vpop.f32.mrb[30].mxu0  ;;  %v2143_v23 = vmul.f32 0.2, %v2127_v52  ;;  %vm2135_vm13 = vcmp.gt.f32.partialorder %v2127_v52, 0.0  ;;  %6227 = vmatpush3.bf16.msra.mxu1 %v6226_v12  ;;  %v2371_v12 = vld [vmem:[%s10760_s5 + $0xf8] sm:$0xff]  ;;  %v6254_v33 = vpack.c.bf16 %v2353_v11, %v2352_v38  ;;  %v2737_v11 = vld [vmem:[%s10762_s7] sm:$0xff] }
 0x3cc   : > { %v2128_v20 = vadd.f32 %v2120_v18, %v2085_v49  ;;  %v2087_v21 = vpop.f32.mrb[31].mxu0  ;;  %6189 = vmatprep.subr.bf16.mxu0 %v6188_v17  ;;  %v2150_v25 = vsel %vm2134_vm12, %v2126_v26, %v2142_v5  ;;  %6229 = vmatprep.subr.bf16.mxu1 %v6228_v13  ;;  %v2359_v17 = vld [vmem:[%s10760_s5 + $0x98] sm:$0xff]  ;;  %v6256_v13 = vpack.c.bf16 %v2371_v12, %v2370_v0 }
 0x3cd   : > { %v2129_v24 = vadd.f32 %v2120_v18, %v2087_v21  ;;  %6191 = vmatpush1.bf16.msra.mxu0 %v6190_v37  ;;  %v2151_v28 = vsel %vm2135_vm13, %v2127_v52, %v2143_v23  ;;  %v2340_v52 = vld [vmem:[%s10760_s5] sm:$0xff]  ;;  %v2342_v21 = vld [vmem:[%s10760_s5 + $0x10] sm:$0xff]  ;;  %v2343_v23 = vld [vmem:[%s10760_s5 + $0x18] sm:$0xff] }
 0x3ce   : > { %vm2136_vm14 = vcmp.gt.f32.partialorder %v2128_v20, 0.0  ;;  %v2144_v3 = vmul.f32 0.2, %v2128_v20  ;;  %v6230_v49 = vpack.c.bf16 %v2341_v16, %v2340_v52  ;;  %v2355_v52 = vld [vmem:[%s10760_s5 + $0x78] sm:$0xff] }
 0x3cf   : > { %vm2137_vm15 = vcmp.gt.f32.partialorder %v2129_v24, 0.0  ;;  %v2145_v36 = vmul.f32 0.2, %v2129_v24 }
 0x3d0   : > { %v2152_v27 = vsel %vm2136_vm14, %v2128_v20, %v2144_v3  ;;  %v6232_v20 = vpack.c.bf16 %v2359_v17, %v2358_v30  ;;  %v2361_v3 = vld [vmem:[%s10760_s5 + $0xa8] sm:$0xff]  ;;  %v5202_v30 = vld [vmem:[%s10760_s5 + $0x280] sm:$0xff] }
 0x3d1   : > { %v6194_v47 = vpack.c.bf16 %v2152_v27, %v2150_v25  ;;  %v2153_v44 = vsel %vm2137_vm15, %v2129_v24, %v2145_v36  ;;  %v2360_v24 = vld [vmem:[%s10760_s5 + $0xa0] sm:$0xff]  ;;  %v6234_v25 = vpack.c.bf16 %v2343_v23, %v2342_v21  ;;  %v5203_v17 = vld [vmem:[%s10760_s5 + $0x288] sm:$0xff] }
 0x3d2   : > { %v6192_v54 = vpack.c.bf16 %v2153_v44, %v2151_v28  ;;  %v2344_v28 = vld [vmem:[%s10760_s5 + $0x20] sm:$0xff]  ;;  %v2345_v44 = vld [vmem:[%s10760_s5 + $0x28] sm:$0xff] }
 0x3d3   : > { %v5187_v21 = vld [vmem:[%s10760_s5 + $0x208] sm:$0xff] }
 0x3d4   : > { %6193 = vmatprep.subr.bf16.mxu0 %v6192_v54  ;;  %v2362_v54 = vld [vmem:[%s10760_s5 + $0xb0] sm:$0xff] }
 0x3d5   : > { %6195 = vmatpush1.bf16.msra.mxu0 %v6194_v47  ;;  %v6236_v47 = vpack.c.bf16 %v2361_v3, %v2360_v24  ;;  %v5204_v24 = vld [vmem:[%s10760_s5 + $0x290] sm:$0xff]  ;;  %v5205_v3 = vld [vmem:[%s10760_s5 + $0x298] sm:$0xff] }
 0x3d8   : > { %5142 = vmatmul.mubr.msk.f32.vlgmr.msra.gmra.mrb[32].mxu0 %vm2166_vm1, %v2154_v57  ;;  %v2363_v57 = vld [vmem:[%s10760_s5 + $0xb8] sm:$0xff] }
 0x3d9   : > { %2273 = vmatprep.mubr.f32.mxu0 %v6894_v34 }
 0x3dc   : > { %5143 = vmatmul.mubr.msk.f32.gmra.mrb[34].mxu0 %vm2166_vm1, %v2155_v58 }
 0x3dd   : > { %2279 = vmatprep.mubr.f32.mxu0 %v6894_v34 }
 0x3e0   : > { %5144 = vmatmul.mubr.msk.f32.gmra.mrb[36].mxu0 %vm2166_vm1, %v2156_v59  ;;  %v6238_v59 = vpack.c.bf16 %v2345_v44, %v2344_v28  ;;  %v5206_v28 = vld [vmem:[%s10760_s5 + $0x2a0] sm:$0xff]  ;;  %v5207_v44 = vld [vmem:[%s10760_s5 + $0x2a8] sm:$0xff] }
 0x3e1   : > { %2285 = vmatprep.mubr.f32.mxu0 %v6894_v34 }
 0x3e4   : > { %5145 = vmatmul.mubr.msk.f32.gmra.mrb[38].mxu0 %vm2166_vm1, %v2157_v9 }
 0x3e5   : > { %2291 = vmatprep.mubr.f32.mxu0 %v6894_v34 }
 0x3e8   : > { %5146 = vmatmul.mubr.msk.f32.gmra.mrb[40].mxu0 %vm2166_vm1, %v2158_v56  ;;  %v6240_v56 = vpack.c.bf16 %v2363_v57, %v2362_v54  ;;  %v6268_v57 = vpack.c.bf16 %v5207_v44, %v5206_v28 }
 0x3e9   : > { %2297 = vmatprep.mubr.f32.mxu0 %v6894_v34 }
 0x3ec   : > { %5147 = vmatmul.mubr.msk.f32.gmra.mrb[42].mxu0 %vm2166_vm1, %v2159_v19  ;;  %v2346_v19 = vld [vmem:[%s10760_s5 + $0x30] sm:$0xff] }
 0x3ed   : > { %2303 = vmatprep.mubr.f32.mxu0 %v6894_v34 }
 0x3f0   : > { %5148 = vmatmul.mubr.msk.f32.gmra.mrb[44].mxu0 %vm2166_vm1, %v2160_v31  ;;  %v2347_v31 = vld [vmem:[%s10760_s5 + $0x38] sm:$0xff] }
 0x3f1   : > { %2309 = vmatprep.mubr.f32.mxu0 %v6894_v34 }
 0x3f4   : > { %5149 = vmatmul.mubr.msk.f32.gmra.mrb[46].mxu0 %vm2166_vm1, %v2161_v32  ;;  %v2364_v32 = vld [vmem:[%s10760_s5 + $0xc0] sm:$0xff] }
 0x3f5   : > { %2315 = vmatprep.mubr.f32.mxu0 %v6894_v34 }
 0x3f8   : > { %5150 = vmatmul.mubr.msk.f32.gmra.mrb[48].mxu0 %vm2166_vm1, %v2162_v35  ;;  %v2365_v35 = vld [vmem:[%s10760_s5 + $0xc8] sm:$0xff] }
 0x3f9   : > { %2321 = vmatprep.mubr.f32.mxu0 %v6894_v34  ;;  %v6244_v45 = vpack.c.bf16 %v2365_v35, %v2364_v32  ;;  %v5210_v32 = vld [vmem:[%s10760_s5 + $0x2c0] sm:$0xff] }
 0x3fc   : > { %5151 = vmatmul.mubr.msk.f32.gmra.mrb[50].mxu0 %vm2166_vm1, %v2163_v39 }
 0x3fd   : > { %2327 = vmatprep.mubr.f32.mxu0 %v6894_v34 }
 0x400   : > { %5152 = vmatmul.mubr.msk.f32.gmra.mrb[52].mxu0 %vm2166_vm1, %v2164_v40  ;;  %v6242_v40 = vpack.c.bf16 %v2347_v31, %v2346_v19  ;;  %v5192_v19 = vld [vmem:[%s10760_s5 + $0x230] sm:$0xff]  ;;  %v5193_v31 = vld [vmem:[%s10760_s5 + $0x238] sm:$0xff] }
 0x401   : > { %2333 = vmatprep.mubr.f32.mxu0 %v6894_v34 }
 0x404   : > { %5153 = vmatmul.mubr.msk.f32.gmra.mrb[54].mxu0 %vm2166_vm1, %v2165_v43 }
 0x4ab   : > { %v8736_v14 = vpop.f32.mrb[32].mxu0 }
 0x4ac   : > { %v2271_v10 = vpop.f32.mrb[33].mxu0 }
 0x4af   : > { %v8738_v41 = vpop.f32.mrb[34].mxu0 }
 0x4b0   : > { %v8740_v15 = vpop.f32.mrb[35].mxu0 }
 0x4b3   : > { %v8742_v63 = vpop.f32.mrb[36].mxu0 }
 0x4b4   : > { %v8744_v26 = vpop.f32.mrb[37].mxu0 }
 0x4b7   : > { %v8746_v42 = vpop.f32.mrb[38].mxu0 }
 0x4b8   : > { %v8748_v37 = vpop.f32.mrb[39].mxu0 }
 0x4bb   : > { %v2293_v18 = vpop.f32.mrb[40].mxu0 }
 0x4bc   : > { %v2295_v5 = vpop.f32.mrb[41].mxu0 }
 0x4bd   : > { %2469 = vmatprep.mubr.f32.mxu1 %v2295_v5  ;;  %v6260_v5 = vpack.c.bf16 %v5203_v17, %v5202_v30 }
 0x4be   : > { %2470 = vmatmul.mubr.f32.vlgmr.msra.gmra.mrb[24].mxu1 %v2293_v18 }
 0x4bf   : > { %6231 = vmatpush3.bf16.msra.mxu1 %v6230_v49  ;;  %v2299_v36 = vpop.f32.mrb[42].mxu0 }
 0x4c0   : > { %v2301_v27 = vpop.f32.mrb[43].mxu0  ;;  %6233 = vmatprep.subr.bf16.mxu1 %v6232_v20  ;;  %v5186_v20 = vld [vmem:[%s10760_s5 + $0x200] sm:$0xff] }
 0x4c1   : > { %2474 = vmatprep.mubr.f32.mxu1 %v2301_v27  ;;  %v5188_v27 = vld [vmem:[%s10760_s5 + $0x210] sm:$0xff] }
 0x4c2   : > { %2475 = vmatmul.mubr.f32.gmra.mrb[26].mxu1 %v2299_v36  ;;  %v6262_v36 = vpack.c.bf16 %v5187_v21, %v5186_v20 }
 0x4c3   : > { %6235 = vmatpush3.bf16.msra.mxu1 %v6234_v25  ;;  %v2305_v58 = vpop.f32.mrb[44].mxu0  ;;  %v6264_v25 = vpack.c.bf16 %v5205_v3, %v5204_v24 }
 0x4c4   : > { %v2307_v9 = vpop.f32.mrb[45].mxu0  ;;  %6237 = vmatprep.subr.bf16.mxu1 %v6236_v47  ;;  %v5189_v47 = vld [vmem:[%s10760_s5 + $0x218] sm:$0xff] }
 0x4c5   : > { %2479 = vmatprep.mubr.f32.mxu1 %v2307_v9  ;;  %v6266_v54 = vpack.c.bf16 %v5189_v47, %v5188_v27  ;;  %v5208_v9 = vld [vmem:[%s10760_s5 + $0x2b0] sm:$0xff] }
 0x4c6   : > { %2480 = vmatmul.mubr.f32.gmra.mrb[28].mxu1 %v2305_v58  ;;  %v5190_v58 = vld [vmem:[%s10760_s5 + $0x220] sm:$0xff] }
 0x4c7   : > { %6239 = vmatpush3.bf16.msra.mxu1 %v6238_v59  ;;  %v2311_v39 = vpop.f32.mrb[46].mxu0  ;;  %v5191_v59 = vld [vmem:[%s10760_s5 + $0x228] sm:$0xff] }
 0x4c8   : > { %v2313_v43 = vpop.f32.mrb[47].mxu0  ;;  %6241 = vmatprep.subr.bf16.mxu1 %v6240_v56 }
 0x4c9   : > { %2484 = vmatprep.mubr.f32.mxu1 %v2313_v43  ;;  %v5212_v43 = vld [vmem:[%s10760_s5 + $0x2d0] sm:$0xff] }
 0x4ca   : > { %2485 = vmatmul.mubr.f32.gmra.mrb[30].mxu1 %v2311_v39  ;;  %v5194_v39 = vld [vmem:[%s10760_s5 + $0x240] sm:$0xff] }
 0x4cb   : > { %6243 = vmatpush3.bf16.msra.mxu1 %v6242_v40  ;;  %2554 = vmatprep.mubr.f32.mxu1 %v2271_v10  ;;  %v8810_v60 = vpop.f32.mrb[48].mxu0  ;;  %v2354_v10 = vld [vmem:[%s10760_s5 + $0x70] sm:$0xff]  ;;  %v5195_v40 = vld [vmem:[%s10760_s5 + $0x248] sm:$0xff] }
 0x4cc   : > { %6245 = vmatprep.subr.bf16.mxu1 %v6244_v45  ;;  %v8818_v29 = vpop.f32.mrb[49].mxu0  ;;  %v6258_v18 = vpack.c.bf16 %v2355_v52, %v2354_v10 }
 0x4cf   : > { %6247 = vmatpush3.bf16.msra.mxu1 %v6246_v55  ;;  %v8826_v8 = vpop.f32.mrb[50].mxu0 }
 0x4d0   : > { %6249 = vmatprep.subr.bf16.mxu1 %v6248_v2  ;;  %v8834_v61 = vpop.f32.mrb[51].mxu0  ;;  %v5198_v2 = vld [vmem:[%s10760_s5 + $0x260] sm:$0xff] }
 0x4d1   : > { %v6286_v6 = vpack.c.bf16 %v5199_v4, %v5198_v2 }
 0x4d3   : > { %6251 = vmatpush3.bf16.msra.mxu1 %v6250_v7  ;;  %v8842_v46 = vpop.f32.mrb[52].mxu0  ;;  %v5200_v7 = vld [vmem:[%s10760_s5 + $0x270] sm:$0xff] }
 0x4d4   : > { %6253 = vmatprep.subr.bf16.mxu1 %v6252_v1  ;;  %v8850_v16 = vpop.f32.mrb[53].mxu0  ;;  %v5201_v1 = vld [vmem:[%s10760_s5 + $0x278] sm:$0xff] }
 0x4d5   : > { %v6290_v38 = vpack.c.bf16 %v5201_v1, %v5200_v7  ;;  %v5231_v7 = vld [vmem:[%s10763_s8 + $0x108] sm:$0xff]  ;;  %v5233_v1 = vld [vmem:[%s10763_s8 + $0x118] sm:$0xff] }
 0x4d7   : > { %6255 = vmatpush3.bf16.msra.mxu1 %v6254_v33  ;;  %v8858_v49 = vpop.f32.mrb[54].mxu0 }
 0x4d8   : > { %6257 = vmatprep.subr.bf16.mxu1 %v6256_v13  ;;  %v8866_v23 = vpop.f32.mrb[55].mxu0 }
 0x4db   : > { %6259 = vmatpush3.bf16.msra.mxu1 %v6258_v18 }
 0x4dc   : > { %6261 = vmatprep.subr.bf16.mxu1 %v6260_v5 }
 0x4de   : > { %2555 = vmatmul.mubr.f32.vlgmr.msra.gmra.mrb[32].mxu1 %v8736_v14  ;;  %v5209_v14 = vld [vmem:[%s10760_s5 + $0x2b8] sm:$0xff] }
 0x4df   : > { %2559 = vmatprep.mubr.f32.mxu1 %v8740_v15  ;;  %6263 = vmatpush3.bf16.msra.mxu1 %v6262_v36  ;;  %v6270_v15 = vpack.c.bf16 %v5191_v59, %v5190_v58  ;;  %v6272_v56 = vpack.c.bf16 %v5209_v14, %v5208_v9 }
 0x4e0   : > { %6265 = vmatprep.subr.bf16.mxu1 %v6264_v25 }
 0x4e2   : > { %2560 = vmatmul.mubr.f32.gmra.mrb[34].mxu1 %v8738_v41  ;;  %v5211_v41 = vld [vmem:[%s10760_s5 + $0x2c8] sm:$0xff] }
 0x4e3   : > { %2564 = vmatprep.mubr.f32.mxu1 %v8744_v26  ;;  %6267 = vmatpush3.bf16.msra.mxu1 %v6266_v54  ;;  %v6274_v26 = vpack.c.bf16 %v5193_v31, %v5192_v19  ;;  %v6276_v35 = vpack.c.bf16 %v5211_v41, %v5210_v32 }
 0x4e4   : > { %6269 = vmatprep.subr.bf16.mxu1 %v6268_v57 }
 0x4e6   : > { %2565 = vmatmul.mubr.f32.gmra.mrb[36].mxu1 %v8742_v63  ;;  %v5213_v63 = vld [vmem:[%s10760_s5 + $0x2d8] sm:$0xff] }
 0x4e7   : > { %2569 = vmatprep.mubr.f32.mxu1 %v8748_v37  ;;  %6271 = vmatpush3.bf16.msra.mxu1 %v6270_v15  ;;  %v6278_v37 = vpack.c.bf16 %v5195_v40, %v5194_v39  ;;  %v6280_v45 = vpack.c.bf16 %v5213_v63, %v5212_v43  ;;  %v2704_v15 = vpop.permute.xlu1 %2703 }
 0x4e8   : > { %6273 = vmatprep.subr.bf16.mxu1 %v6272_v56 }
 0x4ea   : > { %2570 = vmatmul.mubr.f32.gmra.mrb[38].mxu1 %v8746_v42  ;;  %v5215_v42 = vld [vmem:[%s10760_s5 + $0x2e8] sm:$0xff] }
 0x4eb   : > { %6275 = vmatpush3.bf16.msra.mxu1 %v6274_v26  ;;  %2672 = vmatprep.mubr.f32.mxu1 %v8818_v29  ;;  %v6284_v55 = vpack.c.bf16 %v5215_v42, %v5214_v51  ;;  %v5217_v29 = vld [vmem:[%s10760_s5 + $0x2f8] sm:$0xff]  ;;  %v2709_v26 = vpop.permute.xlu0 %2708  ;;  %v2714_v48 = vpop.permute.xlu1 %2713 }
 0x4ec   : > { %6277 = vmatprep.subr.bf16.mxu1 %v6276_v35  ;;  %v6288_v62 = vpack.c.bf16 %v5217_v29, %v5216_v22 }
 0x4ef   : > { %6279 = vmatpush3.bf16.msra.mxu1 %v6278_v37  ;;  %v2719_v22 = vpop.permute.xlu0 %2718 }
 0x4f0   : > { %6281 = vmatprep.subr.bf16.mxu1 %v6280_v45 }
 0x4f3   : > { %6283 = vmatpush3.bf16.msra.mxu1 %v6282_v53 }
 0x4f4   : > { %6285 = vmatprep.subr.bf16.mxu1 %v6284_v55 }
 0x4f7   : > { %6287 = vmatpush3.bf16.msra.mxu1 %v6286_v6 }
 0x4f8   : > { %6289 = vmatprep.subr.bf16.mxu1 %v6288_v62 }
 0x4fb   : > { %6291 = vmatpush3.bf16.msra.mxu1 %v6290_v38 }
 0x4fe   : > { %2673 = vmatmul.mubr.f32.vlgmr.msra.gmra.mrb[40].mxu1 %v8810_v60 }
 0x4ff   : > { %2677 = vmatprep.mubr.f32.mxu1 %v8834_v61 }
 0x502   : > { %2678 = vmatmul.mubr.f32.gmra.mrb[42].mxu1 %v8826_v8 }
 0x503   : > { %2682 = vmatprep.mubr.f32.mxu1 %v8850_v16 }
 0x506   : > { %2683 = vmatmul.mubr.f32.gmra.mrb[44].mxu1 %v8842_v46 }
 0x507   : > { %2687 = vmatprep.mubr.f32.mxu1 %v8866_v23 }
 0x50a   : > { %2688 = vmatmul.mubr.f32.gmra.mrb[46].mxu1 %v8858_v49 }
 0x50b   : > { %5778 = vmatprep.mubr.msk.f32.mxu1 %vm2166_vm1, %v2737_v11 }
 0x591   : > { %v5654_v0 = vpop.f32.mrb[24].mxu1 }
 0x592   : > { %v5655_v60 = vpop.f32.mrb[25].mxu1 }
 0x593   : > { %v5656_v12 = vadd.f32 %v5655_v60, %v5654_v0  ;;  %v6300_v60 = vpack.c.bf16 %v5233_v1, %v5231_v7  ;;  %v2913_v7 = vld [vmem:[%s10763_s8 + $0x18] sm:$0xff] }
 0x595   : > { %v5657_v61 = vpop.f32.mrb[26].mxu1 }
 0x596   : > { %v5658_v33 = vpop.f32.mrb[27].mxu1 }
 0x597   : > { %v5659_v8 = vadd.f32 %v5658_v33, %v5657_v61  ;;  %v5232_v61 = vld [vmem:[%s10763_s8 + $0x110] sm:$0xff]  ;;  %v5235_v33 = vld [vmem:[%s10763_s8 + $0x128] sm:$0xff] }
 0x599   : > { %v5660_v13 = vpop.f32.mrb[28].mxu1 }
 0x59a   : > { %v5661_v10 = vpop.f32.mrb[29].mxu1 }
 0x59b   : > { %v5662_v52 = vadd.f32 %v5661_v10, %v5660_v13  ;;  %v2738_v13 = vld [vmem:[%s10762_s7 + $0x8] sm:$0xff] }
 0x59d   : > { %v5663_v46 = vpop.f32.mrb[30].mxu1 }
 0x59e   : > { %v5664_v16 = vpop.f32.mrb[31].mxu1 }
 0x59f   : > { %v5665_v30 = vadd.f32 %v5664_v16, %v5663_v46  ;;  %v5234_v16 = vld [vmem:[%s10763_s8 + $0x120] sm:$0xff] }
 0x5b1   : > { %v5698_v17 = vpop.f32.mrb[32].mxu1 }
 0x5b2   : > { %v5699_v18 = vpop.f32.mrb[33].mxu1 }
 0x5b3   : > { %v5700_v49 = vadd.f32 %v5699_v18, %v5698_v17  ;;  %v5239_v17 = vld [vmem:[%s10763_s8 + $0x148] sm:$0xff]  ;;  %v5241_v18 = vld [vmem:[%s10763_s8 + $0x158] sm:$0xff] }
 0x5b5   : > { %v2557_v5 = vadd.f32 %v5700_v49, %v5656_v12  ;;  %v5701_v20 = vpop.f32.mrb[34].mxu1  ;;  %v5230_v12 = vld [vmem:[%s10763_s8 + $0x100] sm:$0xff]  ;;  %v2740_v49 = vld [vmem:[%s10762_s7 + $0x18] sm:$0xff] }
 0x5b6   : > { %v5702_v21 = vpop.f32.mrb[35].mxu1  ;;  %v6302_v10 = vpack.c.bf16 %v5232_v61, %v5230_v12  ;;  %v2912_v12 = vld [vmem:[%s10763_s8 + $0x10] sm:$0xff] }
 0x5b7   : > { %v5703_v23 = vadd.f32 %v5702_v21, %v5701_v20  ;;  %v2741_v20 = vld [vmem:[%s10762_s7 + $0x20] sm:$0xff]  ;;  %v6308_v21 = vpack.c.bf16 %v5241_v18, %v5239_v17  ;;  %v2919_v17 = vld [vmem:[%s10763_s8 + $0x48] sm:$0xff]  ;;  %v2921_v18 = vld [vmem:[%s10763_s8 + $0x58] sm:$0xff] }
 0x5b9   : > { %v2562_v24 = vadd.f32 %v5703_v23, %v5659_v8  ;;  %v5704_v3 = vpop.f32.mrb[36].mxu1  ;;  %v5237_v8 = vld [vmem:[%s10763_s8 + $0x138] sm:$0xff]  ;;  %v5238_v23 = vld [vmem:[%s10763_s8 + $0x140] sm:$0xff] }
 0x5ba   : > { %v5705_v36 = vpop.f32.mrb[37].mxu1  ;;  %v6304_v46 = vpack.c.bf16 %v5237_v8, %v5235_v33  ;;  %v2915_v33 = vld [vmem:[%s10763_s8 + $0x28] sm:$0xff]  ;;  %v2917_v8 = vld [vmem:[%s10763_s8 + $0x38] sm:$0xff] }
 0x5bb   : > { %v5706_v25 = vadd.f32 %v5705_v36, %v5704_v3  ;;  %v5243_v3 = vld [vmem:[%s10763_s8 + $0x168] sm:$0xff]  ;;  %v5245_v36 = vld [vmem:[%s10763_s8 + $0x178] sm:$0xff] }
 0x5bd   : > { %v2567_v27 = vadd.f32 %v5706_v25, %v5662_v52  ;;  %v5707_v47 = vpop.f32.mrb[38].mxu1  ;;  %v2739_v52 = vld [vmem:[%s10762_s7 + $0x10] sm:$0xff]  ;;  %v2742_v25 = vld [vmem:[%s10762_s7 + $0x28] sm:$0xff] }
 0x5be   : > { %v5708_v28 = vpop.f32.mrb[39].mxu1 }
 0x5bf   : > { %v5709_v44 = vadd.f32 %v5708_v28, %v5707_v47  ;;  %v2743_v47 = vld [vmem:[%s10762_s7 + $0x30] sm:$0xff]  ;;  %v6312_v28 = vpack.c.bf16 %v5245_v36, %v5243_v3  ;;  %v2925_v3 = vld [vmem:[%s10763_s8 + $0x78] sm:$0xff] }
 0x5c1   : > { %v2572_v54 = vadd.f32 %v5709_v44, %v5665_v30  ;;  %v5236_v30 = vld [vmem:[%s10763_s8 + $0x130] sm:$0xff]  ;;  %v5242_v44 = vld [vmem:[%s10763_s8 + $0x160] sm:$0xff] }
 0x5d1   : > { %v5742_v57 = vpop.f32.mrb[40].mxu1 }
 0x5d2   : > { %v5743_v58 = vpop.f32.mrb[41].mxu1 }
 0x5d3   : > { %v5744_v59 = vadd.f32 %v5743_v58, %v5742_v57  ;;  %v5247_v57 = vld [vmem:[%s10763_s8 + $0x188] sm:$0xff]  ;;  %v5249_v58 = vld [vmem:[%s10763_s8 + $0x198] sm:$0xff] }
 0x5d5   : > { %v2693_v9 = vadd.f32 %v5744_v59, %v2557_v5  ;;  %v5745_v14 = vpop.f32.mrb[42].mxu1  ;;  %v6306_v5 = vpack.c.bf16 %v5236_v30, %v5234_v16  ;;  %v2744_v59 = vld [vmem:[%s10762_s7 + $0x38] sm:$0xff]  ;;  %v2916_v16 = vld [vmem:[%s10763_s8 + $0x30] sm:$0xff] }
 0x5d6   : > { %v5746_v56 = vpop.f32.mrb[43].mxu1 }
 0x5d7   : > { %v2721_v19 = vadd.f32 %v2704_v15, %v2693_v9  ;;  %v5747_v31 = vadd.f32 %v5746_v56, %v5745_v14  ;;  %v2745_v14 = vld [vmem:[%s10762_s7 + $0x40] sm:$0xff]  ;;  %v6316_v15 = vpack.c.bf16 %v5249_v58, %v5247_v57  ;;  %v2929_v57 = vld [vmem:[%s10763_s8 + $0x98] sm:$0xff] }
 0x5d8   : > { %v5246_v56 = vld [vmem:[%s10763_s8 + $0x180] sm:$0xff] }
 0x5d9   : > { %v2694_v32 = vadd.f32 %v5747_v31, %v2562_v24  ;;  %v5748_v41 = vpop.f32.mrb[44].mxu1  ;;  %v2729_v39 = vmul.f32 0.2, %v2721_v19  ;;  %vm2725_vm2 = vcmp.gt.f32.partialorder %v2721_v19, 0.0  ;;  %v5240_v24 = vld [vmem:[%s10763_s8 + $0x150] sm:$0xff]  ;;  %v5251_v31 = vld [vmem:[%s10763_s8 + $0x1a8] sm:$0xff] }
 0x5da   : > { %v5749_v35 = vpop.f32.mrb[45].mxu1 }
 0x5db   : > { %v2722_v40 = vadd.f32 %v2709_v26, %v2694_v32  ;;  %v5750_v43 = vadd.f32 %v5749_v35, %v5748_v41  ;;  %v2733_v53 = vsel %vm2725_vm2, %v2721_v19, %v2729_v39  ;;  %v5248_v19 = vld [vmem:[%s10763_s8 + $0x190] sm:$0xff]  ;;  %v5253_v32 = vld [vmem:[%s10763_s8 + $0x1b8] sm:$0xff]  ;;  %v2746_v41 = vld [vmem:[%s10762_s7 + $0x48] sm:$0xff] }
 0x5dc   : > { %v6318_v26 = vpack.c.bf16 %v5248_v19, %v5246_v56  ;;  %v2747_v35 = vld [vmem:[%s10762_s7 + $0x50] sm:$0xff]  ;;  %v6320_v39 = vpack.c.bf16 %v5253_v32, %v5251_v31  ;;  %v2931_v19 = vld [vmem:[%s10763_s8 + $0xa8] sm:$0xff]  ;;  %v2933_v31 = vld [vmem:[%s10763_s8 + $0xb8] sm:$0xff] }
 0x5dd   : > { %v2730_v63 = vmul.f32 0.2, %v2722_v40  ;;  %v2695_v37 = vadd.f32 %v5750_v43, %v2567_v27  ;;  %v5751_v45 = vpop.f32.mrb[46].mxu1  ;;  %vm2726_vm3 = vcmp.gt.f32.partialorder %v2722_v40, 0.0  ;;  %v6310_v27 = vpack.c.bf16 %v5240_v24, %v5238_v23  ;;  %v5252_v43 = vld [vmem:[%s10763_s8 + $0x1b0] sm:$0xff]  ;;  %v2923_v24 = vld [vmem:[%s10763_s8 + $0x68] sm:$0xff] }
 0x5de   : > { %v5752_v50 = vpop.f32.mrb[47].mxu1 }
 0x5df   : > { %v2723_v51 = vadd.f32 %v2714_v48, %v2695_v37  ;;  %v5753_v42 = vadd.f32 %v5752_v50, %v5751_v45  ;;  %v2734_v55 = vsel %vm2726_vm3, %v2722_v40, %v2730_v63  ;;  %v5250_v40 = vld [vmem:[%s10763_s8 + $0x1a0] sm:$0xff]  ;;  %v2748_v63 = vld [vmem:[%s10762_s7 + $0x58] sm:$0xff]  ;;  %v5255_v45 = vld [vmem:[%s10763_s8 + $0x1c8] sm:$0xff] }
 0x5e0   : > { %v6292_v2 = vpack.c.bf16 %v2734_v55, %v2733_v53  ;;  %v6322_v37 = vpack.c.bf16 %v5252_v43, %v5250_v40  ;;  %v5257_v48 = vld [vmem:[%s10763_s8 + $0x1d8] sm:$0xff]  ;;  %v5259_v55 = vld [vmem:[%s10763_s8 + $0x1e8] sm:$0xff] }
 0x5e1   : > { %v2696_v4 = vadd.f32 %v5753_v42, %v2572_v54  ;;  %v2731_v29 = vmul.f32 0.2, %v2723_v51  ;;  %vm2727_vm4 = vcmp.gt.f32.partialorder %v2723_v51, 0.0  ;;  %v5244_v54 = vld [vmem:[%s10763_s8 + $0x170] sm:$0xff]  ;;  %v6324_v50 = vpack.c.bf16 %v5257_v48, %v5255_v45  ;;  %v2935_v40 = vld [vmem:[%s10763_s8 + $0xc8] sm:$0xff]  ;;  %v2937_v43 = vld [vmem:[%s10763_s8 + $0xd8] sm:$0xff] }
 0x5e2   : > { %6293 = vmatprep.subr.bf16.mxu1 %v6292_v2  ;;  %v6314_v9 = vpack.c.bf16 %v5244_v54, %v5242_v44  ;;  %v5256_v42 = vld [vmem:[%s10763_s8 + $0x1d0] sm:$0xff]  ;;  %v2927_v54 = vld [vmem:[%s10763_s8 + $0x88] sm:$0xff]  ;;  %v2934_v45 = vld [vmem:[%s10763_s8 + $0xc0] sm:$0xff] }
 0x5e3   : > { %v2724_v6 = vadd.f32 %v2719_v22, %v2696_v4  ;;  %6295 = vmatpush3.bf16.msra.mxu1 %v6292_v2  ;;  %v2735_v38 = vsel %vm2727_vm4, %v2723_v51, %v2731_v29  ;;  %v5254_v51 = vld [vmem:[%s10763_s8 + $0x1c0] sm:$0xff]  ;;  %v5261_v2 = vld [vmem:[%s10763_s8 + $0x1f8] sm:$0xff]  ;;  %v5260_v29 = vld [vmem:[%s10763_s8 + $0x1f0] sm:$0xff] }
 0x5e4   : > { %v6326_v53 = vpack.c.bf16 %v5256_v42, %v5254_v51  ;;  %v6328_v4 = vpack.c.bf16 %v5261_v2, %v5259_v55  ;;  %v5258_v22 = vld [vmem:[%s10763_s8 + $0x1e0] sm:$0xff]  ;;  %v2936_v48 = vld [vmem:[%s10763_s8 + $0xd0] sm:$0xff]  ;;  %v2941_v51 = vld [vmem:[%s10763_s8 + $0xf8] sm:$0xff] }
 0x5e5   : > { %v2732_v62 = vmul.f32 0.2, %v2724_v6  ;;  %vm2728_vm5 = vcmp.gt.f32.partialorder %v2724_v6, 0.0  ;;  %v6358_v42 = vpack.c.bf16 %v2936_v48, %v2934_v45  ;;  %v2938_v55 = vld [vmem:[%s10763_s8 + $0xe0] sm:$0xff]  ;;  %v2940_v2 = vld [vmem:[%s10763_s8 + $0xf0] sm:$0xff]  ;;  %v3290_v45 = vpop.permute.xlu1 %3289 }
 0x5e7   : > { %v2736_v11 = vsel %vm2728_vm5, %v2724_v6, %v2732_v62  ;;  %v6330_v6 = vpack.c.bf16 %v5260_v29, %v5258_v22  ;;  %v2911_v62 = vld [vmem:[%s10763_s8 + $0x8] sm:$0xff]  ;;  %v5265_v22 = vld [vmem:[%s10763_s8 + $0x218] sm:$0xff]  ;;  %v6362_v29 = vpack.c.bf16 %v2940_v2, %v2938_v55 }
 0x5e8   : > { %v6296_v0 = vpack.c.bf16 %v2736_v11, %v2735_v38  ;;  %v6332_v1 = vpack.c.bf16 %v2913_v7, %v2911_v62  ;;  %v5262_v62 = vld [vmem:[%s10763_s8 + $0x200] sm:$0xff]  ;;  %v5264_v7 = vld [vmem:[%s10763_s8 + $0x210] sm:$0xff] }
 0x5ea   : > { %6297 = vmatprep.subr.bf16.mxu1 %v6296_v0 }
 0x5eb   : > { %6299 = vmatpush3.bf16.msra.mxu1 %v6296_v0 }
 0x5ec   : > { %6301 = vmatprep.subr.bf16.mxu1 %v6300_v60  ;;  %v2910_v60 = vld [vmem:[%s10763_s8] sm:$0xff] }
 0x5ee   : > { %5779 = vmatmul.mubr.msk.f32.vlgmr.msra.gmra.mrb[48].mxu1 %vm2166_vm1, %v2738_v13  ;;  %v6334_v13 = vpack.c.bf16 %v2912_v12, %v2910_v60  ;;  %v5269_v60 = vld [vmem:[%s10763_s8 + $0x238] sm:$0xff]  ;;  %v6366_v12 = vpack.c.bf16 %v5264_v7, %v5262_v62  ;;  %v3300_v7 = vpop.permute.xlu1 %3299 }
 0x5ef   : > { %5781 = vmatprep.mubr.msk.f32.mxu1 %vm2166_vm1, %v2739_v52  ;;  %6303 = vmatpush1.bf16.msra.mxu1 %v6302_v10  ;;  %v6336_v52 = vpack.c.bf16 %v2917_v8, %v2915_v33  ;;  %v5266_v8 = vld [vmem:[%s10763_s8 + $0x220] sm:$0xff] }
 0x5f0   : > { %6305 = vmatprep.subr.bf16.mxu1 %v6304_v46  ;;  %v2914_v46 = vld [vmem:[%s10763_s8 + $0x20] sm:$0xff] }
 0x5f2   : > { %5782 = vmatmul.mubr.msk.f32.gmra.mrb[50].mxu1 %vm2166_vm1, %v2740_v49  ;;  %v6338_v49 = vpack.c.bf16 %v2916_v16, %v2914_v46 }
 0x5f3   : > { %5784 = vmatprep.mubr.msk.f32.mxu1 %vm2166_vm1, %v2741_v20  ;;  %6307 = vmatpush1.bf16.msra.mxu1 %v6306_v5  ;;  %v6340_v5 = vpack.c.bf16 %v2921_v18, %v2919_v17  ;;  %v2918_v20 = vld [vmem:[%s10763_s8 + $0x40] sm:$0xff]  ;;  %v5272_v17 = vld [vmem:[%s10763_s8 + $0x250] sm:$0xff]  ;;  %v5275_v18 = vld [vmem:[%s10763_s8 + $0x268] sm:$0xff] }
 0x5f4   : > { %6309 = vmatprep.subr.bf16.mxu1 %v6308_v21  ;;  %v2920_v21 = vld [vmem:[%s10763_s8 + $0x50] sm:$0xff] }
 0x5f6   : > { %5785 = vmatmul.mubr.msk.f32.gmra.mrb[52].mxu1 %vm2166_vm1, %v2742_v25  ;;  %v6342_v25 = vpack.c.bf16 %v2920_v21, %v2918_v20  ;;  %v5274_v20 = vld [vmem:[%s10763_s8 + $0x260] sm:$0xff]  ;;  %v5276_v21 = vld [vmem:[%s10763_s8 + $0x270] sm:$0xff] }
 0x5f7   : > { %5787 = vmatprep.mubr.msk.f32.mxu1 %vm2166_vm1, %v2743_v47  ;;  %6311 = vmatpush1.bf16.msra.mxu1 %v6310_v27  ;;  %v6344_v27 = vpack.c.bf16 %v2925_v3, %v2923_v24  ;;  %v2922_v47 = vld [vmem:[%s10763_s8 + $0x60] sm:$0xff]  ;;  %v6378_v24 = vpack.c.bf16 %v5276_v21, %v5274_v20 }
 0x5f8   : > { %6313 = vmatprep.subr.bf16.mxu1 %v6312_v28  ;;  %v2924_v28 = vld [vmem:[%s10763_s8 + $0x70] sm:$0xff] }
 0x5fa   : > { %5788 = vmatmul.mubr.msk.f32.gmra.mrb[54].mxu1 %vm2166_vm1, %v2744_v59  ;;  %v6346_v59 = vpack.c.bf16 %v2924_v28, %v2922_v47 }
 0x5fb   : > { %5790 = vmatprep.mubr.msk.f32.mxu1 %vm2166_vm1, %v2745_v14  ;;  %6315 = vmatpush1.bf16.msra.mxu1 %v6314_v9  ;;  %v6348_v9 = vpack.c.bf16 %v2929_v57, %v2927_v54  ;;  %v2926_v14 = vld [vmem:[%s10763_s8 + $0x80] sm:$0xff]  ;;  %v5284_v57 = vld [vmem:[%s10763_s8 + $0x2b0] sm:$0xff] }
 0x5fc   : > { %6317 = vmatprep.subr.bf16.mxu1 %v6316_v15  ;;  %v2928_v15 = vld [vmem:[%s10763_s8 + $0x90] sm:$0xff]  ;;  %v5282_v54 = vld [vmem:[%s10763_s8 + $0x2a0] sm:$0xff] }
 0x5fe   : > { %5791 = vmatmul.mubr.msk.f32.gmra.mrb[56].mxu1 %vm2166_vm1, %v2746_v41  ;;  %v6350_v41 = vpack.c.bf16 %v2928_v15, %v2926_v14  ;;  %v5286_v15 = vld [vmem:[%s10763_s8 + $0x2c0] sm:$0xff] }
 0x5ff   : > { %5793 = vmatprep.mubr.msk.f32.mxu1 %vm2166_vm1, %v2747_v35  ;;  %6319 = vmatpush1.bf16.msra.mxu1 %v6318_v26  ;;  %v6352_v26 = vpack.c.bf16 %v2933_v31, %v2931_v19  ;;  %v2930_v35 = vld [vmem:[%s10763_s8 + $0xa0] sm:$0xff]  ;;  %v5288_v19 = vld [vmem:[%s10763_s8 + $0x2d0] sm:$0xff]  ;;  %v5291_v31 = vld [vmem:[%s10763_s8 + $0x2e8] sm:$0xff] }
 0x600   : > { %6321 = vmatprep.subr.bf16.mxu1 %v6320_v39  ;;  %v2932_v39 = vld [vmem:[%s10763_s8 + $0xb0] sm:$0xff] }
 0x602   : > { %5794 = vmatmul.mubr.msk.f32.gmra.mrb[58].mxu1 %vm2166_vm1, %v2748_v63  ;;  %v6354_v63 = vpack.c.bf16 %v2932_v39, %v2930_v35  ;;  %v5290_v39 = vld [vmem:[%s10763_s8 + $0x2e0] sm:$0xff] }
 0x603   : > { %6323 = vmatpush1.bf16.msra.mxu1 %v6322_v37  ;;  %3039 = vmatprep.mubr.f32.mxu1 %v6894_v34  ;;  %v6356_v37 = vpack.c.bf16 %v2937_v43, %v2935_v40  ;;  %v5292_v40 = vld [vmem:[%s10763_s8 + $0x2f0] sm:$0xff] }
 0x604   : > { %6325 = vmatprep.subr.bf16.mxu1 %v6324_v50  ;;  %v2939_v50 = vld [vmem:[%s10763_s8 + $0xe8] sm:$0xff]  ;;  %v6394_v43 = vpack.c.bf16 %v5292_v40, %v5290_v39 }
 0x605   : > { %v3340_v39 = vld [vmem:[%s10765_s10 + $0x8] sm:$0xff] }
 0x607   : > { %6327 = vmatpush1.bf16.msra.mxu1 %v6326_v53  ;;  %v6360_v53 = vpack.c.bf16 %v2941_v51, %v2939_v50 }
 0x608   : > { %6329 = vmatprep.subr.bf16.mxu1 %v6328_v4  ;;  %v5263_v4 = vld [vmem:[%s10763_s8 + $0x208] sm:$0xff] }
 0x60b   : > { %6331 = vmatpush1.bf16.msra.mxu1 %v6330_v6  ;;  %v6364_v6 = vpack.c.bf16 %v5265_v22, %v5263_v4 }
 0x60c   : > { %6333 = vmatprep.subr.bf16.mxu1 %v6332_v1  ;;  %v5267_v1 = vld [vmem:[%s10763_s8 + $0x228] sm:$0xff] }
 0x60d   : > { %v6368_v33 = vpack.c.bf16 %v5269_v60, %v5267_v1 }
 0x6c1   : > { %v9118_v38 = vpop.f32.mrb[48].mxu1 }
 0x6c2   : > { %v9120_v11 = vpop.f32.mrb[49].mxu1 }
 0x6c5   : > { %v9122_v0 = vpop.f32.mrb[50].mxu1 }
 0x6c6   : > { %v9130_v61 = vpop.f32.mrb[51].mxu1 }
 0x6c9   : > { %v5786_v10 = vpop.f32.mrb[52].mxu1 }
 0x6ca   : > { %v2871_v30 = vpop.f32.mrb[53].mxu1 }
 0x6cb   : > { %3040 = vmatmul.mubr.f32.vlgmr.msra.gmra.mrb[60].mxu1 %v2871_v30  ;;  %v5270_v30 = vld [vmem:[%s10763_s8 + $0x240] sm:$0xff] }
 0x6cc   : > { %6335 = vmatpush1.bf16.msra.mxu1 %v6334_v13  ;;  %3045 = vmatprep.mubr.f32.mxu1 %v6894_v34  ;;  %v5268_v13 = vld [vmem:[%s10763_s8 + $0x230] sm:$0xff] }
 0x6cd   : > { %6337 = vmatprep.subr.bf16.mxu1 %v6336_v52  ;;  %v5789_v23 = vpop.f32.mrb[54].mxu1  ;;  %v5273_v52 = vld [vmem:[%s10763_s8 + $0x258] sm:$0xff]  ;;  %v6370_v46 = vpack.c.bf16 %v5268_v13, %v5266_v8 }
 0x6ce   : > { %v2881_v36 = vpop.f32.mrb[55].mxu1 }
 0x6cf   : > { %3046 = vmatmul.mubr.f32.gmra.mrb[62].mxu1 %v5786_v10  ;;  %v5271_v10 = vld [vmem:[%s10763_s8 + $0x248] sm:$0xff] }
 0x6d0   : > { %6339 = vmatpush1.bf16.msra.mxu1 %v6338_v49  ;;  %3051 = vmatprep.mubr.f32.mxu1 %v6894_v34  ;;  %v6372_v16 = vpack.c.bf16 %v5273_v52, %v5271_v10  ;;  %v6374_v49 = vpack.c.bf16 %v5272_v17, %v5270_v30 }
 0x6d1   : > { %6341 = vmatprep.subr.bf16.mxu1 %v6340_v5  ;;  %v9170_v44 = vpop.f32.mrb[56].mxu1 }
 0x6d2   : > { %v9178_v58 = vpop.f32.mrb[57].mxu1 }
 0x6d3   : > { %3052 = vmatmul.mubr.f32.gmra.mrb[64].mxu1 %v2881_v36  ;;  %v5278_v36 = vld [vmem:[%s10763_s8 + $0x280] sm:$0xff] }
 0x6d4   : > { %6343 = vmatpush1.bf16.msra.mxu1 %v6342_v25  ;;  %3057 = vmatprep.mubr.f32.mxu1 %v6894_v34  ;;  %v5280_v25 = vld [vmem:[%s10763_s8 + $0x290] sm:$0xff] }
 0x6d5   : > { %6345 = vmatprep.subr.bf16.mxu1 %v6344_v27  ;;  %v9187_v56 = vpop.f32.mrb[58].mxu1  ;;  %v5283_v27 = vld [vmem:[%s10763_s8 + $0x2a8] sm:$0xff]  ;;  %v6382_v47 = vpack.c.bf16 %v5280_v25, %v5278_v36 }
 0x6d6   : > { %v9195_v32 = vpop.f32.mrb[59].mxu1 }
 0x6d7   : > { %3058 = vmatmul.mubr.f32.gmra.mrb[66].mxu1 %v5789_v23  ;;  %v5279_v23 = vld [vmem:[%s10763_s8 + $0x288] sm:$0xff] }
 0x6d8   : > { %6347 = vmatpush1.bf16.msra.mxu1 %v6346_v59  ;;  %3128 = vmatprep.mubr.f32.mxu1 %v6894_v34  ;;  %v5287_v59 = vld [vmem:[%s10763_s8 + $0x2c8] sm:$0xff] }
 0x6d9   : > { %6349 = vmatprep.subr.bf16.mxu1 %v6348_v9  ;;  %v6386_v9 = vpack.c.bf16 %v5284_v57, %v5282_v54  ;;  %v3464_v57 = vld [vmem:[%s10766_s11] sm:$0xff] }
 0x6dc   : > { %6351 = vmatpush1.bf16.msra.mxu1 %v6350_v41  ;;  %v5293_v41 = vld [vmem:[%s10763_s8 + $0x2f8] sm:$0xff] }
 0x6dd   : > { %6353 = vmatprep.subr.bf16.mxu1 %v6352_v26  ;;  %v6390_v26 = vpack.c.bf16 %v5288_v19, %v5286_v15  ;;  %v6392_v35 = vpack.c.bf16 %v5293_v41, %v5291_v31  ;;  %v3472_v31 = vld [vmem:[%s10766_s11 + $0x40] sm:$0xff] }
 0x6de   : > { %v3476_v41 = vld [vmem:[%s10766_s11 + $0x60] sm:$0xff] }
 0x6df   : > { %v6538_v40 = vpack.c.bf16 %v3476_v41, %v3472_v31  ;;  %v3552_v41 = vld [vmem:[%s10766_s11 + $0x2c0] sm:$0xff] }
 0x6e0   : > { %6355 = vmatpush1.bf16.msra.mxu1 %v6354_v63  ;;  %v5301_v63 = vld [vmem:[%s10766_s11 + $0x408] sm:$0xff] }
 0x6e1   : > { %6357 = vmatprep.subr.bf16.mxu1 %v6356_v37 }
 0x6e4   : > { %6359 = vmatpush1.bf16.msra.mxu1 %v6358_v42 }
 0x6e5   : > { %6361 = vmatprep.subr.bf16.mxu1 %v6360_v53  ;;  %v3295_v53 = vpop.permute.xlu0 %3294 }
 0x6e8   : > { %6363 = vmatpush1.bf16.msra.mxu1 %v6362_v29 }
 0x6e9   : > { %6365 = vmatprep.subr.bf16.mxu1 %v6364_v6  ;;  %v3305_v17 = vpop.permute.xlu0 %3304 }
 0x6eb   : > { %3129 = vmatmul.mubr.f32.vlgmr.msra.gmra.mrb[60].mxu1 %v9120_v11  ;;  %v5277_v11 = vld [vmem:[%s10763_s8 + $0x278] sm:$0xff] }
 0x6ec   : > { %6367 = vmatpush1.bf16.msra.mxu1 %v6366_v12  ;;  %3134 = vmatprep.mubr.f32.mxu1 %v6894_v34  ;;  %v6376_v5 = vpack.c.bf16 %v5277_v11, %v5275_v18 }
 0x6ed   : > { %6369 = vmatprep.subr.bf16.mxu1 %v6368_v33 }
 0x6ef   : > { %3135 = vmatmul.mubr.f32.gmra.mrb[62].mxu1 %v9118_v38  ;;  %v5281_v38 = vld [vmem:[%s10763_s8 + $0x298] sm:$0xff] }
 0x6f0   : > { %6371 = vmatpush1.bf16.msra.mxu1 %v6370_v46  ;;  %3140 = vmatprep.mubr.f32.mxu1 %v6894_v34  ;;  %v6380_v3 = vpack.c.bf16 %v5281_v38, %v5279_v23 }
 0x6f1   : > { %6373 = vmatprep.subr.bf16.mxu1 %v6372_v16 }
 0x6f3   : > { %3141 = vmatmul.mubr.f32.gmra.mrb[64].mxu1 %v9130_v61  ;;  %v5285_v61 = vld [vmem:[%s10763_s8 + $0x2b8] sm:$0xff] }
 0x6f4   : > { %6375 = vmatpush1.bf16.msra.mxu1 %v6374_v49  ;;  %3146 = vmatprep.mubr.f32.mxu1 %v6894_v34  ;;  %v6384_v28 = vpack.c.bf16 %v5285_v61, %v5283_v27 }
 0x6f5   : > { %6377 = vmatprep.subr.bf16.mxu1 %v6376_v5 }
 0x6f7   : > { %3147 = vmatmul.mubr.f32.gmra.mrb[66].mxu1 %v9122_v0  ;;  %v5289_v0 = vld [vmem:[%s10763_s8 + $0x2d8] sm:$0xff] }
 0x6f8   : > { %6379 = vmatpush1.bf16.msra.mxu1 %v6378_v24  ;;  %3250 = vmatprep.mubr.f32.mxu1 %v6894_v34  ;;  %v6388_v14 = vpack.c.bf16 %v5289_v0, %v5287_v59  ;;  %v3465_v24 = vld [vmem:[%s10766_s11 + $0x8] sm:$0xff]  ;;  %v3468_v59 = vld [vmem:[%s10766_s11 + $0x20] sm:$0xff] }
 0x6f9   : > { %6381 = vmatprep.subr.bf16.mxu1 %v6380_v3  ;;  %v3469_v3 = vld [vmem:[%s10766_s11 + $0x28] sm:$0xff]  ;;  %v6534_v15 = vpack.c.bf16 %v3468_v59, %v3464_v57 }
 0x6fa   : > { %v6532_v54 = vpack.c.bf16 %v3469_v3, %v3465_v24  ;;  %v3473_v0 = vld [vmem:[%s10766_s11 + $0x48] sm:$0xff]  ;;  %v3532_v24 = vld [vmem:[%s10766_s11 + $0x220] sm:$0xff] }
 0x6fb   : > { %v3537_v3 = vld [vmem:[%s10766_s11 + $0x248] sm:$0xff] }
 0x6fc   : > { %6383 = vmatpush1.bf16.msra.mxu1 %v6382_v47 }
 0x6fd   : > { %6385 = vmatprep.subr.bf16.mxu1 %v6384_v28 }
 0x700   : > { %6387 = vmatpush1.bf16.msra.mxu1 %v6386_v9  ;;  %v3477_v9 = vld [vmem:[%s10766_s11 + $0x68] sm:$0xff] }
 0x701   : > { %6389 = vmatprep.subr.bf16.mxu1 %v6388_v14  ;;  %v3339_v14 = vld [vmem:[%s10765_s10] sm:$0xff]  ;;  %v6536_v19 = vpack.c.bf16 %v3477_v9, %v3473_v0 }
 0x702   : > { %v3544_v0 = vld [vmem:[%s10766_s11 + $0x280] sm:$0xff] }
 0x703   : > { %v3548_v9 = vld [vmem:[%s10766_s11 + $0x2a0] sm:$0xff] }
 0x704   : > { %6391 = vmatpush1.bf16.msra.mxu1 %v6390_v26  ;;  %v3481_v26 = vld [vmem:[%s10766_s11 + $0x88] sm:$0xff] }
 0x705   : > { %6393 = vmatprep.subr.bf16.mxu1 %v6392_v35  ;;  %v3485_v35 = vld [vmem:[%s10766_s11 + $0xa8] sm:$0xff] }
 0x708   : > { %6395 = vmatpush1.bf16.msra.mxu1 %v6394_v43  ;;  %v6540_v43 = vpack.c.bf16 %v3485_v35, %v3481_v26  ;;  %v3556_v26 = vld [vmem:[%s10766_s11 + $0x2e0] sm:$0xff]  ;;  %v3561_v35 = vld [vmem:[%s10766_s11 + $0x308] sm:$0xff] }
 0x70b   : > { %3251 = vmatmul.mubr.f32.vlgmr.msra.gmra.mrb[60].mxu1 %v9178_v58  ;;  %v5305_v58 = vld [vmem:[%s10766_s11 + $0x428] sm:$0xff] }
 0x70c   : > { %3256 = vmatprep.mubr.f32.mxu1 %v6894_v34  ;;  %v6404_v37 = vpack.c.bf16 %v5305_v58, %v5301_v63  ;;  %v3480_v63 = vld [vmem:[%s10766_s11 + $0x80] sm:$0xff] }
 0x70d   : > { %v3484_v58 = vld [vmem:[%s10766_s11 + $0xa0] sm:$0xff] }
 0x70e   : > { %6405 = vmatprep.subr.bf16.mxu0 %v6404_v37  ;;  %v3493_v37 = vld [vmem:[%s10766_s11 + $0xe8] sm:$0xff] }
 0x70f   : > { %3257 = vmatmul.mubr.f32.gmra.mrb[62].mxu1 %v9170_v44  ;;  %v5300_v44 = vld [vmem:[%s10766_s11 + $0x400] sm:$0xff] }
 0x710   : > { %3262 = vmatprep.mubr.f32.mxu1 %v6894_v34 }
 0x713   : > { %3263 = vmatmul.mubr.f32.gmra.mrb[64].mxu1 %v9195_v32  ;;  %v5304_v32 = vld [vmem:[%s10766_s11 + $0x420] sm:$0xff] }
 0x714   : > { %3268 = vmatprep.mubr.f32.mxu1 %v6894_v34 }
 0x717   : > { %3269 = vmatmul.mubr.f32.gmra.mrb[66].mxu1 %v9187_v56  ;;  %v6406_v56 = vpack.c.bf16 %v5304_v32, %v5300_v44  ;;  %v3489_v44 = vld [vmem:[%s10766_s11 + $0xc8] sm:$0xff]  ;;  %v3341_v32 = vld [vmem:[%s10765_s10 + $0x10] sm:$0xff] }
 0x718   : > { %3427 = vmatprep.mubr.f32.mxu1 %v6894_v34 }
 0x719   : > { %6407 = vmatpush1.bf16.msra.mxu0 %v6406_v56  ;;  %v6542_v56 = vpack.c.bf16 %v3484_v58, %v3480_v63  ;;  %v3560_v63 = vld [vmem:[%s10766_s11 + $0x300] sm:$0xff] }
 0x71a   : > { %v3564_v58 = vld [vmem:[%s10766_s11 + $0x320] sm:$0xff] }
 0x7de   : > { %v3252_v48 = vpop.f32.mrb[60].mxu1 }
 0x7df   : > { %v3307_v50 = vadd.f32 %v3290_v45, %v3252_v48  ;;  %v3254_v51 = vpop.f32.mrb[61].mxu1  ;;  %v3488_v48 = vld [vmem:[%s10766_s11 + $0xc0] sm:$0xff] }
 0x7e0   : > { %v3308_v42 = vadd.f32 %v3290_v45, %v3254_v51  ;;  %v6544_v45 = vpack.c.bf16 %v3493_v37, %v3489_v44  ;;  %v3497_v51 = vld [vmem:[%s10766_s11 + $0x108] sm:$0xff] }
 0x7e1   : > { %v3323_v2 = vmul.f32 0.2, %v3307_v50  ;;  %vm3315_vm6 = vcmp.gt.f32.partialorder %v3307_v50, 0.0  ;;  %v3569_v44 = vld [vmem:[%s10766_s11 + $0x348] sm:$0xff] }
 0x7e2   : > { %v3258_v55 = vpop.f32.mrb[62].mxu1  ;;  %v3324_v29 = vmul.f32 0.2, %v3308_v42  ;;  %vm3316_vm7 = vcmp.gt.f32.partialorder %v3308_v42, 0.0  ;;  %v3573_v37 = vld [vmem:[%s10766_s11 + $0x368] sm:$0xff] }
 0x7e3   : > { %v3309_v4 = vadd.f32 %v3295_v53, %v3258_v55  ;;  %v3260_v22 = vpop.f32.mrb[63].mxu1  ;;  %v3331_v12 = vsel %vm3315_vm6, %v3307_v50, %v3323_v2  ;;  %v3492_v50 = vld [vmem:[%s10766_s11 + $0xe0] sm:$0xff] }
 0x7e4   : > { %v3310_v6 = vadd.f32 %v3295_v53, %v3260_v22  ;;  %v3332_v46 = vsel %vm3316_vm7, %v3308_v42, %v3324_v29  ;;  %v3501_v42 = vld [vmem:[%s10766_s11 + $0x128] sm:$0xff]  ;;  %v3342_v53 = vld [vmem:[%s10765_s10 + $0x18] sm:$0xff]  ;;  %v6546_v55 = vpack.c.bf16 %v3492_v50, %v3488_v48  ;;  %v3500_v22 = vld [vmem:[%s10766_s11 + $0x120] sm:$0xff] }
 0x7e5   : > { %vm3317_vm8 = vcmp.gt.f32.partialorder %v3309_v4, 0.0  ;;  %v3325_v62 = vmul.f32 0.2, %v3309_v4  ;;  %v6548_v2 = vpack.c.bf16 %v3501_v42, %v3497_v51  ;;  %v3505_v29 = vld [vmem:[%s10766_s11 + $0x148] sm:$0xff]  ;;  %v3572_v48 = vld [vmem:[%s10766_s11 + $0x360] sm:$0xff] }
 0x7e6   : > { %vm3318_vm9 = vcmp.gt.f32.partialorder %v3310_v6, 0.0  ;;  %v3326_v1 = vmul.f32 0.2, %v3310_v6  ;;  %v3264_v60 = vpop.f32.mrb[64].mxu1  ;;  %v3577_v50 = vld [vmem:[%s10766_s11 + $0x388] sm:$0xff] }
 0x7e7   : > { %v3333_v33 = vsel %vm3317_vm8, %v3309_v4, %v3325_v62  ;;  %v3311_v8 = vadd.f32 %v3300_v7, %v3264_v60  ;;  %v3266_v13 = vpop.f32.mrb[65].mxu1  ;;  %v3496_v4 = vld [vmem:[%s10766_s11 + $0x100] sm:$0xff]  ;;  %v3581_v51 = vld [vmem:[%s10766_s11 + $0x3a8] sm:$0xff] }
 0x7e8   : > { %v6398_v10 = vpack.c.bf16 %v3333_v33, %v3331_v12  ;;  %v3312_v52 = vadd.f32 %v3300_v7, %v3266_v13  ;;  %v3334_v16 = vsel %vm3318_vm9, %v3310_v6, %v3326_v1  ;;  %v3509_v6 = vld [vmem:[%s10766_s11 + $0x168] sm:$0xff]  ;;  %v3343_v62 = vld [vmem:[%s10765_s10 + $0x20] sm:$0xff]  ;;  %v6550_v7 = vpack.c.bf16 %v3500_v22, %v3496_v4 }
 0x7e9   : > { %v6396_v30 = vpack.c.bf16 %v3334_v16, %v3332_v46  ;;  %v3327_v11 = vmul.f32 0.2, %v3311_v8  ;;  %vm3319_vm10 = vcmp.gt.f32.partialorder %v3311_v8, 0.0  ;;  %v6552_v1 = vpack.c.bf16 %v3509_v6, %v3505_v29  ;;  %v3504_v60 = vld [vmem:[%s10766_s11 + $0x140] sm:$0xff]  ;;  %v3513_v33 = vld [vmem:[%s10766_s11 + $0x188] sm:$0xff] }
 0x7ea   : > { %v3270_v18 = vpop.f32.mrb[66].mxu1  ;;  %v3328_v20 = vmul.f32 0.2, %v3312_v52  ;;  %vm3320_vm11 = vcmp.gt.f32.partialorder %v3312_v52, 0.0  ;;  %v3508_v12 = vld [vmem:[%s10766_s11 + $0x160] sm:$0xff]  ;;  %v3344_v13 = vld [vmem:[%s10765_s10 + $0x28] sm:$0xff] }
 0x7eb   : > { %v3313_v49 = vadd.f32 %v3305_v17, %v3270_v18  ;;  %v3272_v5 = vpop.f32.mrb[67].mxu1  ;;  %6397 = vmatprep.subr.bf16.mxu1 %v6396_v30  ;;  %v3335_v36 = vsel %vm3319_vm10, %v3311_v8, %v3327_v11  ;;  %v3517_v8 = vld [vmem:[%s10766_s11 + $0x1a8] sm:$0xff]  ;;  %v3512_v46 = vld [vmem:[%s10766_s11 + $0x180] sm:$0xff] }
 0x7ec   : > { %v3314_v21 = vadd.f32 %v3305_v17, %v3272_v5  ;;  %6399 = vmatpush1.bf16.msra.mxu1 %v6398_v10  ;;  %v3336_v61 = vsel %vm3320_vm11, %v3312_v52, %v3328_v20  ;;  %v6554_v10 = vpack.c.bf16 %v3508_v12, %v3504_v60  ;;  %v6556_v52 = vpack.c.bf16 %v3517_v8, %v3513_v33  ;;  %v3516_v16 = vld [vmem:[%s10766_s11 + $0x1a0] sm:$0xff]  ;;  %v3525_v30 = vld [vmem:[%s10766_s11 + $0x1e8] sm:$0xff] }
 0x7ed   : > { %vm3321_vm12 = vcmp.gt.f32.partialorder %v3313_v49, 0.0  ;;  %v3329_v23 = vmul.f32 0.2, %v3313_v49  ;;  %v6558_v17 = vpack.c.bf16 %v3516_v16, %v3512_v46  ;;  %v3520_v11 = vld [vmem:[%s10766_s11 + $0x1c0] sm:$0xff]  ;;  %v3529_v5 = vld [vmem:[%s10766_s11 + $0x208] sm:$0xff]  ;;  %v3467_v16 = vld [vmem:[%s10766_s11 + $0x18] sm:$0xff] }
 0x7ee   : > { %vm3322_vm13 = vcmp.gt.f32.partialorder %v3314_v21, 0.0  ;;  %v3330_v38 = vmul.f32 0.2, %v3314_v21  ;;  %v3533_v20 = vld [vmem:[%s10766_s11 + $0x228] sm:$0xff]  ;;  %v5308_v8 = vld [vmem:[%s10766_s11 + $0x440] sm:$0xff] }
 0x7ef   : > { %v3337_v25 = vsel %vm3321_vm12, %v3313_v49, %v3329_v23  ;;  %v3524_v49 = vld [vmem:[%s10766_s11 + $0x1e0] sm:$0xff]  ;;  %v6564_v23 = vpack.c.bf16 %v3533_v20, %v3529_v5  ;;  %v3585_v4 = vld [vmem:[%s10766_s11 + $0x3c8] sm:$0xff] }
 0x7f0   : > { %v6402_v27 = vpack.c.bf16 %v3337_v25, %v3335_v36  ;;  %v3338_v47 = vsel %vm3322_vm13, %v3314_v21, %v3330_v38  ;;  %v6562_v21 = vpack.c.bf16 %v3524_v49, %v3520_v11  ;;  %v3528_v38 = vld [vmem:[%s10766_s11 + $0x200] sm:$0xff]  ;;  %v3541_v36 = vld [vmem:[%s10766_s11 + $0x268] sm:$0xff] }
 0x7f1   : > { %v6400_v28 = vpack.c.bf16 %v3338_v47, %v3336_v61  ;;  %v6566_v25 = vpack.c.bf16 %v3532_v24, %v3528_v38  ;;  %v3536_v61 = vld [vmem:[%s10766_s11 + $0x240] sm:$0xff]  ;;  %v3589_v22 = vld [vmem:[%s10766_s11 + $0x3e8] sm:$0xff] }
 0x7f2   : > { %v3540_v47 = vld [vmem:[%s10766_s11 + $0x260] sm:$0xff]  ;;  %v6592_v6 = vpack.c.bf16 %v3589_v22, %v3585_v4  ;;  %v5309_v60 = vld [vmem:[%s10766_s11 + $0x448] sm:$0xff] }
 0x7f3   : > { %6401 = vmatprep.subr.bf16.mxu1 %v6400_v28  ;;  %v3545_v28 = vld [vmem:[%s10766_s11 + $0x288] sm:$0xff]  ;;  %v6570_v57 = vpack.c.bf16 %v3540_v47, %v3536_v61  ;;  %v5320_v11 = vld [vmem:[%s10766_s11 + $0x4a0] sm:$0xff] }
 0x7f4   : > { %6403 = vmatpush1.bf16.msra.mxu1 %v6402_v27  ;;  %v6568_v27 = vpack.c.bf16 %v3541_v36, %v3537_v3  ;;  %v5313_v12 = vld [vmem:[%s10766_s11 + $0x468] sm:$0xff]  ;;  %v5328_v38 = vld [vmem:[%s10766_s11 + $0x4e0] sm:$0xff] }
 0x7f5   : > { %6533 = vmatprep.subr.bf16.mxu1 %v6532_v54  ;;  %v3549_v54 = vld [vmem:[%s10766_s11 + $0x2a8] sm:$0xff]  ;;  %v6408_v33 = vpack.c.bf16 %v5313_v12, %v5309_v60  ;;  %v5336_v61 = vld [vmem:[%s10766_s11 + $0x520] sm:$0xff] }
 0x7f6   : > { %v6572_v59 = vpack.c.bf16 %v3549_v54, %v3545_v28  ;;  %v5321_v46 = vld [vmem:[%s10766_s11 + $0x4a8] sm:$0xff] }
 0x7f7   : > { %5294 = vmatmul.mubr.msk.f32.vlgmr.msra.gmra.mrb[68].mxu1 %vm2166_vm1, %v3339_v14  ;;  %v3553_v14 = vld [vmem:[%s10766_s11 + $0x2c8] sm:$0xff]  ;;  %6409 = vmatprep.subr.bf16.mxu0 %v6408_v33  ;;  %v5388_v33 = vld [vmem:[%s10766_s11 + $0x6c0] sm:$0xff] }
 0x7f8   : > { %3433 = vmatprep.mubr.f32.mxu1 %v6894_v34  ;;  %6535 = vmatpush1.bf16.msra.mxu1 %v6534_v15  ;;  %v3557_v15 = vld [vmem:[%s10766_s11 + $0x2e8] sm:$0xff] }
 0x7f9   : > { %6537 = vmatprep.subr.bf16.mxu1 %v6536_v19  ;;  %v6574_v19 = vpack.c.bf16 %v3548_v9, %v3544_v0  ;;  %v6576_v31 = vpack.c.bf16 %v3557_v15, %v3553_v14  ;;  %v5325_v5 = vld [vmem:[%s10766_s11 + $0x4c8] sm:$0xff]  ;;  %v5344_v0 = vld [vmem:[%s10766_s11 + $0x560] sm:$0xff] }
 0x7fa   : > { %v5329_v20 = vld [vmem:[%s10766_s11 + $0x4e8] sm:$0xff] }
 0x7fb   : > { %5295 = vmatmul.mubr.msk.f32.gmra.mrb[70].mxu1 %vm2166_vm1, %v3340_v39  ;;  %v3565_v39 = vld [vmem:[%s10766_s11 + $0x328] sm:$0xff] }
 0x7fc   : > { %3439 = vmatprep.mubr.f32.mxu1 %v6894_v34  ;;  %6539 = vmatpush1.bf16.msra.mxu1 %v6538_v40  ;;  %v6578_v40 = vpack.c.bf16 %v3556_v26, %v3552_v41  ;;  %v5333_v3 = vld [vmem:[%s10766_s11 + $0x508] sm:$0xff]  ;;  %v5352_v41 = vld [vmem:[%s10766_s11 + $0x5a0] sm:$0xff] }
 0x7fd   : > { %6541 = vmatprep.subr.bf16.mxu1 %v6540_v43  ;;  %v6580_v43 = vpack.c.bf16 %v3565_v39, %v3561_v35  ;;  %v5337_v36 = vld [vmem:[%s10766_s11 + $0x528] sm:$0xff] }
 0x7fe   : > { %v5341_v28 = vld [vmem:[%s10766_s11 + $0x548] sm:$0xff] }
 0x7ff   : > { %5296 = vmatmul.mubr.msk.f32.gmra.mrb[72].mxu1 %vm2166_vm1, %v3341_v32  ;;  %v6582_v32 = vpack.c.bf16 %v3564_v58, %v3560_v63  ;;  %v5345_v54 = vld [vmem:[%s10766_s11 + $0x568] sm:$0xff]  ;;  %v5360_v63 = vld [vmem:[%s10766_s11 + $0x5e0] sm:$0xff] }
 0x800   : > { %3445 = vmatprep.mubr.f32.mxu1 %v6894_v34  ;;  %6543 = vmatpush1.bf16.msra.mxu1 %v6542_v56  ;;  %v6584_v56 = vpack.c.bf16 %v3573_v37, %v3569_v44  ;;  %v5349_v14 = vld [vmem:[%s10766_s11 + $0x588] sm:$0xff] }
 0x801   : > { %6545 = vmatprep.subr.bf16.mxu1 %v6544_v45  ;;  %v3568_v45 = vld [vmem:[%s10766_s11 + $0x340] sm:$0xff]  ;;  %v5353_v15 = vld [vmem:[%s10766_s11 + $0x5a8] sm:$0xff] }
 0x802   : > { %v6586_v42 = vpack.c.bf16 %v3572_v48, %v3568_v45  ;;  %v5357_v35 = vld [vmem:[%s10766_s11 + $0x5c8] sm:$0xff]  ;;  %v5368_v45 = vld [vmem:[%s10766_s11 + $0x620] sm:$0xff] }
 0x803   : > { %5297 = vmatmul.mubr.msk.f32.gmra.mrb[74].mxu1 %vm2166_vm1, %v3342_v53  ;;  %v6588_v53 = vpack.c.bf16 %v3581_v51, %v3577_v50  ;;  %v5361_v39 = vld [vmem:[%s10766_s11 + $0x5e8] sm:$0xff] }
 0x804   : > { %3451 = vmatprep.mubr.f32.mxu1 %v6894_v34  ;;  %6547 = vmatpush1.bf16.msra.mxu1 %v6546_v55  ;;  %v3576_v55 = vld [vmem:[%s10766_s11 + $0x380] sm:$0xff]  ;;  %v5365_v44 = vld [vmem:[%s10766_s11 + $0x608] sm:$0xff] }
 0x805   : > { %6549 = vmatprep.subr.bf16.mxu1 %v6548_v2  ;;  %v3580_v2 = vld [vmem:[%s10766_s11 + $0x3a0] sm:$0xff]  ;;  %v5369_v37 = vld [vmem:[%s10766_s11 + $0x628] sm:$0xff] }
 0x806   : > { %v6590_v29 = vpack.c.bf16 %v3580_v2, %v3576_v55  ;;  %v5373_v50 = vld [vmem:[%s10766_s11 + $0x648] sm:$0xff]  ;;  %v5376_v55 = vld [vmem:[%s10766_s11 + $0x660] sm:$0xff] }
 0x807   : > { %5298 = vmatmul.mubr.msk.f32.gmra.mrb[76].mxu1 %vm2166_vm1, %v3343_v62  ;;  %v3584_v62 = vld [vmem:[%s10766_s11 + $0x3c0] sm:$0xff]  ;;  %v5377_v51 = vld [vmem:[%s10766_s11 + $0x668] sm:$0xff] }
 0x808   : > { %3457 = vmatprep.mubr.f32.mxu1 %v6894_v34  ;;  %6551 = vmatpush1.bf16.msra.mxu1 %v6550_v7  ;;  %v3521_v34 = vld [vmem:[%s10766_s11 + $0x1c8] sm:$0xff]  ;;  %v3588_v7 = vld [vmem:[%s10766_s11 + $0x3e0] sm:$0xff] }
 0x809   : > { %6553 = vmatprep.subr.bf16.mxu1 %v6552_v1  ;;  %v6560_v18 = vpack.c.bf16 %v3525_v30, %v3521_v34  ;;  %v6594_v1 = vpack.c.bf16 %v3588_v7, %v3584_v62  ;;  %v3471_v34 = vld [vmem:[%s10766_s11 + $0x38] sm:$0xff]  ;;  %v5381_v4 = vld [vmem:[%s10766_s11 + $0x688] sm:$0xff]  ;;  %v5384_v62 = vld [vmem:[%s10766_s11 + $0x6a0] sm:$0xff] }
 0x80a   : > { %v5385_v22 = vld [vmem:[%s10766_s11 + $0x6a8] sm:$0xff] }
 0x80b   : > { %5299 = vmatmul.mubr.msk.f32.gmra.mrb[78].mxu1 %vm2166_vm1, %v3344_v13  ;;  %v5312_v13 = vld [vmem:[%s10766_s11 + $0x460] sm:$0xff]  ;;  %v5393_v60 = vld [vmem:[%s10766_s11 + $0x6e8] sm:$0xff] }
 0x80c   : > { %6555 = vmatpush1.bf16.msra.mxu1 %v6554_v10  ;;  %v6410_v10 = vpack.c.bf16 %v5312_v13, %v5308_v8  ;;  %v5392_v8 = vld [vmem:[%s10766_s11 + $0x6e0] sm:$0xff] }
 0x80d   : > { %6557 = vmatprep.subr.bf16.mxu1 %v6556_v52  ;;  %v5317_v52 = vld [vmem:[%s10766_s11 + $0x488] sm:$0xff]  ;;  %v6450_v13 = vpack.c.bf16 %v5392_v8, %v5388_v33  ;;  %v5314_v33 = vld [vmem:[%s10766_s11 + $0x470] sm:$0xff]  ;;  %v3503_v8 = vld [vmem:[%s10766_s11 + $0x138] sm:$0xff] }
 0x80e   : > { %6411 = vmatpush1.bf16.msra.mxu0 %v6410_v10  ;;  %v6412_v30 = vpack.c.bf16 %v5321_v46, %v5317_v52  ;;  %v5397_v10 = vld [vmem:[%s10766_s11 + $0x708] sm:$0xff] }
 0x80f   : > { %v5401_v52 = vld [vmem:[%s10766_s11 + $0x728] sm:$0xff] }
 0x810   : > { %6559 = vmatpush1.bf16.msra.mxu1 %v6558_v17  ;;  %v5316_v17 = vld [vmem:[%s10766_s11 + $0x480] sm:$0xff]  ;;  %6413 = vmatprep.subr.bf16.mxu0 %v6412_v30  ;;  %v6452_v46 = vpack.c.bf16 %v5401_v52, %v5397_v10  ;;  %v5323_v10 = vld [vmem:[%s10766_s11 + $0x4b8] sm:$0xff] }
 0x811   : > { %6561 = vmatprep.subr.bf16.mxu1 %v6560_v18  ;;  %v6596_v18 = vpack.c.bf16 %v3471_v34, %v3467_v16  ;;  %v6414_v49 = vpack.c.bf16 %v5320_v11, %v5316_v17  ;;  %v5396_v16 = vld [vmem:[%s10766_s11 + $0x700] sm:$0xff]  ;;  %v5405_v17 = vld [vmem:[%s10766_s11 + $0x748] sm:$0xff] }
 0x812   : > { %v5400_v34 = vld [vmem:[%s10766_s11 + $0x720] sm:$0xff] }
 0x813   : > { %6415 = vmatpush1.bf16.msra.mxu0 %v6414_v49  ;;  %v6454_v30 = vpack.c.bf16 %v5400_v34, %v5396_v16  ;;  %v5404_v49 = vld [vmem:[%s10766_s11 + $0x740] sm:$0xff]  ;;  %v3502_v16 = vld [vmem:[%s10766_s11 + $0x130] sm:$0xff] }
 0x814   : > { %6563 = vmatpush1.bf16.msra.mxu1 %v6562_v21  ;;  %v6416_v21 = vpack.c.bf16 %v5329_v20, %v5325_v5  ;;  %v5408_v5 = vld [vmem:[%s10766_s11 + $0x760] sm:$0xff] }
 0x815   : > { %6565 = vmatprep.subr.bf16.mxu1 %v6564_v23  ;;  %v5324_v23 = vld [vmem:[%s10766_s11 + $0x4c0] sm:$0xff]  ;;  %v6458_v20 = vpack.c.bf16 %v5408_v5, %v5404_v49  ;;  %v5318_v49 = vld [vmem:[%s10766_s11 + $0x490] sm:$0xff] }
 0x816   : > { %v6418_v24 = vpack.c.bf16 %v5328_v38, %v5324_v23  ;;  %6417 = vmatprep.subr.bf16.mxu0 %v6416_v21  ;;  %v5413_v21 = vld [vmem:[%s10766_s11 + $0x788] sm:$0xff]  ;;  %v5322_v5 = vld [vmem:[%s10766_s11 + $0x4b0] sm:$0xff] }
 0x817   : > { %v5417_v23 = vld [vmem:[%s10766_s11 + $0x7a8] sm:$0xff] }
 0x818   : > { %6567 = vmatpush1.bf16.msra.mxu1 %v6566_v25  ;;  %6419 = vmatpush1.bf16.msra.mxu0 %v6418_v24  ;;  %v6420_v25 = vpack.c.bf16 %v5337_v36, %v5333_v3  ;;  %v6460_v38 = vpack.c.bf16 %v5417_v23, %v5413_v21  ;;  %v5412_v24 = vld [vmem:[%s10766_s11 + $0x780] sm:$0xff]  ;;  %v3511_v21 = vld [vmem:[%s10766_s11 + $0x178] sm:$0xff] }
 0x819   : > { %6569 = vmatprep.subr.bf16.mxu1 %v6568_v27  ;;  %v5332_v27 = vld [vmem:[%s10766_s11 + $0x500] sm:$0xff]  ;;  %v5327_v23 = vld [vmem:[%s10766_s11 + $0x4d8] sm:$0xff] }
 0x81a   : > { %v6422_v47 = vpack.c.bf16 %v5336_v61, %v5332_v27  ;;  %6421 = vmatprep.subr.bf16.mxu0 %v6420_v25  ;;  %v5416_v3 = vld [vmem:[%s10766_s11 + $0x7a0] sm:$0xff]  ;;  %v5421_v25 = vld [vmem:[%s10766_s11 + $0x7c8] sm:$0xff] }
 0x81b   : > { %v6462_v36 = vpack.c.bf16 %v5416_v3, %v5412_v24  ;;  %v5425_v27 = vld [vmem:[%s10766_s11 + $0x7e8] sm:$0xff]  ;;  %v3506_v3 = vld [vmem:[%s10766_s11 + $0x150] sm:$0xff] }
 0x81c   : > { %6571 = vmatpush1.bf16.msra.mxu1 %v6570_v57  ;;  %6423 = vmatpush1.bf16.msra.mxu0 %v6422_v47  ;;  %v6424_v57 = vpack.c.bf16 %v5345_v54, %v5341_v28  ;;  %v6464_v61 = vpack.c.bf16 %v5425_v27, %v5421_v25  ;;  %v5420_v47 = vld [vmem:[%s10766_s11 + $0x7c0] sm:$0xff]  ;;  %v6478_v25 = vpack.c.bf16 %v5322_v5, %v5318_v49  ;;  %v3538_v49 = vld [vmem:[%s10766_s11 + $0x250] sm:$0xff] }
 0x81d   : > { %6573 = vmatprep.subr.bf16.mxu1 %v6572_v59  ;;  %v5340_v59 = vld [vmem:[%s10766_s11 + $0x540] sm:$0xff]  ;;  %v3542_v5 = vld [vmem:[%s10766_s11 + $0x270] sm:$0xff] }
 0x81e   : > { %v6426_v9 = vpack.c.bf16 %v5344_v0, %v5340_v59  ;;  %6425 = vmatprep.subr.bf16.mxu0 %v6424_v57  ;;  %v5424_v28 = vld [vmem:[%s10766_s11 + $0x7e0] sm:$0xff]  ;;  %v5303_v57 = vld [vmem:[%s10766_s11 + $0x418] sm:$0xff] }
 0x81f   : > { %v6466_v54 = vpack.c.bf16 %v5424_v28, %v5420_v47  ;;  %v5307_v59 = vld [vmem:[%s10766_s11 + $0x438] sm:$0xff] }
 0x820   : > { %6575 = vmatpush1.bf16.msra.mxu1 %v6574_v19  ;;  %6427 = vmatpush1.bf16.msra.mxu0 %v6426_v9  ;;  %v6428_v19 = vpack.c.bf16 %v5353_v15, %v5349_v14  ;;  %v6468_v0 = vpack.c.bf16 %v5307_v59, %v5303_v57  ;;  %v3466_v9 = vld [vmem:[%s10766_s11 + $0x10] sm:$0xff]  ;;  %v3475_v15 = vld [vmem:[%s10766_s11 + $0x58] sm:$0xff] }
 0x821   : > { %6577 = vmatprep.subr.bf16.mxu1 %v6576_v31  ;;  %v5348_v31 = vld [vmem:[%s10766_s11 + $0x580] sm:$0xff]  ;;  %v3470_v14 = vld [vmem:[%s10766_s11 + $0x30] sm:$0xff]  ;;  %v3515_v47 = vld [vmem:[%s10766_s11 + $0x198] sm:$0xff] }
 0x822   : > { %v6430_v26 = vpack.c.bf16 %v5352_v41, %v5348_v31  ;;  %6429 = vmatprep.subr.bf16.mxu0 %v6428_v19  ;;  %v3479_v19 = vld [vmem:[%s10766_s11 + $0x78] sm:$0xff]  ;;  %v6598_v41 = vpack.c.bf16 %v3470_v14, %v3466_v9  ;;  %v5330_v57 = vld [vmem:[%s10766_s11 + $0x4f0] sm:$0xff] }
 0x823   : > { %v5335_v9 = vld [vmem:[%s10766_s11 + $0x518] sm:$0xff] }
 0x824   : > { %6579 = vmatpush1.bf16.msra.mxu1 %v6578_v40  ;;  %6431 = vmatpush1.bf16.msra.mxu0 %v6430_v26  ;;  %v6432_v40 = vpack.c.bf16 %v5361_v39, %v5357_v35  ;;  %v6600_v35 = vpack.c.bf16 %v3479_v19, %v3475_v15  ;;  %v3474_v39 = vld [vmem:[%s10766_s11 + $0x50] sm:$0xff]  ;;  %v5339_v14 = vld [vmem:[%s10766_s11 + $0x538] sm:$0xff] }
 0x825   : > { %6581 = vmatprep.subr.bf16.mxu1 %v6580_v43  ;;  %v5356_v43 = vld [vmem:[%s10766_s11 + $0x5c0] sm:$0xff]  ;;  %v3514_v19 = vld [vmem:[%s10766_s11 + $0x190] sm:$0xff] }
 0x826   : > { %v6434_v58 = vpack.c.bf16 %v5360_v63, %v5356_v43  ;;  %6433 = vmatprep.subr.bf16.mxu0 %v6432_v40  ;;  %v3478_v40 = vld [vmem:[%s10766_s11 + $0x70] sm:$0xff]  ;;  %v3483_v43 = vld [vmem:[%s10766_s11 + $0x98] sm:$0xff] }
 0x827   : > { %v3487_v63 = vld [vmem:[%s10766_s11 + $0xb8] sm:$0xff] }
 0x828   : > { %6583 = vmatpush1.bf16.msra.mxu1 %v6582_v32  ;;  %6435 = vmatpush1.bf16.msra.mxu0 %v6434_v58  ;;  %v6436_v32 = vpack.c.bf16 %v5369_v37, %v5365_v44  ;;  %v6602_v44 = vpack.c.bf16 %v3478_v40, %v3474_v39  ;;  %v3482_v37 = vld [vmem:[%s10766_s11 + $0x90] sm:$0xff]  ;;  %v3523_v40 = vld [vmem:[%s10766_s11 + $0x1d8] sm:$0xff] }
 0x829   : > { %6585 = vmatprep.subr.bf16.mxu1 %v6584_v56  ;;  %v5364_v56 = vld [vmem:[%s10766_s11 + $0x600] sm:$0xff] }
 0x82a   : > { %v6438_v48 = vpack.c.bf16 %v5368_v45, %v5364_v56  ;;  %6437 = vmatprep.subr.bf16.mxu0 %v6436_v32  ;;  %v3486_v32 = vld [vmem:[%s10766_s11 + $0xb0] sm:$0xff]  ;;  %v6604_v45 = vpack.c.bf16 %v3487_v63, %v3483_v43  ;;  %v6484_v43 = vpack.c.bf16 %v5339_v14, %v5335_v9  ;;  %v3555_v14 = vld [vmem:[%s10766_s11 + $0x2d8] sm:$0xff] }
 0x82b   : > { %v5334_v63 = vld [vmem:[%s10766_s11 + $0x510] sm:$0xff] }
 0x82c   : > { %6587 = vmatpush1.bf16.msra.mxu1 %v6586_v42  ;;  %6439 = vmatpush1.bf16.msra.mxu0 %v6438_v48  ;;  %v6440_v42 = vpack.c.bf16 %v5377_v51, %v5373_v50  ;;  %v3491_v48 = vld [vmem:[%s10766_s11 + $0xd8] sm:$0xff]  ;;  %v5302_v50 = vld [vmem:[%s10766_s11 + $0x410] sm:$0xff] }
 0x82d   : > { %6589 = vmatprep.subr.bf16.mxu1 %v6588_v53  ;;  %v5372_v53 = vld [vmem:[%s10766_s11 + $0x640] sm:$0xff]  ;;  %v5306_v51 = vld [vmem:[%s10766_s11 + $0x430] sm:$0xff] }
 0x82e   : > { %v6442_v2 = vpack.c.bf16 %v5376_v55, %v5372_v53  ;;  %6441 = vmatprep.subr.bf16.mxu0 %v6440_v42  ;;  %v3495_v42 = vld [vmem:[%s10766_s11 + $0xf8] sm:$0xff] }
 0x82f   : > { %v5311_v53 = vld [vmem:[%s10766_s11 + $0x458] sm:$0xff] }
 0x830   : > { %6591 = vmatpush1.bf16.msra.mxu1 %v6590_v29  ;;  %6443 = vmatpush1.bf16.msra.mxu0 %v6442_v2  ;;  %v6444_v29 = vpack.c.bf16 %v5385_v22, %v5381_v4  ;;  %v5315_v55 = vld [vmem:[%s10766_s11 + $0x478] sm:$0xff]  ;;  %v6606_v2 = vpack.c.bf16 %v3486_v32, %v3482_v37  ;;  %v3490_v4 = vld [vmem:[%s10766_s11 + $0xd0] sm:$0xff] }
 0x831   : > { %6593 = vmatprep.subr.bf16.mxu1 %v6592_v6  ;;  %v5380_v6 = vld [vmem:[%s10766_s11 + $0x680] sm:$0xff]  ;;  %v3494_v22 = vld [vmem:[%s10766_s11 + $0xf0] sm:$0xff]  ;;  %v3527_v32 = vld [vmem:[%s10766_s11 + $0x1f8] sm:$0xff] }
 0x832   : > { %v6446_v7 = vpack.c.bf16 %v5384_v62, %v5380_v6  ;;  %6445 = vmatprep.subr.bf16.mxu0 %v6444_v29  ;;  %v6470_v6 = vpack.c.bf16 %v5306_v51, %v5302_v50  ;;  %v6608_v62 = vpack.c.bf16 %v3495_v42, %v3491_v48  ;;  %v6610_v52 = vpack.c.bf16 %v3494_v22, %v3490_v4  ;;  %v5347_v48 = vld [vmem:[%s10766_s11 + $0x578] sm:$0xff]  ;;  %v3522_v51 = vld [vmem:[%s10766_s11 + $0x1d0] sm:$0xff] }
 0x833   : > { %v3526_v42 = vld [vmem:[%s10766_s11 + $0x1f0] sm:$0xff] }
 0x834   : > { %6595 = vmatpush1.bf16.msra.mxu1 %v6594_v1  ;;  %v5389_v1 = vld [vmem:[%s10766_s11 + $0x6c8] sm:$0xff]  ;;  %6447 = vmatpush1.bf16.msra.mxu0 %v6446_v7  ;;  %v3499_v7 = vld [vmem:[%s10766_s11 + $0x118] sm:$0xff]  ;;  %v5342_v22 = vld [vmem:[%s10766_s11 + $0x550] sm:$0xff] }
 0x835   : > { %6597 = vmatprep.subr.bf16.mxu1 %v6596_v18  ;;  %v6448_v12 = vpack.c.bf16 %v5393_v60, %v5389_v1  ;;  %v5409_v18 = vld [vmem:[%s10766_s11 + $0x768] sm:$0xff]  ;;  %v6472_v60 = vpack.c.bf16 %v5315_v55, %v5311_v53  ;;  %v6624_v55 = vpack.c.bf16 %v3527_v32, %v3523_v40  ;;  %v5379_v40 = vld [vmem:[%s10766_s11 + $0x678] sm:$0xff] }
 0x836   : > { %v6456_v11 = vpack.c.bf16 %v5409_v18, %v5405_v17  ;;  %v6612_v17 = vpack.c.bf16 %v3503_v8, %v3499_v7  ;;  %v3507_v18 = vld [vmem:[%s10766_s11 + $0x158] sm:$0xff] }
 0x837   : > { %6449 = vmatprep.subr.bf16.mxu0 %v6448_v12  ;;  %v5310_v12 = vld [vmem:[%s10766_s11 + $0x450] sm:$0xff]  ;;  %v5351_v7 = vld [vmem:[%s10766_s11 + $0x598] sm:$0xff] }
 0x838   : > { %6451 = vmatpush1.bf16.msra.mxu0 %v6450_v13  ;;  %v5319_v13 = vld [vmem:[%s10766_s11 + $0x498] sm:$0xff]  ;;  %v6474_v34 = vpack.c.bf16 %v5314_v33, %v5310_v12  ;;  %v3530_v12 = vld [vmem:[%s10766_s11 + $0x210] sm:$0xff] }
 0x839   : > { %6453 = vmatprep.subr.bf16.mxu0 %v6452_v46  ;;  %v3498_v46 = vld [vmem:[%s10766_s11 + $0x110] sm:$0xff] }
 0x83a   : > { %v6614_v24 = vpack.c.bf16 %v3502_v16, %v3498_v46  ;;  %v3534_v33 = vld [vmem:[%s10766_s11 + $0x230] sm:$0xff] }
 0x83b   : > { %v5350_v46 = vld [vmem:[%s10766_s11 + $0x590] sm:$0xff] }
 0x83c   : > { %6455 = vmatpush1.bf16.msra.mxu0 %v6454_v30  ;;  %v5354_v16 = vld [vmem:[%s10766_s11 + $0x5b0] sm:$0xff] }
 0x83d   : > { %6457 = vmatprep.subr.bf16.mxu0 %v6456_v11  ;;  %v6476_v11 = vpack.c.bf16 %v5323_v10, %v5319_v13  ;;  %v3539_v10 = vld [vmem:[%s10766_s11 + $0x258] sm:$0xff] }
 0x840   : > { %6459 = vmatpush1.bf16.msra.mxu0 %v6458_v20 }
 0x841   : > { %6461 = vmatprep.subr.bf16.mxu0 %v6460_v38  ;;  %v5331_v38 = vld [vmem:[%s10766_s11 + $0x4f8] sm:$0xff] }
 0x842   : > { %v6480_v28 = vpack.c.bf16 %v5331_v38, %v5327_v23  ;;  %v3547_v38 = vld [vmem:[%s10766_s11 + $0x298] sm:$0xff] }
 0x844   : > { %6463 = vmatpush1.bf16.msra.mxu0 %v6462_v36  ;;  %v3510_v36 = vld [vmem:[%s10766_s11 + $0x170] sm:$0xff] }
 0x845   : > { %6465 = vmatprep.subr.bf16.mxu0 %v6464_v61  ;;  %v6616_v61 = vpack.c.bf16 %v3511_v21, %v3507_v18  ;;  %v6618_v15 = vpack.c.bf16 %v3510_v36, %v3506_v3  ;;  %v5363_v18 = vld [vmem:[%s10766_s11 + $0x5f8] sm:$0xff]  ;;  %v6494_v21 = vpack.c.bf16 %v5354_v16, %v5350_v46  ;;  %v5358_v3 = vld [vmem:[%s10766_s11 + $0x5d0] sm:$0xff] }
 0x846   : > { %v5362_v36 = vld [vmem:[%s10766_s11 + $0x5f0] sm:$0xff] }
 0x847   : > { %v3570_v46 = vld [vmem:[%s10766_s11 + $0x350] sm:$0xff] }
 0x848   : > { %6467 = vmatpush1.bf16.msra.mxu0 %v6466_v54  ;;  %v5326_v54 = vld [vmem:[%s10766_s11 + $0x4d0] sm:$0xff] }
 0x849   : > { %6469 = vmatprep.subr.bf16.mxu0 %v6468_v0  ;;  %v3519_v0 = vld [vmem:[%s10766_s11 + $0x1b8] sm:$0xff]  ;;  %v3574_v16 = vld [vmem:[%s10766_s11 + $0x370] sm:$0xff] }
 0x84a   : > { %v6620_v39 = vpack.c.bf16 %v3519_v0, %v3515_v47  ;;  %v5371_v47 = vld [vmem:[%s10766_s11 + $0x638] sm:$0xff]  ;;  %v6498_v0 = vpack.c.bf16 %v5362_v36, %v5358_v3  ;;  %v3578_v3 = vld [vmem:[%s10766_s11 + $0x390] sm:$0xff] }
 0x84b   : > { %v3582_v36 = vld [vmem:[%s10766_s11 + $0x3b0] sm:$0xff] }
 0x8ca   : > { %v9777_v31 = vpop.f32.mrb[68].mxu1 }
 0x8cb   : > { %v3431_v26 = vpop.f32.mrb[69].mxu1 }
 0x8cc   : > { %3939 = vmatprep.mubr.f32.mxu1 %v3431_v26 }
 0x8cd   : > { %3940 = vmatmul.mubr.f32.vlgmr.msra.gmra.mrb[80].mxu1 %v9777_v31 }
 0x8ce   : > { %6599 = vmatpush1.bf16.msra.mxu1 %v6598_v41  ;;  %v9792_v58 = vpop.f32.mrb[70].mxu1  ;;  %v3518_v41 = vld [vmem:[%s10766_s11 + $0x1b0] sm:$0xff] }
 0x8cf   : > { %v9800_v56 = vpop.f32.mrb[71].mxu1  ;;  %6601 = vmatprep.subr.bf16.mxu1 %v6600_v35  ;;  %v6622_v50 = vpack.c.bf16 %v3518_v41, %v3514_v19  ;;  %v5366_v19 = vld [vmem:[%s10766_s11 + $0x610] sm:$0xff] }
 0x8d0   : > { %3945 = vmatprep.mubr.f32.mxu1 %v9800_v56  ;;  %v5370_v41 = vld [vmem:[%s10766_s11 + $0x630] sm:$0xff] }
 0x8d1   : > { %3946 = vmatmul.mubr.f32.gmra.mrb[82].mxu1 %v9792_v58  ;;  %v6502_v32 = vpack.c.bf16 %v5370_v41, %v5366_v19  ;;  %v3586_v19 = vld [vmem:[%s10766_s11 + $0x3d0] sm:$0xff] }
 0x8d2   : > { %6603 = vmatpush1.bf16.msra.mxu1 %v6602_v44  ;;  %4016 = vmatprep.mubr.f32.mxu1 %v3431_v26  ;;  %v9828_v29 = vpop.f32.mrb[72].mxu1  ;;  %v6482_v26 = vpack.c.bf16 %v5330_v57, %v5326_v54  ;;  %v5338_v44 = vld [vmem:[%s10766_s11 + $0x530] sm:$0xff] }
 0x8d3   : > { %6605 = vmatprep.subr.bf16.mxu1 %v6604_v45  ;;  %v3443_v1 = vpop.f32.mrb[73].mxu1  ;;  %v5343_v45 = vld [vmem:[%s10766_s11 + $0x558] sm:$0xff]  ;;  %v6486_v53 = vpack.c.bf16 %v5338_v44, %v5334_v63  ;;  %v3546_v54 = vld [vmem:[%s10766_s11 + $0x290] sm:$0xff] }
 0x8d4   : > { %3785 = vmatprep.mubr.f32.mxu0 %v3443_v1  ;;  %v6488_v4 = vpack.c.bf16 %v5347_v48, %v5343_v45  ;;  %v3550_v57 = vld [vmem:[%s10766_s11 + $0x2b0] sm:$0xff]  ;;  %v3563_v48 = vld [vmem:[%s10766_s11 + $0x318] sm:$0xff] }
 0x8d5   : > { %3786 = vmatmul.mubr.f32.vlgmr.msra.gmra.mrb[56].mxu0 %v9828_v29  ;;  %v3554_v63 = vld [vmem:[%s10766_s11 + $0x2d0] sm:$0xff] }
 0x8d6   : > { %6607 = vmatpush1.bf16.msra.mxu1 %v6606_v2  ;;  %6471 = vmatpush1.bf16.msra.mxu0 %v6470_v6  ;;  %v9855_v30 = vpop.f32.mrb[74].mxu1  ;;  %v3531_v2 = vld [vmem:[%s10766_s11 + $0x218] sm:$0xff]  ;;  %v5346_v6 = vld [vmem:[%s10766_s11 + $0x570] sm:$0xff] }
 0x8d7   : > { %6609 = vmatprep.subr.bf16.mxu1 %v6608_v62  ;;  %6473 = vmatprep.subr.bf16.mxu0 %v6472_v60  ;;  %v9866_v20 = vpop.f32.mrb[75].mxu1  ;;  %v3535_v62 = vld [vmem:[%s10766_s11 + $0x238] sm:$0xff]  ;;  %v6626_v60 = vpack.c.bf16 %v3526_v42, %v3522_v51  ;;  %v6490_v8 = vpack.c.bf16 %v5346_v6, %v5342_v22  ;;  %v3558_v44 = vld [vmem:[%s10766_s11 + $0x2f0] sm:$0xff] }
 0x8d8   : > { %3791 = vmatprep.mubr.f32.mxu0 %v9866_v20  ;;  %v6628_v13 = vpack.c.bf16 %v3535_v62, %v3531_v2  ;;  %v5374_v51 = vld [vmem:[%s10766_s11 + $0x650] sm:$0xff]  ;;  %v5387_v2 = vld [vmem:[%s10766_s11 + $0x6b8] sm:$0xff] }
 0x8d9   : > { %3792 = vmatmul.mubr.f32.gmra.mrb[58].mxu0 %v9855_v30  ;;  %v5378_v42 = vld [vmem:[%s10766_s11 + $0x670] sm:$0xff] }
 0x8da   : > { %6611 = vmatpush1.bf16.msra.mxu1 %v6610_v52  ;;  %6475 = vmatpush1.bf16.msra.mxu0 %v6474_v34  ;;  %v9885_v27 = vpop.f32.mrb[76].mxu1  ;;  %v3543_v34 = vld [vmem:[%s10766_s11 + $0x278] sm:$0xff]  ;;  %v3562_v22 = vld [vmem:[%s10766_s11 + $0x310] sm:$0xff]  ;;  %v6506_v62 = vpack.c.bf16 %v5378_v42, %v5374_v51 }
 0x8db   : > { %6613 = vmatprep.subr.bf16.mxu1 %v6612_v17  ;;  %6477 = vmatprep.subr.bf16.mxu0 %v6476_v11  ;;  %v9896_v59 = vpop.f32.mrb[77].mxu1  ;;  %v5359_v17 = vld [vmem:[%s10766_s11 + $0x5d8] sm:$0xff]  ;;  %v6630_v11 = vpack.c.bf16 %v3534_v33, %v3530_v12  ;;  %v6632_v23 = vpack.c.bf16 %v3543_v34, %v3539_v10  ;;  %v3566_v6 = vld [vmem:[%s10766_s11 + $0x330] sm:$0xff] }
 0x8dc   : > { %3862 = vmatprep.mubr.f32.mxu0 %v3443_v1  ;;  %v5355_v1 = vld [vmem:[%s10766_s11 + $0x5b8] sm:$0xff]  ;;  %v5382_v12 = vld [vmem:[%s10766_s11 + $0x690] sm:$0xff] }
 0x8dd   : > { %v6492_v52 = vpack.c.bf16 %v5355_v1, %v5351_v7  ;;  %v3571_v1 = vld [vmem:[%s10766_s11 + $0x358] sm:$0xff]  ;;  %v5386_v33 = vld [vmem:[%s10766_s11 + $0x6b0] sm:$0xff] }
 0x8de   : > { %6615 = vmatpush1.bf16.msra.mxu1 %v6614_v24  ;;  %6479 = vmatpush1.bf16.msra.mxu0 %v6478_v25  ;;  %v9913_v35 = vpop.f32.mrb[78].mxu1  ;;  %v6496_v24 = vpack.c.bf16 %v5363_v18, %v5359_v17  ;;  %v3551_v25 = vld [vmem:[%s10766_s11 + $0x2b8] sm:$0xff]  ;;  %v6510_v34 = vpack.c.bf16 %v5386_v33, %v5382_v12  ;;  %v3590_v41 = vld [vmem:[%s10766_s11 + $0x3f0] sm:$0xff]  ;;  %v5436_v33 = vld [vmem:[%s10766_s11 + $0x840] sm:$0xff] }
 0x8df   : > { %6617 = vmatprep.subr.bf16.mxu1 %v6616_v61  ;;  %6481 = vmatprep.subr.bf16.mxu0 %v6480_v28  ;;  %v9924_v37 = vpop.f32.mrb[79].mxu1  ;;  %v5367_v61 = vld [vmem:[%s10766_s11 + $0x618] sm:$0xff]  ;;  %v6634_v28 = vpack.c.bf16 %v3542_v5, %v3538_v49  ;;  %v6636_v9 = vpack.c.bf16 %v3551_v25, %v3547_v38  ;;  %v5390_v49 = vld [vmem:[%s10766_s11 + $0x6d0] sm:$0xff] }
 0x8e0   : > { %v5395_v10 = vld [vmem:[%s10766_s11 + $0x6f8] sm:$0xff]  ;;  %v5394_v5 = vld [vmem:[%s10766_s11 + $0x6f0] sm:$0xff] }
 0x8e1   : > { %v3579_v18 = vld [vmem:[%s10766_s11 + $0x398] sm:$0xff]  ;;  %v6514_v25 = vpack.c.bf16 %v5394_v5, %v5390_v49  ;;  %v5448_v49 = vld [vmem:[%s10766_s11 + $0x8a0] sm:$0xff] }
 0x8e2   : > { %6619 = vmatpush1.bf16.msra.mxu1 %v6618_v15  ;;  %6483 = vmatpush1.bf16.msra.mxu0 %v6482_v26  ;;  %v6500_v15 = vpack.c.bf16 %v5371_v47, %v5367_v61  ;;  %v3559_v26 = vld [vmem:[%s10766_s11 + $0x2f8] sm:$0xff] }
 0x8e3   : > { %6621 = vmatprep.subr.bf16.mxu1 %v6620_v39  ;;  %6485 = vmatprep.subr.bf16.mxu0 %v6484_v43  ;;  %v5375_v39 = vld [vmem:[%s10766_s11 + $0x658] sm:$0xff]  ;;  %v6638_v43 = vpack.c.bf16 %v3550_v57, %v3546_v54  ;;  %v6640_v45 = vpack.c.bf16 %v3559_v26, %v3555_v14  ;;  %v5398_v54 = vld [vmem:[%s10766_s11 + $0x710] sm:$0xff] }
 0x8e4   : > { %v5403_v38 = vld [vmem:[%s10766_s11 + $0x738] sm:$0xff]  ;;  %v5402_v57 = vld [vmem:[%s10766_s11 + $0x730] sm:$0xff] }
 0x8e5   : > { %v3587_v47 = vld [vmem:[%s10766_s11 + $0x3d8] sm:$0xff]  ;;  %v6518_v26 = vpack.c.bf16 %v5402_v57, %v5398_v54 }
 0x8e6   : > { %6623 = vmatpush1.bf16.msra.mxu1 %v6622_v50  ;;  %6487 = vmatpush1.bf16.msra.mxu0 %v6486_v53  ;;  %v6504_v50 = vpack.c.bf16 %v5379_v40, %v5375_v39  ;;  %v3567_v53 = vld [vmem:[%s10766_s11 + $0x338] sm:$0xff]  ;;  %v5429_v40 = vld [vmem:[%s10766_s11 + $0x808] sm:$0xff] }
 0x8e7   : > { %6625 = vmatprep.subr.bf16.mxu1 %v6624_v55  ;;  %6489 = vmatprep.subr.bf16.mxu0 %v6488_v4  ;;  %v5383_v55 = vld [vmem:[%s10766_s11 + $0x698] sm:$0xff]  ;;  %v6642_v4 = vpack.c.bf16 %v3558_v44, %v3554_v63  ;;  %v6644_v7 = vpack.c.bf16 %v3567_v53, %v3563_v48  ;;  %v5406_v63 = vld [vmem:[%s10766_s11 + $0x750] sm:$0xff]  ;;  %v5428_v53 = vld [vmem:[%s10766_s11 + $0x800] sm:$0xff] }
 0x8e8   : > { %v5411_v14 = vld [vmem:[%s10766_s11 + $0x778] sm:$0xff]  ;;  %v5410_v44 = vld [vmem:[%s10766_s11 + $0x770] sm:$0xff] }
 0x8e9   : > { %v5419_v48 = vld [vmem:[%s10766_s11 + $0x7b8] sm:$0xff]  ;;  %v6522_v51 = vpack.c.bf16 %v5410_v44, %v5406_v63  ;;  %v5484_v63 = vld [vmem:[%s10766_s11 + $0x9c0] sm:$0xff] }
 0x8ea   : > { %6627 = vmatpush1.bf16.msra.mxu1 %v6626_v60  ;;  %6491 = vmatpush1.bf16.msra.mxu0 %v6490_v8  ;;  %v6508_v60 = vpack.c.bf16 %v5387_v2, %v5383_v55  ;;  %v3575_v8 = vld [vmem:[%s10766_s11 + $0x378] sm:$0xff]  ;;  %v5432_v55 = vld [vmem:[%s10766_s11 + $0x820] sm:$0xff]  ;;  %v5437_v2 = vld [vmem:[%s10766_s11 + $0x848] sm:$0xff] }
 0x8eb   : > { %6629 = vmatprep.subr.bf16.mxu1 %v6628_v13  ;;  %6493 = vmatprep.subr.bf16.mxu0 %v6492_v52  ;;  %v5391_v13 = vld [vmem:[%s10766_s11 + $0x6d8] sm:$0xff]  ;;  %v6646_v52 = vpack.c.bf16 %v3566_v6, %v3562_v22  ;;  %v6648_v17 = vpack.c.bf16 %v3575_v8, %v3571_v1  ;;  %v5441_v22 = vld [vmem:[%s10766_s11 + $0x868] sm:$0xff]  ;;  %v5414_v6 = vld [vmem:[%s10766_s11 + $0x790] sm:$0xff] }
 0x8ec   : > { %v5427_v1 = vld [vmem:[%s10766_s11 + $0x7f8] sm:$0xff]  ;;  %v6664_v12 = vpack.c.bf16 %v5441_v22, %v5437_v2  ;;  %v5440_v8 = vld [vmem:[%s10766_s11 + $0x860] sm:$0xff] }
 0x8ed   : > { %v5488_v44 = vld [vmem:[%s10766_s11 + $0x9e0] sm:$0xff] }
 0x8ee   : > { %6631 = vmatpush1.bf16.msra.mxu1 %v6630_v11  ;;  %6495 = vmatpush1.bf16.msra.mxu0 %v6494_v21  ;;  %v6512_v11 = vpack.c.bf16 %v5395_v10, %v5391_v13  ;;  %v3583_v21 = vld [vmem:[%s10766_s11 + $0x3b8] sm:$0xff]  ;;  %v5445_v13 = vld [vmem:[%s10766_s11 + $0x888] sm:$0xff]  ;;  %v5500_v22 = vld [vmem:[%s10766_s11 + $0xa40] sm:$0xff] }
 0x8ef   : > { %6633 = vmatprep.subr.bf16.mxu1 %v6632_v23  ;;  %6497 = vmatprep.subr.bf16.mxu0 %v6496_v24  ;;  %v5399_v23 = vld [vmem:[%s10766_s11 + $0x718] sm:$0xff]  ;;  %v6650_v24 = vpack.c.bf16 %v3574_v16, %v3570_v46  ;;  %v6652_v61 = vpack.c.bf16 %v3583_v21, %v3579_v18  ;;  %v5422_v16 = vld [vmem:[%s10766_s11 + $0x7d0] sm:$0xff] }
 0x8f2   : > { %6635 = vmatpush1.bf16.msra.mxu1 %v6634_v28  ;;  %6499 = vmatpush1.bf16.msra.mxu0 %v6498_v0  ;;  %v6516_v28 = vpack.c.bf16 %v5403_v38, %v5399_v23  ;;  %v3591_v0 = vld [vmem:[%s10766_s11 + $0x3f8] sm:$0xff]  ;;  %v5452_v38 = vld [vmem:[%s10766_s11 + $0x8c0] sm:$0xff] }
 0x8f3   : > { %6637 = vmatprep.subr.bf16.mxu1 %v6636_v9  ;;  %6501 = vmatprep.subr.bf16.mxu0 %v6500_v15  ;;  %v5407_v9 = vld [vmem:[%s10766_s11 + $0x758] sm:$0xff]  ;;  %v6654_v15 = vpack.c.bf16 %v3582_v36, %v3578_v3  ;;  %v6656_v39 = vpack.c.bf16 %v3591_v0, %v3587_v47  ;;  %v5461_v3 = vld [vmem:[%s10766_s11 + $0x908] sm:$0xff]  ;;  %v5464_v47 = vld [vmem:[%s10766_s11 + $0x920] sm:$0xff] }
 0x8f4   : > { %v5468_v0 = vld [vmem:[%s10766_s11 + $0x940] sm:$0xff] }
 0x8f6   : > { %6639 = vmatpush1.bf16.msra.mxu1 %v6638_v43  ;;  %6503 = vmatpush1.bf16.msra.mxu0 %v6502_v32  ;;  %v6520_v43 = vpack.c.bf16 %v5411_v14, %v5407_v9  ;;  %v5433_v32 = vld [vmem:[%s10766_s11 + $0x828] sm:$0xff] }
 0x8f7   : > { %6641 = vmatprep.subr.bf16.mxu1 %v6640_v45  ;;  %6505 = vmatprep.subr.bf16.mxu0 %v6504_v50  ;;  %v5415_v45 = vld [vmem:[%s10766_s11 + $0x798] sm:$0xff]  ;;  %v6658_v50 = vpack.c.bf16 %v3590_v41, %v3586_v19  ;;  %v6660_v42 = vpack.c.bf16 %v5433_v32, %v5429_v40  ;;  %v5477_v9 = vld [vmem:[%s10766_s11 + $0x988] sm:$0xff]  ;;  %v5476_v19 = vld [vmem:[%s10766_s11 + $0x980] sm:$0xff] }
 0x8f8   : > { %v5481_v14 = vld [vmem:[%s10766_s11 + $0x9a8] sm:$0xff]  ;;  %v5480_v41 = vld [vmem:[%s10766_s11 + $0x9a0] sm:$0xff] }
 0x8f9   : > { %v6686_v40 = vpack.c.bf16 %v5480_v41, %v5476_v19  ;;  %v5493_v32 = vld [vmem:[%s10766_s11 + $0xa08] sm:$0xff]  ;;  %v5430_v19 = vld [vmem:[%s10766_s11 + $0x810] sm:$0xff] }
 0x8fa   : > { %6643 = vmatpush1.bf16.msra.mxu1 %v6642_v4  ;;  %6507 = vmatpush1.bf16.msra.mxu0 %v6506_v62  ;;  %v6524_v4 = vpack.c.bf16 %v5419_v48, %v5415_v45  ;;  %v5418_v62 = vld [vmem:[%s10766_s11 + $0x7b0] sm:$0xff]  ;;  %v5497_v45 = vld [vmem:[%s10766_s11 + $0xa28] sm:$0xff]  ;;  %v6690_v48 = vpack.c.bf16 %v5488_v44, %v5484_v63 }
 0x8fb   : > { %6645 = vmatprep.subr.bf16.mxu1 %v6644_v7  ;;  %6509 = vmatprep.subr.bf16.mxu0 %v6508_v60  ;;  %v5423_v7 = vld [vmem:[%s10766_s11 + $0x7d8] sm:$0xff]  ;;  %v6662_v60 = vpack.c.bf16 %v5432_v55, %v5428_v53  ;;  %v6526_v10 = vpack.c.bf16 %v5418_v62, %v5414_v6  ;;  %v5501_v53 = vld [vmem:[%s10766_s11 + $0xa48] sm:$0xff]  ;;  %v5504_v6 = vld [vmem:[%s10766_s11 + $0xa60] sm:$0xff] }
 0x8fc   : > { %v6528_v46 = vpack.c.bf16 %v5427_v1, %v5423_v7  ;;  %v5505_v55 = vld [vmem:[%s10766_s11 + $0xa68] sm:$0xff]  ;;  %v6698_v1 = vpack.c.bf16 %v5504_v6, %v5500_v22  ;;  %v5434_v41 = vld [vmem:[%s10766_s11 + $0x830] sm:$0xff] }
 0x8fd   : > { %v5509_v62 = vld [vmem:[%s10766_s11 + $0xa88] sm:$0xff]  ;;  %v5438_v63 = vld [vmem:[%s10766_s11 + $0x850] sm:$0xff] }
 0x8fe   : > { %6647 = vmatpush1.bf16.msra.mxu1 %v6646_v52  ;;  %6511 = vmatpush1.bf16.msra.mxu0 %v6510_v34  ;;  %v5449_v52 = vld [vmem:[%s10766_s11 + $0x8a8] sm:$0xff]  ;;  %v5426_v34 = vld [vmem:[%s10766_s11 + $0x7f0] sm:$0xff] }
 0x8ff   : > { %6649 = vmatprep.subr.bf16.mxu1 %v6648_v17  ;;  %6513 = vmatprep.subr.bf16.mxu0 %v6512_v11  ;;  %v6666_v17 = vpack.c.bf16 %v5440_v8, %v5436_v33  ;;  %v6668_v18 = vpack.c.bf16 %v5449_v52, %v5445_v13  ;;  %v5444_v11 = vld [vmem:[%s10766_s11 + $0x880] sm:$0xff]  ;;  %v6530_v5 = vpack.c.bf16 %v5426_v34, %v5422_v16  ;;  %v5513_v7 = vld [vmem:[%s10766_s11 + $0xaa8] sm:$0xff]  ;;  %v5442_v44 = vld [vmem:[%s10766_s11 + $0x870] sm:$0xff] }
 0x900   : > { %v6670_v21 = vpack.c.bf16 %v5448_v49, %v5444_v11  ;;  %v5512_v33 = vld [vmem:[%s10766_s11 + $0xaa0] sm:$0xff]  ;;  %v5517_v8 = vld [vmem:[%s10766_s11 + $0xac8] sm:$0xff]  ;;  %v5454_v22 = vld [vmem:[%s10766_s11 + $0x8d0] sm:$0xff] }
 0x901   : > { %v5521_v13 = vld [vmem:[%s10766_s11 + $0xae8] sm:$0xff]  ;;  %v5520_v16 = vld [vmem:[%s10766_s11 + $0xae0] sm:$0xff]  ;;  %v5458_v6 = vld [vmem:[%s10766_s11 + $0x8f0] sm:$0xff] }
 0x902   : > { %6651 = vmatpush1.bf16.msra.mxu1 %v6650_v24  ;;  %6515 = vmatpush1.bf16.msra.mxu0 %v6514_v25  ;;  %v5456_v24 = vld [vmem:[%s10766_s11 + $0x8e0] sm:$0xff]  ;;  %v6704_v52 = vpack.c.bf16 %v5521_v13, %v5517_v8  ;;  %v5525_v34 = vld [vmem:[%s10766_s11 + $0xb08] sm:$0xff]  ;;  %v5475_v8 = vld [vmem:[%s10766_s11 + $0x978] sm:$0xff] }
 0x903   : > { %6653 = vmatprep.subr.bf16.mxu1 %v6652_v61  ;;  %6517 = vmatprep.subr.bf16.mxu0 %v6516_v28  ;;  %v6674_v36 = vpack.c.bf16 %v5456_v24, %v5452_v38  ;;  %v5460_v61 = vld [vmem:[%s10766_s11 + $0x900] sm:$0xff]  ;;  %v5469_v28 = vld [vmem:[%s10766_s11 + $0x948] sm:$0xff] }
 0x904   : > { %v6678_v54 = vpack.c.bf16 %v5464_v47, %v5460_v61  ;;  %v5524_v49 = vld [vmem:[%s10766_s11 + $0xb00] sm:$0xff] }
 0x905   : > { %v5532_v38 = vld [vmem:[%s10766_s11 + $0xb40] sm:$0xff] }
 0x906   : > { %6655 = vmatpush1.bf16.msra.mxu1 %v6654_v15  ;;  %6519 = vmatpush1.bf16.msra.mxu0 %v6518_v26  ;;  %v6684_v15 = vpack.c.bf16 %v5481_v14, %v5477_v9  ;;  %v5485_v26 = vld [vmem:[%s10766_s11 + $0x9c8] sm:$0xff]  ;;  %v5536_v24 = vld [vmem:[%s10766_s11 + $0xb60] sm:$0xff]  ;;  %v5431_v9 = vld [vmem:[%s10766_s11 + $0x818] sm:$0xff] }
 0x907   : > { %6657 = vmatprep.subr.bf16.mxu1 %v6656_v39  ;;  %6521 = vmatprep.subr.bf16.mxu0 %v6520_v43  ;;  %v5489_v39 = vld [vmem:[%s10766_s11 + $0x9e8] sm:$0xff]  ;;  %v5540_v61 = vld [vmem:[%s10766_s11 + $0xb80] sm:$0xff]  ;;  %v5435_v14 = vld [vmem:[%s10766_s11 + $0x838] sm:$0xff] }
 0x908   : > { %v6688_v43 = vpack.c.bf16 %v5489_v39, %v5485_v26  ;;  %v5544_v47 = vld [vmem:[%s10766_s11 + $0xba0] sm:$0xff]  ;;  %v5439_v26 = vld [vmem:[%s10766_s11 + $0x858] sm:$0xff] }
 0x909   : > { %v5443_v39 = vld [vmem:[%s10766_s11 + $0x878] sm:$0xff] }
 0x90a   : > { %6659 = vmatpush1.bf16.msra.mxu1 %v6658_v50  ;;  %6523 = vmatpush1.bf16.msra.mxu0 %v6522_v51  ;;  %v6692_v50 = vpack.c.bf16 %v5497_v45, %v5493_v32  ;;  %v5492_v51 = vld [vmem:[%s10766_s11 + $0xa00] sm:$0xff]  ;;  %v5447_v32 = vld [vmem:[%s10766_s11 + $0x898] sm:$0xff] }
 0x90b   : > { %6661 = vmatprep.subr.bf16.mxu1 %v6660_v42  ;;  %6525 = vmatprep.subr.bf16.mxu0 %v6524_v4  ;;  %v5496_v42 = vld [vmem:[%s10766_s11 + $0xa20] sm:$0xff]  ;;  %v6696_v4 = vpack.c.bf16 %v5505_v55, %v5501_v53  ;;  %v5451_v45 = vld [vmem:[%s10766_s11 + $0x8b8] sm:$0xff] }
 0x90c   : > { %v6694_v2 = vpack.c.bf16 %v5496_v42, %v5492_v51  ;;  %v5446_v51 = vld [vmem:[%s10766_s11 + $0x890] sm:$0xff]  ;;  %v5455_v53 = vld [vmem:[%s10766_s11 + $0x8d8] sm:$0xff] }
 0x90d   : > { %4017 = vmatmul.mubr.f32.vlgmr.msra.gmra.mrb[84].mxu1 %v9777_v31  ;;  %v5453_v31 = vld [vmem:[%s10766_s11 + $0x8c8] sm:$0xff]  ;;  %v5450_v42 = vld [vmem:[%s10766_s11 + $0x8b0] sm:$0xff]  ;;  %v5459_v55 = vld [vmem:[%s10766_s11 + $0x8f8] sm:$0xff] }
 0x90e   : > { %4022 = vmatprep.mubr.f32.mxu1 %v9800_v56  ;;  %6663 = vmatpush1.bf16.msra.mxu1 %v6662_v60  ;;  %v5457_v56 = vld [vmem:[%s10766_s11 + $0x8e8] sm:$0xff]  ;;  %v6700_v60 = vpack.c.bf16 %v5513_v7, %v5509_v62  ;;  %v5463_v62 = vld [vmem:[%s10766_s11 + $0x918] sm:$0xff] }
 0x90f   : > { %6665 = vmatprep.subr.bf16.mxu1 %v6664_v12  ;;  %6527 = vmatpush1.bf16.msra.mxu0 %v6526_v10  ;;  %v6672_v23 = vpack.c.bf16 %v5457_v56, %v5453_v31  ;;  %v5508_v12 = vld [vmem:[%s10766_s11 + $0xa80] sm:$0xff]  ;;  %v5533_v31 = vld [vmem:[%s10766_s11 + $0xb48] sm:$0xff]  ;;  %v5467_v7 = vld [vmem:[%s10766_s11 + $0x938] sm:$0xff] }
 0x910   : > { %6529 = vmatprep.subr.bf16.mxu0 %v6528_v46  ;;  %v6702_v10 = vpack.c.bf16 %v5512_v33, %v5508_v12  ;;  %v5516_v46 = vld [vmem:[%s10766_s11 + $0xac0] sm:$0xff]  ;;  %v5537_v56 = vld [vmem:[%s10766_s11 + $0xb68] sm:$0xff]  ;;  %v5466_v12 = vld [vmem:[%s10766_s11 + $0x930] sm:$0xff] }
 0x911   : > { %4023 = vmatmul.mubr.f32.gmra.mrb[86].mxu1 %v9792_v58  ;;  %v5465_v58 = vld [vmem:[%s10766_s11 + $0x928] sm:$0xff]  ;;  %v5471_v33 = vld [vmem:[%s10766_s11 + $0x958] sm:$0xff] }
 0x912   : > { %6667 = vmatpush1.bf16.msra.mxu1 %v6666_v17  ;;  %4222 = vmatprep.mubr.f32.mxu1 %v9896_v59  ;;  %v6676_v25 = vpack.c.bf16 %v5465_v58, %v5461_v3  ;;  %v5529_v17 = vld [vmem:[%s10766_s11 + $0xb28] sm:$0xff] }
 0x913   : > { %6669 = vmatprep.subr.bf16.mxu1 %v6668_v18  ;;  %6531 = vmatpush1.bf16.msra.mxu0 %v6530_v5  ;;  %v6706_v18 = vpack.c.bf16 %v5520_v16, %v5516_v46  ;;  %v6708_v11 = vpack.c.bf16 %v5529_v17, %v5525_v34  ;;  %v5528_v5 = vld [vmem:[%s10766_s11 + $0xb20] sm:$0xff]  ;;  %v5541_v3 = vld [vmem:[%s10766_s11 + $0xb88] sm:$0xff]  ;;  %v5474_v46 = vld [vmem:[%s10766_s11 + $0x970] sm:$0xff] }
 0x914   : > { %v5545_v58 = vld [vmem:[%s10766_s11 + $0xba8] sm:$0xff]  ;;  %v5479_v16 = vld [vmem:[%s10766_s11 + $0x998] sm:$0xff] }
 0x915   : > { %v5483_v34 = vld [vmem:[%s10766_s11 + $0x9b8] sm:$0xff] }
 0x916   : > { %6671 = vmatpush1.bf16.msra.mxu1 %v6670_v21  ;;  %3863 = vmatmul.mubr.f32.vlgmr.msra.gmra.mrb[60].mxu0 %v9828_v29  ;;  %v5473_v29 = vld [vmem:[%s10766_s11 + $0x968] sm:$0xff]  ;;  %v6710_v21 = vpack.c.bf16 %v5528_v5, %v5524_v49  ;;  %v5482_v49 = vld [vmem:[%s10766_s11 + $0x9b0] sm:$0xff]  ;;  %v5487_v5 = vld [vmem:[%s10766_s11 + $0x9d8] sm:$0xff] }
 0x917   : > { %6673 = vmatprep.subr.bf16.mxu1 %v6672_v23  ;;  %3868 = vmatprep.mubr.f32.mxu0 %v9866_v20  ;;  %v6680_v57 = vpack.c.bf16 %v5473_v29, %v5469_v28  ;;  %v5472_v20 = vld [vmem:[%s10766_s11 + $0x960] sm:$0xff]  ;;  %v6712_v23 = vpack.c.bf16 %v5537_v56, %v5533_v31  ;;  %v5549_v28 = vld [vmem:[%s10766_s11 + $0xbc8] sm:$0xff]  ;;  %v5491_v31 = vld [vmem:[%s10766_s11 + $0x9f8] sm:$0xff] }
 0x918   : > { %v5553_v29 = vld [vmem:[%s10766_s11 + $0xbe8] sm:$0xff] }
 0x91a   : > { %6675 = vmatpush1.bf16.msra.mxu1 %v6674_v36  ;;  %3869 = vmatmul.mubr.f32.gmra.mrb[62].mxu0 %v9855_v30  ;;  %v6682_v30 = vpack.c.bf16 %v5472_v20, %v5468_v0  ;;  %v6714_v36 = vpack.c.bf16 %v5536_v24, %v5532_v38  ;;  %v5548_v0 = vld [vmem:[%s10766_s11 + $0xbc0] sm:$0xff]  ;;  %v5490_v38 = vld [vmem:[%s10766_s11 + $0x9f0] sm:$0xff]  ;;  %v5495_v24 = vld [vmem:[%s10766_s11 + $0xa18] sm:$0xff] }
 0x91b   : > { %6677 = vmatprep.subr.bf16.mxu1 %v6676_v25  ;;  %v6716_v25 = vpack.c.bf16 %v5545_v58, %v5541_v3  ;;  %v5552_v20 = vld [vmem:[%s10766_s11 + $0xbe0] sm:$0xff]  ;;  %v5499_v3 = vld [vmem:[%s10766_s11 + $0xa38] sm:$0xff] }
 0x91e   : > { %6679 = vmatpush1.bf16.msra.mxu1 %v6678_v54  ;;  %v6718_v54 = vpack.c.bf16 %v5544_v47, %v5540_v61  ;;  %v5498_v61 = vld [vmem:[%s10766_s11 + $0xa30] sm:$0xff]  ;;  %v5503_v47 = vld [vmem:[%s10766_s11 + $0xa58] sm:$0xff] }
 0x91f   : > { %6681 = vmatprep.subr.bf16.mxu1 %v6680_v57  ;;  %v6720_v57 = vpack.c.bf16 %v5553_v29, %v5549_v28  ;;  %v5507_v28 = vld [vmem:[%s10766_s11 + $0xa78] sm:$0xff] }
 0x922   : > { %6683 = vmatpush1.bf16.msra.mxu1 %v6682_v30  ;;  %v6722_v30 = vpack.c.bf16 %v5552_v20, %v5548_v0  ;;  %v5506_v0 = vld [vmem:[%s10766_s11 + $0xa70] sm:$0xff]  ;;  %v5511_v20 = vld [vmem:[%s10766_s11 + $0xa98] sm:$0xff] }
 0x923   : > { %6685 = vmatprep.subr.bf16.mxu1 %v6684_v15  ;;  %v6724_v15 = vpack.c.bf16 %v5435_v14, %v5431_v9  ;;  %v5515_v9 = vld [vmem:[%s10766_s11 + $0xab8] sm:$0xff] }
 0x926   : > { %6687 = vmatpush1.bf16.msra.mxu1 %v6686_v40  ;;  %v6726_v40 = vpack.c.bf16 %v5434_v41, %v5430_v19  ;;  %v5514_v19 = vld [vmem:[%s10766_s11 + $0xab0] sm:$0xff]  ;;  %v5519_v41 = vld [vmem:[%s10766_s11 + $0xad8] sm:$0xff] }
 0x927   : > { %6689 = vmatprep.subr.bf16.mxu1 %v6688_v43  ;;  %v6728_v43 = vpack.c.bf16 %v5443_v39, %v5439_v26  ;;  %v5523_v26 = vld [vmem:[%s10766_s11 + $0xaf8] sm:$0xff] }
 0x92a   : > { %6691 = vmatpush1.bf16.msra.mxu1 %v6690_v48  ;;  %v6730_v48 = vpack.c.bf16 %v5442_v44, %v5438_v63  ;;  %v5522_v63 = vld [vmem:[%s10766_s11 + $0xaf0] sm:$0xff]  ;;  %v5527_v44 = vld [vmem:[%s10766_s11 + $0xb18] sm:$0xff] }
 0x92b   : > { %6693 = vmatprep.subr.bf16.mxu1 %v6692_v50  ;;  %v6732_v50 = vpack.c.bf16 %v5451_v45, %v5447_v32  ;;  %v5531_v32 = vld [vmem:[%s10766_s11 + $0xb38] sm:$0xff] }
 0x92e   : > { %6695 = vmatpush1.bf16.msra.mxu1 %v6694_v2  ;;  %v6734_v2 = vpack.c.bf16 %v5450_v42, %v5446_v51  ;;  %v5530_v51 = vld [vmem:[%s10766_s11 + $0xb30] sm:$0xff]  ;;  %v5535_v42 = vld [vmem:[%s10766_s11 + $0xb58] sm:$0xff] }
 0x92f   : > { %6697 = vmatprep.subr.bf16.mxu1 %v6696_v4  ;;  %v6736_v4 = vpack.c.bf16 %v5459_v55, %v5455_v53  ;;  %v5539_v53 = vld [vmem:[%s10766_s11 + $0xb78] sm:$0xff] }
 0x932   : > { %6699 = vmatpush1.bf16.msra.mxu1 %v6698_v1  ;;  %v6740_v1 = vpack.c.bf16 %v5467_v7, %v5463_v62  ;;  %v5547_v62 = vld [vmem:[%s10766_s11 + $0xbb8] sm:$0xff] }
 0x933   : > { %6701 = vmatprep.subr.bf16.mxu1 %v6700_v60  ;;  %v5462_v60 = vld [vmem:[%s10766_s11 + $0x910] sm:$0xff] }
 0x934   : > { %v6742_v13 = vpack.c.bf16 %v5466_v12, %v5462_v60  ;;  %v5546_v60 = vld [vmem:[%s10766_s11 + $0xbb0] sm:$0xff]  ;;  %v5551_v12 = vld [vmem:[%s10766_s11 + $0xbd8] sm:$0xff] }
 0x936   : > { %6703 = vmatpush1.bf16.msra.mxu1 %v6702_v10  ;;  %v6744_v10 = vpack.c.bf16 %v5475_v8, %v5471_v33  ;;  %v5555_v33 = vld [vmem:[%s10766_s11 + $0xbf8] sm:$0xff] }
 0x937   : > { %6705 = vmatprep.subr.bf16.mxu1 %v6704_v52  ;;  %v5470_v52 = vld [vmem:[%s10766_s11 + $0x950] sm:$0xff] }
 0x938   : > { %v6746_v17 = vpack.c.bf16 %v5474_v46, %v5470_v52  ;;  %v5554_v52 = vld [vmem:[%s10766_s11 + $0xbf0] sm:$0xff] }
 0x93a   : > { %6707 = vmatpush1.bf16.msra.mxu1 %v6706_v18  ;;  %v6748_v18 = vpack.c.bf16 %v5483_v34, %v5479_v16 }
 0x93b   : > { %6709 = vmatprep.subr.bf16.mxu1 %v6708_v11  ;;  %v5478_v11 = vld [vmem:[%s10766_s11 + $0x990] sm:$0xff] }
 0x93c   : > { %v6750_v56 = vpack.c.bf16 %v5482_v49, %v5478_v11 }
 0x93e   : > { %6711 = vmatpush1.bf16.msra.mxu1 %v6710_v21  ;;  %v6752_v21 = vpack.c.bf16 %v5491_v31, %v5487_v5 }
 0x93f   : > { %6713 = vmatprep.subr.bf16.mxu1 %v6712_v23  ;;  %v5486_v23 = vld [vmem:[%s10766_s11 + $0x9d0] sm:$0xff] }
 0x940   : > { %v6754_v58 = vpack.c.bf16 %v5490_v38, %v5486_v23 }
 0x942   : > { %6715 = vmatpush1.bf16.msra.mxu1 %v6714_v36  ;;  %v6756_v36 = vpack.c.bf16 %v5499_v3, %v5495_v24 }
 0x943   : > { %6717 = vmatprep.subr.bf16.mxu1 %v6716_v25  ;;  %v5494_v25 = vld [vmem:[%s10766_s11 + $0xa10] sm:$0xff] }
 0x944   : > { %v6758_v29 = vpack.c.bf16 %v5498_v61, %v5494_v25 }
 0x946   : > { %6719 = vmatpush1.bf16.msra.mxu1 %v6718_v54  ;;  %v6760_v54 = vpack.c.bf16 %v5507_v28, %v5503_v47 }
 0x947   : > { %6721 = vmatprep.subr.bf16.mxu1 %v6720_v57  ;;  %v5502_v57 = vld [vmem:[%s10766_s11 + $0xa50] sm:$0xff] }
 0x948   : > { %v6762_v14 = vpack.c.bf16 %v5506_v0, %v5502_v57 }
 0x94a   : > { %6723 = vmatpush1.bf16.msra.mxu1 %v6722_v30  ;;  %v6764_v30 = vpack.c.bf16 %v5515_v9, %v5511_v20 }
 0x94b   : > { %6725 = vmatprep.subr.bf16.mxu1 %v6724_v15  ;;  %v5510_v15 = vld [vmem:[%s10766_s11 + $0xa90] sm:$0xff] }
 0x94c   : > { %v6766_v39 = vpack.c.bf16 %v5514_v19, %v5510_v15 }
 0x94d   : > { %4223 = vmatmul.mubr.f32.vlgmr.msra.gmra.mrb[80].mxu1 %v9885_v27 }
 0x94e   : > { %6727 = vmatpush1.bf16.msra.mxu1 %v6726_v40  ;;  %4228 = vmatprep.mubr.f32.mxu1 %v9924_v37  ;;  %v6768_v40 = vpack.c.bf16 %v5523_v26, %v5519_v41 }
 0x94f   : > { %6729 = vmatprep.subr.bf16.mxu1 %v6728_v43  ;;  %v5518_v43 = vld [vmem:[%s10766_s11 + $0xad0] sm:$0xff] }
 0x950   : > { %v6770_v45 = vpack.c.bf16 %v5522_v63, %v5518_v43 }
 0x951   : > { %4229 = vmatmul.mubr.f32.gmra.mrb[82].mxu1 %v9913_v35 }
 0x952   : > { %6731 = vmatpush1.bf16.msra.mxu1 %v6730_v48  ;;  %4299 = vmatprep.mubr.f32.mxu1 %v9896_v59  ;;  %v6738_v59 = vpack.c.bf16 %v5458_v6, %v5454_v22  ;;  %v6772_v48 = vpack.c.bf16 %v5531_v32, %v5527_v44  ;;  %v5538_v22 = vld [vmem:[%s10766_s11 + $0xb70] sm:$0xff]  ;;  %v5543_v6 = vld [vmem:[%s10766_s11 + $0xb98] sm:$0xff] }
 0x953   : > { %6733 = vmatprep.subr.bf16.mxu1 %v6732_v50  ;;  %v5526_v50 = vld [vmem:[%s10766_s11 + $0xb10] sm:$0xff] }
 0x954   : > { %v6774_v55 = vpack.c.bf16 %v5530_v51, %v5526_v50 }
 0x956   : > { %6735 = vmatpush1.bf16.msra.mxu1 %v6734_v2  ;;  %v6776_v2 = vpack.c.bf16 %v5539_v53, %v5535_v42 }
 0x957   : > { %6737 = vmatprep.subr.bf16.mxu1 %v6736_v4  ;;  %v5534_v4 = vld [vmem:[%s10766_s11 + $0xb50] sm:$0xff] }
 0x958   : > { %v6778_v7 = vpack.c.bf16 %v5538_v22, %v5534_v4 }
 0x95a   : > { %6739 = vmatpush1.bf16.msra.mxu1 %v6738_v59  ;;  %v6780_v59 = vpack.c.bf16 %v5547_v62, %v5543_v6 }
 0x95b   : > { %6741 = vmatprep.subr.bf16.mxu1 %v6740_v1  ;;  %v5542_v1 = vld [vmem:[%s10766_s11 + $0xb90] sm:$0xff] }
 0x95c   : > { %v6782_v8 = vpack.c.bf16 %v5546_v60, %v5542_v1 }
 0x95e   : > { %6743 = vmatpush1.bf16.msra.mxu1 %v6742_v13  ;;  %v6784_v13 = vpack.c.bf16 %v5555_v33, %v5551_v12 }
 0x95f   : > { %6745 = vmatprep.subr.bf16.mxu1 %v6744_v10  ;;  %v5550_v10 = vld [vmem:[%s10766_s11 + $0xbd0] sm:$0xff] }
 0x960   : > { %v6786_v46 = vpack.c.bf16 %v5554_v52, %v5550_v10 }
 0x962   : > { %6747 = vmatpush1.bf16.msra.mxu1 %v6746_v17 }
 0x963   : > { %6749 = vmatprep.subr.bf16.mxu1 %v6748_v18 }
 0x966   : > { %6751 = vmatpush1.bf16.msra.mxu1 %v6750_v56 }
 0x967   : > { %6753 = vmatprep.subr.bf16.mxu1 %v6752_v21 }
 0x96a   : > { %6755 = vmatpush1.bf16.msra.mxu1 %v6754_v58 }
 0x96b   : > { %6757 = vmatprep.subr.bf16.mxu1 %v6756_v36  ;;  %v4330_v36 = vpop.permute.xlu0 %4329 }
 0x96e   : > { %6759 = vmatpush1.bf16.msra.mxu1 %v6758_v29 }
 0x96f   : > { %6761 = vmatprep.subr.bf16.mxu1 %v6760_v54 }
 0x972   : > { %6763 = vmatpush1.bf16.msra.mxu1 %v6762_v14 }
 0x973   : > { %6765 = vmatprep.subr.bf16.mxu1 %v6764_v30 }
 0x976   : > { %6767 = vmatpush1.bf16.msra.mxu1 %v6766_v39 }
 0x977   : > { %6769 = vmatprep.subr.bf16.mxu1 %v6768_v40 }
 0x97a   : > { %6771 = vmatpush1.bf16.msra.mxu1 %v6770_v45 }
 0x97b   : > { %6773 = vmatprep.subr.bf16.mxu1 %v6772_v48 }
 0x97e   : > { %6775 = vmatpush1.bf16.msra.mxu1 %v6774_v55 }
 0x97f   : > { %6777 = vmatprep.subr.bf16.mxu1 %v6776_v2 }
 0x982   : > { %6779 = vmatpush1.bf16.msra.mxu1 %v6778_v7 }
 0x983   : > { %6781 = vmatprep.subr.bf16.mxu1 %v6780_v59 }
 0x986   : > { %6783 = vmatpush1.bf16.msra.mxu1 %v6782_v8 }
 0x987   : > { %6785 = vmatprep.subr.bf16.mxu1 %v6784_v13 }
 0x98a   : > { %6787 = vmatpush1.bf16.msra.mxu1 %v6786_v46 }
 0x98d   : > { %4300 = vmatmul.mubr.f32.vlgmr.msra.gmra.mrb[84].mxu1 %v9885_v27  ;;  %v4325_v27 = vpop.permute.xlu1 %4324 }
 0x98e   : > { %4305 = vmatprep.mubr.f32.mxu1 %v9924_v37 }
 0x991   : > { %4306 = vmatmul.mubr.f32.gmra.mrb[86].mxu1 %v9913_v35 }
 0x9a8   : > { %v3787_v16 = vpop.f32.mrb[56].mxu0 }
 0x9a9   : > { %v3789_v34 = vpop.f32.mrb[57].mxu0 }
 0x9ac   : > { %v3793_v17 = vpop.f32.mrb[58].mxu0 }
 0x9ad   : > { %v3795_v18 = vpop.f32.mrb[59].mxu0 }
 0x9e9   : > { %v3864_v11 = vpop.f32.mrb[60].mxu0 }
 0x9ea   : > { %v3866_v49 = vpop.f32.mrb[61].mxu0 }
 0x9ed   : > { %v3870_v5 = vpop.f32.mrb[62].mxu0 }
 0x9ee   : > { %v3872_v31 = vpop.f32.mrb[63].mxu0 }
 0xa20   : > { %v4224_v56 = vpop.f32.mrb[80].mxu1 }
 0xa21   : > { %v6788_v21 = vadd.f32 %v4224_v56, %v3787_v16  ;;  %v4226_v23 = vpop.f32.mrb[81].mxu1 }
 0xa22   : > { %v6789_v35 = vadd.f32 %v4226_v23, %v3789_v34 }
 0xa23   : > { %v4332_v37 = vadd.f32 %v6788_v21, %v4325_v27 }
 0xa24   : > { %v4333_v38 = vadd.f32 %v6789_v35, %v4325_v27  ;;  %v4230_v24 = vpop.f32.mrb[82].mxu1 }
 0xa25   : > { %4350 = vst.msk [vmem:[%s10566_s24] sm:$0xff] %vm451_vm0, %v4332_v37  ;;  %v6790_v3 = vadd.f32 %v4230_v24, %v3793_v17  ;;  %4356 = vrot.lane.b32.xlu1 %v4332_v37, %s6893_s21  ;;  %v4232_v58 = vpop.f32.mrb[83].mxu1 }
 0xa26   : > { %5570 = vst.msk [vmem:[%s10566_s24 + $0x80] sm:$0xff] %vm451_vm0, %v4333_v38  ;;  %v6791_v25 = vadd.f32 %v4232_v58, %v3795_v18 }
 0xa27   : > { %v4336_v61 = vadd.f32 %v6790_v3, %v4330_v36 }
 0xa28   : > { %v4337_v47 = vadd.f32 %v6791_v25, %v4330_v36 }
 0xa29   : > { %4351 = vst.msk [vmem:[%s10566_s24 + $0x8] sm:$0xff] %vm451_vm0, %v4336_v61  ;;  %4369 = vrot.lane.b32.xlu1 %v4332_v37, %s6892_s20  ;;  %4358 = vrot.lane.b32.xlu0 %v4336_v61, %s6893_s21 }
 0xa2a   : > { %5571 = vst.msk [vmem:[%s10566_s24 + $0x88] sm:$0xff] %vm451_vm0, %v4337_v47 }
 0xa2d   : > { %4382 = vrot.lane.b32.xlu1 %v4332_v37, %s6891_s19  ;;  %4371 = vrot.lane.b32.xlu0 %v4336_v61, %s6892_s20 }
 0xa31   : > { %4395 = vrot.lane.b32.xlu1 %v4332_v37, %s10777_s27  ;;  %4384 = vrot.lane.b32.xlu0 %v4336_v61, %s6891_s19 }
 0xa35   : > { %4408 = vrot.lane.b32.xlu1 %v4332_v37, %s10778_s28  ;;  %4397 = vrot.lane.b32.xlu0 %v4336_v61, %s10777_s27 }
 0xa39   : > { %4421 = vrot.lane.b32.xlu1 %v4332_v37, %s10779_s26  ;;  %4410 = vrot.lane.b32.xlu0 %v4336_v61, %s10778_s28 }
 0xa3d   : > { %4434 = vrot.lane.b32.xlu1 %v4332_v37, %s10780_s29  ;;  %4423 = vrot.lane.b32.xlu0 %v4336_v61, %s10779_s26 }
 0xa41   : > { %4452 = vrot.lane.b32.xlu1 %v4333_v38, %s6893_s21  ;;  %4436 = vrot.lane.b32.xlu0 %v4336_v61, %s10780_s29 }
 0xa45   : > { %4465 = vrot.lane.b32.xlu1 %v4333_v38, %s6892_s20  ;;  %4454 = vrot.lane.b32.xlu0 %v4337_v47, %s6893_s21 }
 0xa49   : > { %4478 = vrot.lane.b32.xlu1 %v4333_v38, %s6891_s19  ;;  %4467 = vrot.lane.b32.xlu0 %v4337_v47, %s6892_s20 }
 0xa4d   : > { %4491 = vrot.lane.b32.xlu1 %v4333_v38, %s10777_s27  ;;  %4480 = vrot.lane.b32.xlu0 %v4337_v47, %s6891_s19 }
 0xa51   : > { %4504 = vrot.lane.b32.xlu1 %v4333_v38, %s10778_s28  ;;  %4493 = vrot.lane.b32.xlu0 %v4337_v47, %s10777_s27 }
 0xa55   : > { %4517 = vrot.lane.b32.xlu1 %v4333_v38, %s10779_s26  ;;  %4506 = vrot.lane.b32.xlu0 %v4337_v47, %s10778_s28 }
 0xa59   : > { %4530 = vrot.lane.b32.xlu1 %v4333_v38, %s10780_s29  ;;  %4519 = vrot.lane.b32.xlu0 %v4337_v47, %s10779_s26 }
 0xa5d   : > { %4532 = vrot.lane.b32.xlu0 %v4337_v47, %s10780_s29 }
 0xa60   : > { %v4301_v28 = vpop.f32.mrb[84].mxu1 }
 0xa61   : > { %v6792_v29 = vadd.f32 %v4301_v28, %v3864_v11  ;;  %v4303_v54 = vpop.f32.mrb[85].mxu1 }
 0xa62   : > { %v6793_v57 = vadd.f32 %v4303_v54, %v3866_v49 }
 0xa63   : > { %v4334_v0 = vadd.f32 %v6792_v29, %v4325_v27 }
 0xa64   : > { %v4335_v20 = vadd.f32 %v6793_v57, %v4325_v27  ;;  %v4307_v9 = vpop.f32.mrb[86].mxu1 }
 0xa65   : > { %5586 = vst.msk [vmem:[%s10566_s24 + $0x100] sm:$0xff] %vm451_vm0, %v4334_v0  ;;  %v6794_v14 = vadd.f32 %v4307_v9, %v3870_v5  ;;  %4548 = vrot.lane.b32.xlu1 %v4334_v0, %s6893_s21  ;;  %v4309_v30 = vpop.f32.mrb[87].mxu1 }
 0xa66   : > { %5602 = vst.msk [vmem:[%s10566_s24 + $0x180] sm:$0xff] %vm451_vm0, %v4335_v20  ;;  %v6795_v15 = vadd.f32 %v4309_v30, %v3872_v31 }
 0xa67   : > { %v4338_v19 = vadd.f32 %v6794_v14, %v4330_v36 }
 0xa68   : > { %v4339_v41 = vadd.f32 %v6795_v15, %v4330_v36 }
 0xa69   : > { %5587 = vst.msk [vmem:[%s10566_s24 + $0x108] sm:$0xff] %vm451_vm0, %v4338_v19  ;;  %4561 = vrot.lane.b32.xlu1 %v4334_v0, %s6892_s20  ;;  %4550 = vrot.lane.b32.xlu0 %v4338_v19, %s6893_s21 }
 0xa6a   : > { %5603 = vst.msk [vmem:[%s10566_s24 + $0x188] sm:$0xff] %vm451_vm0, %v4339_v41 }
 0xa6d   : > { %4574 = vrot.lane.b32.xlu1 %v4334_v0, %s6891_s19  ;;  %4563 = vrot.lane.b32.xlu0 %v4338_v19, %s6892_s20 }
 0xa71   : > { %4587 = vrot.lane.b32.xlu1 %v4334_v0, %s10777_s27  ;;  %4576 = vrot.lane.b32.xlu0 %v4338_v19, %s6891_s19 }
 0xa75   : > { %4600 = vrot.lane.b32.xlu1 %v4334_v0, %s10778_s28  ;;  %4589 = vrot.lane.b32.xlu0 %v4338_v19, %s10777_s27 }
 0xa79   : > { %4613 = vrot.lane.b32.xlu1 %v4334_v0, %s10779_s26  ;;  %4602 = vrot.lane.b32.xlu0 %v4338_v19, %s10778_s28 }
 0xa7d   : > { %4626 = vrot.lane.b32.xlu1 %v4334_v0, %s10780_s29  ;;  %4615 = vrot.lane.b32.xlu0 %v4338_v19, %s10779_s26 }
 0xa81   : > { %4644 = vrot.lane.b32.xlu1 %v4335_v20, %s6893_s21  ;;  %4628 = vrot.lane.b32.xlu0 %v4338_v19, %s10780_s29 }
 0xa85   : > { %4657 = vrot.lane.b32.xlu1 %v4335_v20, %s6892_s20  ;;  %4646 = vrot.lane.b32.xlu0 %v4339_v41, %s6893_s21 }
 0xa89   : > { %4670 = vrot.lane.b32.xlu1 %v4335_v20, %s6891_s19  ;;  %4659 = vrot.lane.b32.xlu0 %v4339_v41, %s6892_s20 }
 0xa8d   : > { %4683 = vrot.lane.b32.xlu1 %v4335_v20, %s10777_s27  ;;  %4672 = vrot.lane.b32.xlu0 %v4339_v41, %s6891_s19 }
 0xa91   : > { %4696 = vrot.lane.b32.xlu1 %v4335_v20, %s10778_s28  ;;  %4685 = vrot.lane.b32.xlu0 %v4339_v41, %s10777_s27 }
 0xa95   : > { %4709 = vrot.lane.b32.xlu1 %v4335_v20, %s10779_s26  ;;  %4698 = vrot.lane.b32.xlu0 %v4339_v41, %s10778_s28 }
 0xa97   : > { %v4357_v26 = vpop.permute.xlu1 %4356 }
 0xa98   : > { %5556 = vst.msk [vmem:[%s10566_s24 + $0x10] sm:$0xff] %vm451_vm0, %v4357_v26 }
 0xa99   : > { %4722 = vrot.lane.b32.xlu1 %v4335_v20, %s10780_s29  ;;  %4711 = vrot.lane.b32.xlu0 %v4339_v41, %s10779_s26 }
 0xa9b   : > { %v4370_v39 = vpop.permute.xlu1 %4369  ;;  %v4359_v40 = vpop.permute.xlu0 %4358 }
 0xa9c   : > { %5558 = vst.msk [vmem:[%s10566_s24 + $0x20] sm:$0xff] %vm451_vm0, %v4370_v39  ;;  %5557 = vst.msk [vmem:[%s10566_s24 + $0x18] sm:$0xff] %vm451_vm0, %v4359_v40 }
 0xa9d   : > { %4724 = vrot.lane.b32.xlu0 %v4339_v41, %s10780_s29 }
 0xa9f   : > { %v4383_v43 = vpop.permute.xlu1 %4382  ;;  %v4372_v63 = vpop.permute.xlu0 %4371 }
 0xaa0   : > { %5560 = vst.msk [vmem:[%s10566_s24 + $0x30] sm:$0xff] %vm451_vm0, %v4383_v43  ;;  %5559 = vst.msk [vmem:[%s10566_s24 + $0x28] sm:$0xff] %vm451_vm0, %v4372_v63 }
 0xaa3   : > { %v4396_v44 = vpop.permute.xlu1 %4395  ;;  %v4385_v32 = vpop.permute.xlu0 %4384 }
 0xaa4   : > { %5562 = vst.msk [vmem:[%s10566_s24 + $0x40] sm:$0xff] %vm451_vm0, %v4396_v44  ;;  %5561 = vst.msk [vmem:[%s10566_s24 + $0x38] sm:$0xff] %vm451_vm0, %v4385_v32 }
 0xaa7   : > { %v4409_v45 = vpop.permute.xlu1 %4408  ;;  %v4398_v48 = vpop.permute.xlu0 %4397 }
 0xaa8   : > { %5564 = vst.msk [vmem:[%s10566_s24 + $0x50] sm:$0xff] %vm451_vm0, %v4409_v45  ;;  %5563 = vst.msk [vmem:[%s10566_s24 + $0x48] sm:$0xff] %vm451_vm0, %v4398_v48 }
 0xaab   : > { %v4422_v50 = vpop.permute.xlu1 %4421  ;;  %v4411_v51 = vpop.permute.xlu0 %4410 }
 0xaac   : > { %5566 = vst.msk [vmem:[%s10566_s24 + $0x60] sm:$0xff] %vm451_vm0, %v4422_v50  ;;  %5565 = vst.msk [vmem:[%s10566_s24 + $0x58] sm:$0xff] %vm451_vm0, %v4411_v51 }
 0xaaf   : > { %v4435_v42 = vpop.permute.xlu1 %4434  ;;  %v4424_v53 = vpop.permute.xlu0 %4423 }
 0xab0   : > { %5568 = vst.msk [vmem:[%s10566_s24 + $0x70] sm:$0xff] %vm451_vm0, %v4435_v42  ;;  %5567 = vst.msk [vmem:[%s10566_s24 + $0x68] sm:$0xff] %vm451_vm0, %v4424_v53 }
 0xab3   : > { %v4453_v55 = vpop.permute.xlu1 %4452  ;;  %v4437_v2 = vpop.permute.xlu0 %4436 }
 0xab4   : > { %5572 = vst.msk [vmem:[%s10566_s24 + $0x90] sm:$0xff] %vm451_vm0, %v4453_v55  ;;  %5569 = vst.msk [vmem:[%s10566_s24 + $0x78] sm:$0xff] %vm451_vm0, %v4437_v2 }
 0xab7   : > { %v4466_v4 = vpop.permute.xlu1 %4465  ;;  %v4455_v22 = vpop.permute.xlu0 %4454 }
 0xab8   : > { %5574 = vst.msk [vmem:[%s10566_s24 + $0xa0] sm:$0xff] %vm451_vm0, %v4466_v4  ;;  %5573 = vst.msk [vmem:[%s10566_s24 + $0x98] sm:$0xff] %vm451_vm0, %v4455_v22 }
 0xabb   : > { %v4479_v6 = vpop.permute.xlu1 %4478  ;;  %v4468_v62 = vpop.permute.xlu0 %4467 }
 0xabc   : > { %5576 = vst.msk [vmem:[%s10566_s24 + $0xb0] sm:$0xff] %vm451_vm0, %v4479_v6  ;;  %5575 = vst.msk [vmem:[%s10566_s24 + $0xa8] sm:$0xff] %vm451_vm0, %v4468_v62 }
 0xabf   : > { %v4492_v7 = vpop.permute.xlu1 %4491  ;;  %v4481_v59 = vpop.permute.xlu0 %4480 }
 0xac0   : > { %5578 = vst.msk [vmem:[%s10566_s24 + $0xc0] sm:$0xff] %vm451_vm0, %v4492_v7  ;;  %5577 = vst.msk [vmem:[%s10566_s24 + $0xb8] sm:$0xff] %vm451_vm0, %v4481_v59 }
 0xac3   : > { %v4505_v1 = vpop.permute.xlu1 %4504  ;;  %v4494_v60 = vpop.permute.xlu0 %4493 }
 0xac4   : > { %5580 = vst.msk [vmem:[%s10566_s24 + $0xd0] sm:$0xff] %vm451_vm0, %v4505_v1  ;;  %5579 = vst.msk [vmem:[%s10566_s24 + $0xc8] sm:$0xff] %vm451_vm0, %v4494_v60 }
 0xac7   : > { %v4518_v12 = vpop.permute.xlu1 %4517  ;;  %v4507_v33 = vpop.permute.xlu0 %4506 }
 0xac8   : > { %5582 = vst.msk [vmem:[%s10566_s24 + $0xe0] sm:$0xff] %vm451_vm0, %v4518_v12  ;;  %5581 = vst.msk [vmem:[%s10566_s24 + $0xd8] sm:$0xff] %vm451_vm0, %v4507_v33 }
 0xacb   : > { %v4531_v8 = vpop.permute.xlu1 %4530  ;;  %v4520_v13 = vpop.permute.xlu0 %4519 }
 0xacc   : > { %5584 = vst.msk [vmem:[%s10566_s24 + $0xf0] sm:$0xff] %vm451_vm0, %v4531_v8  ;;  %5583 = vst.msk [vmem:[%s10566_s24 + $0xe8] sm:$0xff] %vm451_vm0, %v4520_v13 }
 0xacf   : > { %v4533_v10 = vpop.permute.xlu0 %4532 }
 0xad0   : > { %5585 = vst.msk [vmem:[%s10566_s24 + $0xf8] sm:$0xff] %vm451_vm0, %v4533_v10 }
 0xad7   : > { %v4549_v52 = vpop.permute.xlu1 %4548 }
 0xad8   : > { %5588 = vst.msk [vmem:[%s10566_s24 + $0x110] sm:$0xff] %vm451_vm0, %v4549_v52 }
 0xadb   : > { %v4562_v46 = vpop.permute.xlu1 %4561  ;;  %v4551_v16 = vpop.permute.xlu0 %4550 }
 0xadc   : > { %5590 = vst.msk [vmem:[%s10566_s24 + $0x120] sm:$0xff] %vm451_vm0, %v4562_v46  ;;  %5589 = vst.msk [vmem:[%s10566_s24 + $0x118] sm:$0xff] %vm451_vm0, %v4551_v16 }
 0xadf   : > { %v4575_v34 = vpop.permute.xlu1 %4574  ;;  %v4564_v17 = vpop.permute.xlu0 %4563 }
 0xae0   : > { %5592 = vst.msk [vmem:[%s10566_s24 + $0x130] sm:$0xff] %vm451_vm0, %v4575_v34  ;;  %5591 = vst.msk [vmem:[%s10566_s24 + $0x128] sm:$0xff] %vm451_vm0, %v4564_v17 }
 0xae3   : > { %v4588_v18 = vpop.permute.xlu1 %4587  ;;  %v4577_v11 = vpop.permute.xlu0 %4576 }
 0xae4   : > { %5594 = vst.msk [vmem:[%s10566_s24 + $0x140] sm:$0xff] %vm451_vm0, %v4588_v18  ;;  %5593 = vst.msk [vmem:[%s10566_s24 + $0x138] sm:$0xff] %vm451_vm0, %v4577_v11 }
 0xae7   : > { %v4601_v49 = vpop.permute.xlu1 %4600  ;;  %v4590_v5 = vpop.permute.xlu0 %4589 }
 0xae8   : > { %5596 = vst.msk [vmem:[%s10566_s24 + $0x150] sm:$0xff] %vm451_vm0, %v4601_v49  ;;  %5595 = vst.msk [vmem:[%s10566_s24 + $0x148] sm:$0xff] %vm451_vm0, %v4590_v5 }
 0xaeb   : > { %v4614_v31 = vpop.permute.xlu1 %4613  ;;  %v4603_v56 = vpop.permute.xlu0 %4602 }
 0xaec   : > { %5598 = vst.msk [vmem:[%s10566_s24 + $0x160] sm:$0xff] %vm451_vm0, %v4614_v31  ;;  %5597 = vst.msk [vmem:[%s10566_s24 + $0x158] sm:$0xff] %vm451_vm0, %v4603_v56 }
 0xaef   : > { %v4627_v21 = vpop.permute.xlu1 %4626  ;;  %v4616_v23 = vpop.permute.xlu0 %4615 }
 0xaf0   : > { %5600 = vst.msk [vmem:[%s10566_s24 + $0x170] sm:$0xff] %vm451_vm0, %v4627_v21  ;;  %5599 = vst.msk [vmem:[%s10566_s24 + $0x168] sm:$0xff] %vm451_vm0, %v4616_v23 }
 0xaf3   : > { %v4645_v27 = vpop.permute.xlu1 %4644  ;;  %v4629_v35 = vpop.permute.xlu0 %4628 }
 0xaf4   : > { %5604 = vst.msk [vmem:[%s10566_s24 + $0x190] sm:$0xff] %vm451_vm0, %v4645_v27  ;;  %5601 = vst.msk [vmem:[%s10566_s24 + $0x178] sm:$0xff] %vm451_vm0, %v4629_v35 }
 0xaf7   : > { %v4658_v37 = vpop.permute.xlu1 %4657  ;;  %v4647_v38 = vpop.permute.xlu0 %4646 }
 0xaf8   : > { %5606 = vst.msk [vmem:[%s10566_s24 + $0x1a0] sm:$0xff] %vm451_vm0, %v4658_v37  ;;  %5605 = vst.msk [vmem:[%s10566_s24 + $0x198] sm:$0xff] %vm451_vm0, %v4647_v38 }
 0xafb   : > { %v4671_v24 = vpop.permute.xlu1 %4670  ;;  %v4660_v3 = vpop.permute.xlu0 %4659 }
 0xafc   : > { %5608 = vst.msk [vmem:[%s10566_s24 + $0x1b0] sm:$0xff] %vm451_vm0, %v4671_v24  ;;  %5607 = vst.msk [vmem:[%s10566_s24 + $0x1a8] sm:$0xff] %vm451_vm0, %v4660_v3 }
 0xaff   : > { %v4684_v58 = vpop.permute.xlu1 %4683  ;;  %v4673_v36 = vpop.permute.xlu0 %4672 }
 0xb00   : > { %5610 = vst.msk [vmem:[%s10566_s24 + $0x1c0] sm:$0xff] %vm451_vm0, %v4684_v58  ;;  %5609 = vst.msk [vmem:[%s10566_s24 + $0x1b8] sm:$0xff] %vm451_vm0, %v4673_v36 }
 0xb03   : > { %v4697_v25 = vpop.permute.xlu1 %4696  ;;  %v4686_v61 = vpop.permute.xlu0 %4685 }
 0xb04   : > { %5612 = vst.msk [vmem:[%s10566_s24 + $0x1d0] sm:$0xff] %vm451_vm0, %v4697_v25  ;;  %5611 = vst.msk [vmem:[%s10566_s24 + $0x1c8] sm:$0xff] %vm451_vm0, %v4686_v61 }
 0xb07   : > { %v4710_v47 = vpop.permute.xlu1 %4709  ;;  %v4699_v28 = vpop.permute.xlu0 %4698 }
 0xb08   : > { %5614 = vst.msk [vmem:[%s10566_s24 + $0x1e0] sm:$0xff] %vm451_vm0, %v4710_v47  ;;  %5613 = vst.msk [vmem:[%s10566_s24 + $0x1d8] sm:$0xff] %vm451_vm0, %v4699_v28 }
 0xb0b   : > { %v4723_v29 = vpop.permute.xlu1 %4722  ;;  %v4712_v54 = vpop.permute.xlu0 %4711 }
 0xb0c   : > { %5616 = vst.msk [vmem:[%s10566_s24 + $0x1f0] sm:$0xff] %vm451_vm0, %v4723_v29  ;;  %5615 = vst.msk [vmem:[%s10566_s24 + $0x1e8] sm:$0xff] %vm451_vm0, %v4712_v54 }
 0xb0f   : > { %v4725_v57 = vpop.permute.xlu0 %4724 }
 0xb10   : > { %5617 = vst.msk [vmem:[%s10566_s24 + $0x1f8] sm:$0xff] %vm451_vm0, %v4725_v57 }
 0xb11 PF: > { %s23_s25 = sadd.s32 1, %s6885_s25  }
 0xb12   : > { %p20_p4 = scmp.ge.s32.totalorder %s23_s25, 4  }
 0xb14   :  { %22 = sbr.rel (!%p20_p4) target bundleno = 1 (0x1), region = 172 }

</bundles_post_ra>
